<compile_context>
chip_gen: v7x
topology: tpu7x:2x2x1
jax: 0.10.0
libtpu: 0.0.40
codegen_flags: <defaults>
</compile_context>

<pallas_src>
import functools

import jax
import jax.numpy as jnp
from jax.experimental import pallas as pl
from jax.experimental.pallas import tpu as pltpu


NUM_CLASSES = 15
BACKBONE_C = 32
NUM_ANCHORS = 3
POOL = 4
HIDDEN = 128
CP = 128                      # lane-padded channel width used everywhere

_VMEM_LIMIT = 32 * 1024 * 1024


def _round_up(x, m):
    return ((x + m - 1) // m) * m


# ----------------------------------------------------------------------------
# Fully fused forward kernel: one grid step == one image.
# ----------------------------------------------------------------------------
def _fused_kernel(x_ref, wst_ref, bst_ref, wr_ref, br_ref, wh_ref, bh_ref,
                  pm_ref, w6_ref, b6_ref, w7_ref, b7_ref, wpr_ref, bpr_ref,
                  rpn_ref, det_ref, fpad_sc, acc_sc,
                  *, H, W, pool2, pad_top):
    HW = H * W

    # --- backbone stem conv: taps folded into the contraction (wrapper-side
    #     im2col), one (HW,128)@(128,128) MXU pass, bias + ReLU in f32. ---
    feat = jnp.maximum(
        jnp.dot(x_ref[0], wst_ref[...], preferred_element_type=jnp.float32)
        + bst_ref[...],
        0.0,
    )

    # Store the feature into a flat, zero row-padded VMEM scratch so every RPN
    # conv tap is a static sublane-offset window read (no reshape, no im2col
    # copies).  pad_top is a multiple of 8 so the big store stays aligned.
    zeros_pad = jnp.zeros((pad_top, CP), jnp.float32)
    fpad_sc[pl.ds(0, pad_top), :] = zeros_pad
    fpad_sc[pl.ds(pad_top + HW, pad_top), :] = zeros_pad
    fpad_sc[pl.ds(pad_top, HW), :] = feat

    # --- RPN 3x3 conv: 9 shifted-window taps, f32 accumulation in VMEM. ---
    # x-boundary wrap-around is masked; y-boundary reads the zero pad rows.
    col = jax.lax.broadcasted_iota(jnp.int32, (HW, CP), 0) % W   # x coordinate
    not_left_edge = col >= 1          # valid when the tap reads x-1 (dx == 0)
    not_right_edge = col <= W - 2     # valid when the tap reads x+1 (dx == 2)

    acc_sc[...] = jnp.zeros_like(acc_sc)
    for t in range(9):
        dy, dx = t // 3, t % 3
        off = pad_top + (dy - 1) * W + (dx - 1)          # static offset
        tap = fpad_sc[pl.ds(off, HW), :]
        if dx == 0:
            tap = jnp.where(not_left_edge, tap, 0.0)
        elif dx == 2:
            tap = jnp.where(not_right_edge, tap, 0.0)
        acc_sc[...] += jnp.dot(tap.astype(jnp.bfloat16), wr_ref[t],
                               preferred_element_type=jnp.float32)

    rpn_feat = jnp.maximum(acc_sc[...] + br_ref[...], 0.0).astype(jnp.bfloat16)

    # --- fused RPN 1x1 heads: [objectness | bbox deltas], lane-padded to 128,
    #     written as bf16 to halve the (padded) HBM writeback. ---
    rpn_ref[0] = (
        jnp.dot(rpn_feat, wh_ref[...], preferred_element_type=jnp.float32)
        + bh_ref[...]
    ).astype(rpn_ref.dtype)

    # --- simplified RoI average pool (single whole-image proposal) expressed
    #     as a matmul with the constant pooling matrix. ---
    featb = fpad_sc[pl.ds(pad_top, HW), :].astype(jnp.bfloat16)
    pooled = jnp.dot(pm_ref[...], featb,
                     preferred_element_type=jnp.float32)        # (16, 128)

    # --- fused box head: fc6 -> ReLU -> fc7 -> ReLU -> [cls | bbox]. ---
    # fc6 contracts over (pool-cell, channel) without flattening the padded
    # pooled tile: one small dot per pool cell, accumulated in f32.
    pooled_b = pooled.astype(jnp.bfloat16)
    h6 = b6_ref[...]
    for p in range(pool2):
        h6 = h6 + jnp.dot(pooled_b[p:p + 1, :], w6_ref[p],
                          preferred_element_type=jnp.float32)
    h6 = jnp.maximum(h6, 0.0).astype(jnp.bfloat16)
    h7 = jnp.maximum(
        jnp.dot(h6, w7_ref[...], preferred_element_type=jnp.float32)
        + b7_ref[...],
        0.0,
    ).astype(jnp.bfloat16)
    det = (jnp.dot(h7, wpr_ref[...], preferred_element_type=jnp.float32)
           + bpr_ref[...])
    det_ref[0] = jnp.broadcast_to(det, det_ref.shape[1:]).astype(det_ref.dtype)


# ----------------------------------------------------------------------------
# Model definition (miniature FasterRCNN head stack), deterministic params.
# ----------------------------------------------------------------------------
def init_params(key):
    ks = jax.random.split(key, 16)
    s = 0.05

    def w(k, shape):
        return (s * jax.random.normal(k, shape)).astype(jnp.float32)

    return {
        # backbone stem conv: 3 -> BACKBONE_C, 3x3
        "bb_w": w(ks[0], (3, 3, 3, BACKBONE_C)),
        "bb_b": jnp.zeros((BACKBONE_C,), jnp.float32),
        # RPN head conv: BACKBONE_C -> BACKBONE_C, 3x3
        "rpn_w": w(ks[1], (3, 3, BACKBONE_C, BACKBONE_C)),
        "rpn_b": jnp.zeros((BACKBONE_C,), jnp.float32),
        # RPN objectness: 1x1, BACKBONE_C -> NUM_ANCHORS
        "rpn_cls_w": w(ks[2], (BACKBONE_C, NUM_ANCHORS)),
        "rpn_cls_b": jnp.zeros((NUM_ANCHORS,), jnp.float32),
        # RPN bbox deltas: 1x1, BACKBONE_C -> NUM_ANCHORS * 4
        "rpn_box_w": w(ks[3], (BACKBONE_C, NUM_ANCHORS * 4)),
        "rpn_box_b": jnp.zeros((NUM_ANCHORS * 4,), jnp.float32),
        # box head MLP (TwoMLPHead analogue)
        "fc6_w": w(ks[4], (BACKBONE_C * POOL * POOL, HIDDEN)),
        "fc6_b": jnp.zeros((HIDDEN,), jnp.float32),
        "fc7_w": w(ks[5], (HIDDEN, HIDDEN)),
        "fc7_b": jnp.zeros((HIDDEN,), jnp.float32),
        # FastRCNNPredictor (the layer replaced in FasterRCNN.__init__)
        "cls_w": w(ks[6], (HIDDEN, NUM_CLASSES)),
        "cls_b": jnp.zeros((NUM_CLASSES,), jnp.float32),
        "box_w": w(ks[7], (HIDDEN, NUM_CLASSES * 4)),
        "box_b": jnp.zeros((NUM_CLASSES * 4,), jnp.float32),
    }


def faster_rcnn_forward(params, images_nchw):
    """images_nchw: (B, 3, H, W) float32, PyTorch layout."""
    x = jnp.transpose(images_nchw, (0, 2, 3, 1)).astype(jnp.float32)   # NHWC
    B, H, W, Cin = x.shape
    HW = H * W
    assert H % POOL == 0 and W % POOL == 0 and HW % 8 == 0
    assert HIDDEN == CP

    # ---------------- wrapper-side (tiny, one-time) preprocessing -----------
    # Stem im2col on the raw image: K = 9*Cin = 27, lane-padded to 128.
    xp = jnp.pad(x, ((0, 0), (1, 1), (1, 1), (0, 0)))
    patches = [xp[:, dy:dy + H, dx:dx + W, :]
               for dy in range(3) for dx in range(3)]
    k1 = 9 * Cin
    im2col = jnp.stack(patches, axis=3).reshape(B, HW, k1)
    im2col = jnp.pad(im2col, ((0, 0), (0, 0), (0, CP - k1))).astype(jnp.bfloat16)

    # Folded / lane-padded weights.
    w_stem = jnp.pad(params["bb_w"].reshape(k1, BACKBONE_C),
                     ((0, CP - k1), (0, CP - BACKBONE_C))).astype(jnp.bfloat16)
    b_stem = jnp.pad(params["bb_b"].reshape(1, -1),
                     ((0, 0), (0, CP - BACKBONE_C))).astype(jnp.float32)

    w_rpn = jnp.pad(params["rpn_w"].reshape(9, BACKBONE_C, BACKBONE_C),
                    ((0, 0), (0, CP - BACKBONE_C),
                     (0, CP - BACKBONE_C))).astype(jnp.bfloat16)
    b_rpn = jnp.pad(params["rpn_b"].reshape(1, -1),
                    ((0, 0), (0, CP - BACKBONE_C))).astype(jnp.float32)

    nrpn = NUM_ANCHORS * 5                                   # 3 + 12 = 15
    w_rh = jnp.concatenate([params["rpn_cls_w"], params["rpn_box_w"]], axis=1)
    w_rh = jnp.pad(w_rh, ((0, CP - BACKBONE_C),
                          (0, CP - nrpn))).astype(jnp.bfloat16)
    b_rh = jnp.concatenate([params["rpn_cls_b"], params["rpn_box_b"]], axis=0)
    b_rh = jnp.pad(b_rh.reshape(1, -1), ((0, 0), (0, CP - nrpn))).astype(jnp.float32)

    # Constant RoI average-pooling matrix (POOL*POOL, H*W), 1/16 exact in bf16.
    cell = ((jnp.arange(H) // (H // POOL))[:, None] * POOL
            + (jnp.arange(W) // (W // POOL))[None, :]).reshape(HW)
    pmat = (jnp.arange(POOL * POOL)[:, None] == cell[None, :]).astype(jnp.float32)
    pmat = (pmat / float((H // POOL) * (W // POOL))).astype(jnp.bfloat16)

    # fc6 weight regrouped per pool cell so pooled stays in its padded layout.
    w6 = params["fc6_w"].reshape(POOL * POOL, BACKBONE_C, HIDDEN)
    w6 = jnp.pad(w6, ((0, 0), (0, CP - BACKBONE_C), (0, 0))).astype(jnp.bfloat16)
    b6 = params["fc6_b"].reshape(1, HIDDEN).astype(jnp.float32)
    w7 = params["fc7_w"].astype(jnp.bfloat16)
    b7 = params["fc7_b"].reshape(1, HIDDEN).astype(jnp.float32)

    ndet = NUM_CLASSES * 5                                   # 15 + 60 = 75
    w_pred = jnp.concatenate([params["cls_w"], params["box_w"]], axis=1)
    w_pred = jnp.pad(w_pred, ((0, 0), (0, CP - ndet))).astype(jnp.bfloat16)
    b_pred = jnp.concatenate([params["cls_b"], params["box_b"]], axis=0)
    b_pred = jnp.pad(b_pred.reshape(1, -1),
                     ((0, 0), (0, CP - ndet))).astype(jnp.float32)

    # ---------------- single fused pallas_call ------------------------------
    pad_top = _round_up(W + 1, 8)
    pad_rows = 2 * pad_top + HW
    pool2 = POOL * POOL

    flops = 2 * B * (HW * CP * CP * 11 + pool2 * HW * CP
                     + pool2 * CP * CP + 2 * CP * CP)
    bytes_in = (2 * (im2col.size + w_stem.size + w_rpn.size + w_rh.size
                     + pmat.size + w6.size + w7.size + w_pred.size)
                + 4 * (b_stem.size + b_rpn.size + b_rh.size
                       + b6.size + b7.size + b_pred.size))
    bytes_out = 2 * B * HW * CP + 4 * B * 8 * CP
    cost = pl.CostEstimate(flops=flops, transcendentals=0,
                           bytes_accessed=bytes_in + bytes_out)

    kernel = functools.partial(_fused_kernel, H=H, W=W, pool2=pool2,
                               pad_top=pad_top)

    rpn_out, det_out = pl.pallas_call(
        kernel,
        out_shape=(
            jax.ShapeDtypeStruct((B, HW, CP), jnp.bfloat16),   # RPN heads
            jax.ShapeDtypeStruct((B, 8, CP), jnp.float32),     # box head (row 0)
        ),
        grid=(B,),
        in_specs=[
            pl.BlockSpec((1, HW, CP), lambda b: (b, 0, 0)),        # image im2col
            pl.BlockSpec((CP, CP), lambda b: (0, 0)),              # stem w
            pl.BlockSpec((1, CP), lambda b: (0, 0)),               # stem b
            pl.BlockSpec((9, CP, CP), lambda b: (0, 0, 0)),        # rpn conv w
            pl.BlockSpec((1, CP), lambda b: (0, 0)),               # rpn conv b
            pl.BlockSpec((CP, CP), lambda b: (0, 0)),              # rpn head w
            pl.BlockSpec((1, CP), lambda b: (0, 0)),               # rpn head b
            pl.BlockSpec((pool2, HW), lambda b: (0, 0)),           # pool matrix
            pl.BlockSpec((pool2, CP, CP), lambda b: (0, 0, 0)),    # fc6 w
            pl.BlockSpec((1, CP), lambda b: (0, 0)),               # fc6 b
            pl.BlockSpec((CP, CP), lambda b: (0, 0)),              # fc7 w
            pl.BlockSpec((1, CP), lambda b: (0, 0)),               # fc7 b
            pl.BlockSpec((CP, CP), lambda b: (0, 0)),              # predictor w
            pl.BlockSpec((1, CP), lambda b: (0, 0)),               # predictor b
        ],
        out_specs=[
            pl.BlockSpec((1, HW, CP), lambda b: (b, 0, 0)),
            pl.BlockSpec((1, 8, CP), lambda b: (b, 0, 0)),
        ],
        scratch_shapes=[
            pltpu.VMEM((pad_rows, CP), jnp.float32),   # zero row-padded feature
            pltpu.VMEM((HW, CP), jnp.float32),         # RPN conv accumulator
        ],
        compiler_params=pltpu.CompilerParams(
            dimension_semantics=("parallel",),
            vmem_limit_bytes=_VMEM_LIMIT,
        ),
        cost_estimate=cost,
    )(im2col, w_stem, b_stem, w_rpn, b_rpn, w_rh, b_rh, pmat,
      w6, b6, w7, b7, w_pred, b_pred)

    rpn_out = rpn_out.astype(jnp.float32)
    rpn_objectness = rpn_out[:, :, :NUM_ANCHORS].reshape(B, H, W, NUM_ANCHORS)
    rpn_box_deltas = rpn_out[:, :, NUM_ANCHORS:nrpn].reshape(
        B, H, W, NUM_ANCHORS * 4)
    class_logits = det_out[:, 0, :NUM_CLASSES]
    box_regression = det_out[:, 0, NUM_CLASSES:ndet]

    # TODO(synk): anchor generation + proposal NMS, RoIAlign with real
    #             proposals and eval-mode box decoding / per-class NMS omitted.
    return {
        "rpn_objectness": rpn_objectness,
        "rpn_box_deltas": rpn_box_deltas,
        "class_logits": class_logits,
        "box_regression": box_regression,
    }


# ----------------------------------------------------------------------------
# Pure-JAX float32 reference of the same miniature forward (for verification).
# ----------------------------------------------------------------------------
def _conv3x3_ref(x, w, b):
    B, H, W, Cin = x.shape
    xp = jnp.pad(x, ((0, 0), (1, 1), (1, 1), (0, 0)))
    patches = jnp.stack([xp[:, dy:dy + H, dx:dx + W, :]
                         for dy in range(3) for dx in range(3)], axis=3)
    cols = patches.reshape(B, H, W, 9 * Cin)
    return jax.nn.relu(cols @ w.reshape(9 * Cin, -1) + b)


def reference_forward(params, images_nchw):
    x = jnp.transpose(images_nchw, (0, 2, 3, 1)).astype(jnp.float32)
    B, H, W, _ = x.shape
    feat = _conv3x3_ref(x, params["bb_w"], params["bb_b"])
    rpn_feat = _conv3x3_ref(feat, params["rpn_w"], params["rpn_b"])
    rpn_w = jnp.concatenate([params["rpn_cls_w"], params["rpn_box_w"]], axis=1)
    rpn_b = jnp.concatenate([params["rpn_cls_b"], params["rpn_box_b"]], axis=0)
    rpn_out = rpn_feat.reshape(B * H * W, BACKBONE_C) @ rpn_w + rpn_b
    pooled = feat.reshape(B, POOL, H // POOL, POOL, W // POOL,
                          BACKBONE_C).mean(axis=(2, 4))
    bf = pooled.reshape(B, POOL * POOL * BACKBONE_C)
    h = jax.nn.relu(bf @ params["fc6_w"] + params["fc6_b"])
    h = jax.nn.relu(h @ params["fc7_w"] + params["fc7_b"])
    return {
        "rpn_objectness": rpn_out[:, :NUM_ANCHORS].reshape(B, H, W, NUM_ANCHORS),
        "rpn_box_deltas": rpn_out[:, NUM_ANCHORS:].reshape(B, H, W,
                                                           NUM_ANCHORS * 4),
        "class_logits": h @ params["cls_w"] + params["cls_b"],
        "box_regression": h @ params["box_w"] + params["box_b"],
    }


if __name__ == "__main__":
    key = jax.random.PRNGKey(0)
    pkey, xkey = jax.random.split(key)
    params = init_params(pkey)

    # PyTorch-style NCHW images.
    images = jax.random.normal(xkey, (2, 3, 16, 16), dtype=jnp.float32)

    fwd = jax.jit(faster_rcnn_forward)
    out = fwd(params, images)
    out = jax.tree_util.tree_map(jax.block_until_ready, out)

    ref = jax.jit(reference_forward)(params, images)

    assert out["class_logits"].shape == (2, NUM_CLASSES)
    assert out["box_regression"].shape == (2, NUM_CLASSES * 4)
    assert out["rpn_objectness"].shape == (2, 16, 16, NUM_ANCHORS)
    assert out["rpn_box_deltas"].shape == (2, 16, 16, NUM_ANCHORS * 4)
    for k in out:
        assert bool(jnp.isfinite(out[k]).all()), f"non-finite output in {k}"
        assert bool(jnp.allclose(out[k], ref[k], rtol=5e-2, atol=2e-2)), (
            f"mismatch vs reference in {k}")

    print("KERNEL_OK")
</pallas_src>

<mosaic_0001>
module attributes {stable_mosaic.version = 11 : i64} {
  func.func @_fused_kernel(%arg0: i32, %arg1: memref<1x256x128xbf16, #tpu.memory_space<vmem>>, %arg2: memref<128x128xbf16, #tpu.memory_space<vmem>>, %arg3: memref<1x128xf32, #tpu.memory_space<vmem>>, %arg4: memref<9x128x128xbf16, #tpu.memory_space<vmem>>, %arg5: memref<1x128xf32, #tpu.memory_space<vmem>>, %arg6: memref<128x128xbf16, #tpu.memory_space<vmem>>, %arg7: memref<1x128xf32, #tpu.memory_space<vmem>>, %arg8: memref<16x256xbf16, #tpu.memory_space<vmem>>, %arg9: memref<16x128x128xbf16, #tpu.memory_space<vmem>>, %arg10: memref<1x128xf32, #tpu.memory_space<vmem>>, %arg11: memref<128x128xbf16, #tpu.memory_space<vmem>>, %arg12: memref<1x128xf32, #tpu.memory_space<vmem>>, %arg13: memref<128x128xbf16, #tpu.memory_space<vmem>>, %arg14: memref<1x128xf32, #tpu.memory_space<vmem>>, %arg15: memref<1x256x128xbf16, #tpu.memory_space<vmem>>, %arg16: memref<1x8x128xf32, #tpu.memory_space<vmem>>, %arg17: memref<304x128xf32, #tpu.memory_space<vmem>>, %arg18: memref<256x128xf32, #tpu.memory_space<vmem>>) attributes {dimension_semantics = [#tpu.dimension_semantics<parallel>], iteration_bounds = array<i64: 2>, scalar_prefetch = 0 : i64, scratch_operands = 2 : i64, tpu.core_type = #tpu.core_type<tc>, window_params = [{transform_indices = @transform_0, window_bounds = array<i64: 1, 256, 128>}, {pipeline_mode = #tpu.pipeline_mode<synchronous>, transform_indices = @transform_1, window_bounds = array<i64: 128, 128>}, {pipeline_mode = #tpu.pipeline_mode<synchronous>, transform_indices = @transform_2, window_bounds = array<i64: 1, 128>}, {pipeline_mode = #tpu.pipeline_mode<synchronous>, transform_indices = @transform_3, window_bounds = array<i64: 9, 128, 128>}, {pipeline_mode = #tpu.pipeline_mode<synchronous>, transform_indices = @transform_4, window_bounds = array<i64: 1, 128>}, {pipeline_mode = #tpu.pipeline_mode<synchronous>, transform_indices = @transform_5, window_bounds = array<i64: 128, 128>}, {pipeline_mode = #tpu.pipeline_mode<synchronous>, transform_indices = @transform_6, window_bounds = array<i64: 1, 128>}, {pipeline_mode = #tpu.pipeline_mode<synchronous>, transform_indices = @transform_7, window_bounds = array<i64: 16, 256>}, {pipeline_mode = #tpu.pipeline_mode<synchronous>, transform_indices = @transform_8, window_bounds = array<i64: 16, 128, 128>}, {pipeline_mode = #tpu.pipeline_mode<synchronous>, transform_indices = @transform_9, window_bounds = array<i64: 1, 128>}, {pipeline_mode = #tpu.pipeline_mode<synchronous>, transform_indices = @transform_10, window_bounds = array<i64: 128, 128>}, {pipeline_mode = #tpu.pipeline_mode<synchronous>, transform_indices = @transform_11, window_bounds = array<i64: 1, 128>}, {pipeline_mode = #tpu.pipeline_mode<synchronous>, transform_indices = @transform_12, window_bounds = array<i64: 128, 128>}, {pipeline_mode = #tpu.pipeline_mode<synchronous>, transform_indices = @transform_13, window_bounds = array<i64: 1, 128>}, {transform_indices = @transform_14, window_bounds = array<i64: 1, 256, 128>}, {transform_indices = @transform_15, window_bounds = array<i64: 1, 8, 128>}]} {
    %c0 = arith.constant 0 : index
    %c0_0 = arith.constant 0 : index
    %c0_1 = arith.constant 0 : index
    %0 = vector.load %arg1[%c0, %c0_0, %c0_1] : memref<1x256x128xbf16, #tpu.memory_space<vmem>>, vector<1x256x128xbf16>
    %1 = vector.shape_cast %0 : vector<1x256x128xbf16> to vector<256x128xbf16>
    %c0_2 = arith.constant 0 : index
    %c0_3 = arith.constant 0 : index
    %2 = vector.load %arg2[%c0_2, %c0_3] : memref<128x128xbf16, #tpu.memory_space<vmem>>, vector<128x128xbf16>
    %cst = arith.constant dense<0.000000e+00> : vector<256x128xf32>
    %3 = tpu.matmul %1, %2, %cst {dimension_numbers = #tpu.dot_dimension_numbers<[1], [0], [0], [1], [0, 0, 1, 1], [], []>} : vector<256x128xbf16>, vector<128x128xbf16>, vector<256x128xf32> -> vector<256x128xf32>
    %c0_4 = arith.constant 0 : index
    %c0_5 = arith.constant 0 : index
    %4 = vector.load %arg3[%c0_4, %c0_5] : memref<1x128xf32, #tpu.memory_space<vmem>>, vector<1x128xf32>
    %5 = vector.broadcast %4 : vector<1x128xf32> to vector<256x128xf32>
    %6 = arith.addf %3, %5 : vector<256x128xf32>
    %cst_6 = arith.constant 0.000000e+00 : f32
    %7 = vector.broadcast %cst_6 : f32 to vector<256x128xf32>
    %8 = arith.maximumf %6, %7 : vector<256x128xf32>
    %cst_7 = arith.constant 0.000000e+00 : f32
    %9 = vector.broadcast %cst_7 : f32 to vector<24x128xf32>
    %c0_8 = arith.constant 0 : index
    %c0_9 = arith.constant 0 : index
    %10 = vector.load %arg17[%c0_8, %c0_9] : memref<304x128xf32, #tpu.memory_space<vmem>>, vector<24x128xf32>
    tpu.vector_store %arg17[%c0_8, %c0_9], %9 {strides = array<i32>} : memref<304x128xf32, #tpu.memory_space<vmem>>, vector<24x128xf32>,
    %c280 = arith.constant 280 : index
    %c0_10 = arith.constant 0 : index
    %11 = vector.load %arg17[%c280, %c0_10] : memref<304x128xf32, #tpu.memory_space<vmem>>, vector<24x128xf32>
    tpu.vector_store %arg17[%c280, %c0_10], %9 {strides = array<i32>} : memref<304x128xf32, #tpu.memory_space<vmem>>, vector<24x128xf32>,
    %c24 = arith.constant 24 : index
    %c0_11 = arith.constant 0 : index
    %12 = vector.load %arg17[%c24, %c0_11] : memref<304x128xf32, #tpu.memory_space<vmem>>, vector<256x128xf32>
    tpu.vector_store %arg17[%c24, %c0_11], %8 {strides = array<i32>} : memref<304x128xf32, #tpu.memory_space<vmem>>, vector<256x128xf32>,
    %13 = tpu.iota {dimensions = array<i32: 0>} : vector<256x128xi32>
    %c16_i32 = arith.constant 16 : i32
    %c0_i32 = arith.constant 0 : i32
    %14 = arith.cmpi eq, %c16_i32, %c0_i32 : i32
    %c1_i32 = arith.constant 1 : i32
    %15 = arith.select %14, %c1_i32, %c16_i32 : i32
    %16 = vector.broadcast %15 : i32 to vector<256x128xi32>
    %17 = arith.remsi %13, %16 : vector<256x128xi32>
    %c0_i32_12 = arith.constant 0 : i32
    %18 = vector.broadcast %c0_i32_12 : i32 to vector<256x128xi32>
    %19 = arith.cmpi ne, %17, %18 : vector<256x128xi32>
    %c0_i32_13 = arith.constant 0 : i32
    %20 = vector.broadcast %c0_i32_13 : i32 to vector<256x128xi32>
    %21 = arith.cmpi slt, %17, %20 : vector<256x128xi32>
    %c0_i32_14 = arith.constant 0 : i32
    %22 = arith.cmpi slt, %15, %c0_i32_14 : i32
    %23 = vector.broadcast %22 : i1 to vector<256x128xi1>
    %24 = vector.broadcast %23 : vector<256x128xi1> to vector<256x128xi1>
    %25 = arith.xori %21, %24 : vector<256x128xi1>
    %26 = arith.andi %25, %19 : vector<256x128xi1>
    %27 = vector.broadcast %15 : i32 to vector<256x128xi32>
    %28 = arith.addi %17, %27 : vector<256x128xi32>
    %29 = arith.select %26, %28, %17 : vector<256x128xi1>, vector<256x128xi32>
    %c1_i32_15 = arith.constant 1 : i32
    %30 = vector.broadcast %c1_i32_15 : i32 to vector<256x128xi32>
    %31 = arith.cmpi sge, %29, %30 : vector<256x128xi32>
    %c14_i32 = arith.constant 14 : i32
    %32 = vector.broadcast %c14_i32 : i32 to vector<256x128xi32>
    %33 = arith.cmpi sle, %29, %32 : vector<256x128xi32>
    %cst_16 = arith.constant 0.000000e+00 : f32
    %34 = vector.broadcast %cst_16 : f32 to vector<256x128xf32>
    %c0_17 = arith.constant 0 : index
    %c0_18 = arith.constant 0 : index
    %35 = vector.load %arg18[%c0_17, %c0_18] : memref<256x128xf32, #tpu.memory_space<vmem>>, vector<256x128xf32>
    tpu.vector_store %arg18[%c0_17, %c0_18], %34 {strides = array<i32>} : memref<256x128xf32, #tpu.memory_space<vmem>>, vector<256x128xf32>,
    %c7 = arith.constant 7 : index
    %c0_19 = arith.constant 0 : index
    %36 = vector.load %arg17[%c7, %c0_19] : memref<304x128xf32, #tpu.memory_space<vmem>>, vector<256x128xf32>
    %cst_20 = arith.constant 0.000000e+00 : f32
    %37 = vector.broadcast %cst_20 : f32 to vector<256x128xf32>
    %38 = arith.select %31, %36, %37 : vector<256x128xi1>, vector<256x128xf32>
    %c0_21 = arith.constant 0 : index
    %c0_22 = arith.constant 0 : index
    %39 = vector.load %arg18[%c0_21, %c0_22] : memref<256x128xf32, #tpu.memory_space<vmem>>, vector<256x128xf32>
    %40 = arith.truncf %38 : vector<256x128xf32> to vector<256x128xbf16>
    %c0_23 = arith.constant 0 : index
    %c0_24 = arith.constant 0 : index
    %c0_25 = arith.constant 0 : index
    %41 = vector.load %arg4[%c0_23, %c0_24, %c0_25] : memref<9x128x128xbf16, #tpu.memory_space<vmem>>, vector<1x128x128xbf16>
    %42 = vector.shape_cast %41 : vector<1x128x128xbf16> to vector<128x128xbf16>
    %cst_26 = arith.constant dense<0.000000e+00> : vector<256x128xf32>
    %43 = tpu.matmul %40, %42, %cst_26 {dimension_numbers = #tpu.dot_dimension_numbers<[1], [0], [0], [1], [0, 0, 1, 1], [], []>} : vector<256x128xbf16>, vector<128x128xbf16>, vector<256x128xf32> -> vector<256x128xf32>
    %44 = arith.addf %39, %43 : vector<256x128xf32>
    %c0_27 = arith.constant 0 : index
    %c0_28 = arith.constant 0 : index
    %45 = vector.load %arg18[%c0_27, %c0_28] : memref<256x128xf32, #tpu.memory_space<vmem>>, vector<256x128xf32>
    tpu.vector_store %arg18[%c0_27, %c0_28], %44 {strides = array<i32>} : memref<256x128xf32, #tpu.memory_space<vmem>>, vector<256x128xf32>,
    %c8 = arith.constant 8 : index
    %c0_29 = arith.constant 0 : index
    %46 = vector.load %arg17[%c8, %c0_29] : memref<304x128xf32, #tpu.memory_space<vmem>>, vector<256x128xf32>
    %c0_30 = arith.constant 0 : index
    %c0_31 = arith.constant 0 : index
    %47 = vector.load %arg18[%c0_30, %c0_31] : memref<256x128xf32, #tpu.memory_space<vmem>>, vector<256x128xf32>
    %48 = arith.truncf %46 : vector<256x128xf32> to vector<256x128xbf16>
    %c1 = arith.constant 1 : index
    %c0_32 = arith.constant 0 : index
    %c0_33 = arith.constant 0 : index
    %49 = vector.load %arg4[%c1, %c0_32, %c0_33] : memref<9x128x128xbf16, #tpu.memory_space<vmem>>, vector<1x128x128xbf16>
    %50 = vector.shape_cast %49 : vector<1x128x128xbf16> to vector<128x128xbf16>
    %cst_34 = arith.constant dense<0.000000e+00> : vector<256x128xf32>
    %51 = tpu.matmul %48, %50, %cst_34 {dimension_numbers = #tpu.dot_dimension_numbers<[1], [0], [0], [1], [0, 0, 1, 1], [], []>} : vector<256x128xbf16>, vector<128x128xbf16>, vector<256x128xf32> -> vector<256x128xf32>
    %52 = arith.addf %47, %51 : vector<256x128xf32>
    %c0_35 = arith.constant 0 : index
    %c0_36 = arith.constant 0 : index
    %53 = vector.load %arg18[%c0_35, %c0_36] : memref<256x128xf32, #tpu.memory_space<vmem>>, vector<256x128xf32>
    tpu.vector_store %arg18[%c0_35, %c0_36], %52 {strides = array<i32>} : memref<256x128xf32, #tpu.memory_space<vmem>>, vector<256x128xf32>,
    %c9 = arith.constant 9 : index
    %c0_37 = arith.constant 0 : index
    %54 = vector.load %arg17[%c9, %c0_37] : memref<304x128xf32, #tpu.memory_space<vmem>>, vector<256x128xf32>
    %cst_38 = arith.constant 0.000000e+00 : f32
    %55 = vector.broadcast %cst_38 : f32 to vector<256x128xf32>
    %56 = arith.select %33, %54, %55 : vector<256x128xi1>, vector<256x128xf32>
    %c0_39 = arith.constant 0 : index
    %c0_40 = arith.constant 0 : index
    %57 = vector.load %arg18[%c0_39, %c0_40] : memref<256x128xf32, #tpu.memory_space<vmem>>, vector<256x128xf32>
    %58 = arith.truncf %56 : vector<256x128xf32> to vector<256x128xbf16>
    %c2 = arith.constant 2 : index
    %c0_41 = arith.constant 0 : index
    %c0_42 = arith.constant 0 : index
    %59 = vector.load %arg4[%c2, %c0_41, %c0_42] : memref<9x128x128xbf16, #tpu.memory_space<vmem>>, vector<1x128x128xbf16>
    %60 = vector.shape_cast %59 : vector<1x128x128xbf16> to vector<128x128xbf16>
    %cst_43 = arith.constant dense<0.000000e+00> : vector<256x128xf32>
    %61 = tpu.matmul %58, %60, %cst_43 {dimension_numbers = #tpu.dot_dimension_numbers<[1], [0], [0], [1], [0, 0, 1, 1], [], []>} : vector<256x128xbf16>, vector<128x128xbf16>, vector<256x128xf32> -> vector<256x128xf32>
    %62 = arith.addf %57, %61 : vector<256x128xf32>
    %c0_44 = arith.constant 0 : index
    %c0_45 = arith.constant 0 : index
    %63 = vector.load %arg18[%c0_44, %c0_45] : memref<256x128xf32, #tpu.memory_space<vmem>>, vector<256x128xf32>
    tpu.vector_store %arg18[%c0_44, %c0_45], %62 {strides = array<i32>} : memref<256x128xf32, #tpu.memory_space<vmem>>, vector<256x128xf32>,
    %c23 = arith.constant 23 : index
    %c0_46 = arith.constant 0 : index
    %64 = vector.load %arg17[%c23, %c0_46] : memref<304x128xf32, #tpu.memory_space<vmem>>, vector<256x128xf32>
    %cst_47 = arith.constant 0.000000e+00 : f32
    %65 = vector.broadcast %cst_47 : f32 to vector<256x128xf32>
    %66 = arith.select %31, %64, %65 : vector<256x128xi1>, vector<256x128xf32>
    %c0_48 = arith.constant 0 : index
    %c0_49 = arith.constant 0 : index
    %67 = vector.load %arg18[%c0_48, %c0_49] : memref<256x128xf32, #tpu.memory_space<vmem>>, vector<256x128xf32>
    %68 = arith.truncf %66 : vector<256x128xf32> to vector<256x128xbf16>
    %c3 = arith.constant 3 : index
    %c0_50 = arith.constant 0 : index
    %c0_51 = arith.constant 0 : index
    %69 = vector.load %arg4[%c3, %c0_50, %c0_51] : memref<9x128x128xbf16, #tpu.memory_space<vmem>>, vector<1x128x128xbf16>
    %70 = vector.shape_cast %69 : vector<1x128x128xbf16> to vector<128x128xbf16>
    %cst_52 = arith.constant dense<0.000000e+00> : vector<256x128xf32>
    %71 = tpu.matmul %68, %70, %cst_52 {dimension_numbers = #tpu.dot_dimension_numbers<[1], [0], [0], [1], [0, 0, 1, 1], [], []>} : vector<256x128xbf16>, vector<128x128xbf16>, vector<256x128xf32> -> vector<256x128xf32>
    %72 = arith.addf %67, %71 : vector<256x128xf32>
    %c0_53 = arith.constant 0 : index
    %c0_54 = arith.constant 0 : index
    %73 = vector.load %arg18[%c0_53, %c0_54] : memref<256x128xf32, #tpu.memory_space<vmem>>, vector<256x128xf32>
    tpu.vector_store %arg18[%c0_53, %c0_54], %72 {strides = array<i32>} : memref<256x128xf32, #tpu.memory_space<vmem>>, vector<256x128xf32>,
    %c24_55 = arith.constant 24 : index
    %c0_56 = arith.constant 0 : index
    %74 = vector.load %arg17[%c24_55, %c0_56] : memref<304x128xf32, #tpu.memory_space<vmem>>, vector<256x128xf32>
    %c0_57 = arith.constant 0 : index
    %c0_58 = arith.constant 0 : index
    %75 = vector.load %arg18[%c0_57, %c0_58] : memref<256x128xf32, #tpu.memory_space<vmem>>, vector<256x128xf32>
    %76 = arith.truncf %74 : vector<256x128xf32> to vector<256x128xbf16>
    %c4 = arith.constant 4 : index
    %c0_59 = arith.constant 0 : index
    %c0_60 = arith.constant 0 : index
    %77 = vector.load %arg4[%c4, %c0_59, %c0_60] : memref<9x128x128xbf16, #tpu.memory_space<vmem>>, vector<1x128x128xbf16>
    %78 = vector.shape_cast %77 : vector<1x128x128xbf16> to vector<128x128xbf16>
    %cst_61 = arith.constant dense<0.000000e+00> : vector<256x128xf32>
    %79 = tpu.matmul %76, %78, %cst_61 {dimension_numbers = #tpu.dot_dimension_numbers<[1], [0], [0], [1], [0, 0, 1, 1], [], []>} : vector<256x128xbf16>, vector<128x128xbf16>, vector<256x128xf32> -> vector<256x128xf32>
    %80 = arith.addf %75, %79 : vector<256x128xf32>
    %c0_62 = arith.constant 0 : index
    %c0_63 = arith.constant 0 : index
    %81 = vector.load %arg18[%c0_62, %c0_63] : memref<256x128xf32, #tpu.memory_space<vmem>>, vector<256x128xf32>
    tpu.vector_store %arg18[%c0_62, %c0_63], %80 {strides = array<i32>} : memref<256x128xf32, #tpu.memory_space<vmem>>, vector<256x128xf32>,
    %c25 = arith.constant 25 : index
    %c0_64 = arith.constant 0 : index
    %82 = vector.load %arg17[%c25, %c0_64] : memref<304x128xf32, #tpu.memory_space<vmem>>, vector<256x128xf32>
    %cst_65 = arith.constant 0.000000e+00 : f32
    %83 = vector.broadcast %cst_65 : f32 to vector<256x128xf32>
    %84 = arith.select %33, %82, %83 : vector<256x128xi1>, vector<256x128xf32>
    %c0_66 = arith.constant 0 : index
    %c0_67 = arith.constant 0 : index
    %85 = vector.load %arg18[%c0_66, %c0_67] : memref<256x128xf32, #tpu.memory_space<vmem>>, vector<256x128xf32>
    %86 = arith.truncf %84 : vector<256x128xf32> to vector<256x128xbf16>
    %c5 = arith.constant 5 : index
    %c0_68 = arith.constant 0 : index
    %c0_69 = arith.constant 0 : index
    %87 = vector.load %arg4[%c5, %c0_68, %c0_69] : memref<9x128x128xbf16, #tpu.memory_space<vmem>>, vector<1x128x128xbf16>
    %88 = vector.shape_cast %87 : vector<1x128x128xbf16> to vector<128x128xbf16>
    %cst_70 = arith.constant dense<0.000000e+00> : vector<256x128xf32>
    %89 = tpu.matmul %86, %88, %cst_70 {dimension_numbers = #tpu.dot_dimension_numbers<[1], [0], [0], [1], [0, 0, 1, 1], [], []>} : vector<256x128xbf16>, vector<128x128xbf16>, vector<256x128xf32> -> vector<256x128xf32>
    %90 = arith.addf %85, %89 : vector<256x128xf32>
    %c0_71 = arith.constant 0 : index
    %c0_72 = arith.constant 0 : index
    %91 = vector.load %arg18[%c0_71, %c0_72] : memref<256x128xf32, #tpu.memory_space<vmem>>, vector<256x128xf32>
    tpu.vector_store %arg18[%c0_71, %c0_72], %90 {strides = array<i32>} : memref<256x128xf32, #tpu.memory_space<vmem>>, vector<256x128xf32>,
    %c39 = arith.constant 39 : index
    %c0_73 = arith.constant 0 : index
    %92 = vector.load %arg17[%c39, %c0_73] : memref<304x128xf32, #tpu.memory_space<vmem>>, vector<256x128xf32>
    %cst_74 = arith.constant 0.000000e+00 : f32
    %93 = vector.broadcast %cst_74 : f32 to vector<256x128xf32>
    %94 = arith.select %31, %92, %93 : vector<256x128xi1>, vector<256x128xf32>
    %c0_75 = arith.constant 0 : index
    %c0_76 = arith.constant 0 : index
    %95 = vector.load %arg18[%c0_75, %c0_76] : memref<256x128xf32, #tpu.memory_space<vmem>>, vector<256x128xf32>
    %96 = arith.truncf %94 : vector<256x128xf32> to vector<256x128xbf16>
    %c6 = arith.constant 6 : index
    %c0_77 = arith.constant 0 : index
    %c0_78 = arith.constant 0 : index
    %97 = vector.load %arg4[%c6, %c0_77, %c0_78] : memref<9x128x128xbf16, #tpu.memory_space<vmem>>, vector<1x128x128xbf16>
    %98 = vector.shape_cast %97 : vector<1x128x128xbf16> to vector<128x128xbf16>
    %cst_79 = arith.constant dense<0.000000e+00> : vector<256x128xf32>
    %99 = tpu.matmul %96, %98, %cst_79 {dimension_numbers = #tpu.dot_dimension_numbers<[1], [0], [0], [1], [0, 0, 1, 1], [], []>} : vector<256x128xbf16>, vector<128x128xbf16>, vector<256x128xf32> -> vector<256x128xf32>
    %100 = arith.addf %95, %99 : vector<256x128xf32>
    %c0_80 = arith.constant 0 : index
    %c0_81 = arith.constant 0 : index
    %101 = vector.load %arg18[%c0_80, %c0_81] : memref<256x128xf32, #tpu.memory_space<vmem>>, vector<256x128xf32>
    tpu.vector_store %arg18[%c0_80, %c0_81], %100 {strides = array<i32>} : memref<256x128xf32, #tpu.memory_space<vmem>>, vector<256x128xf32>,
    %c40 = arith.constant 40 : index
    %c0_82 = arith.constant 0 : index
    %102 = vector.load %arg17[%c40, %c0_82] : memref<304x128xf32, #tpu.memory_space<vmem>>, vector<256x128xf32>
    %c0_83 = arith.constant 0 : index
    %c0_84 = arith.constant 0 : index
    %103 = vector.load %arg18[%c0_83, %c0_84] : memref<256x128xf32, #tpu.memory_space<vmem>>, vector<256x128xf32>
    %104 = arith.truncf %102 : vector<256x128xf32> to vector<256x128xbf16>
    %c7_85 = arith.constant 7 : index
    %c0_86 = arith.constant 0 : index
    %c0_87 = arith.constant 0 : index
    %105 = vector.load %arg4[%c7_85, %c0_86, %c0_87] : memref<9x128x128xbf16, #tpu.memory_space<vmem>>, vector<1x128x128xbf16>
    %106 = vector.shape_cast %105 : vector<1x128x128xbf16> to vector<128x128xbf16>
    %cst_88 = arith.constant dense<0.000000e+00> : vector<256x128xf32>
    %107 = tpu.matmul %104, %106, %cst_88 {dimension_numbers = #tpu.dot_dimension_numbers<[1], [0], [0], [1], [0, 0, 1, 1], [], []>} : vector<256x128xbf16>, vector<128x128xbf16>, vector<256x128xf32> -> vector<256x128xf32>
    %108 = arith.addf %103, %107 : vector<256x128xf32>
    %c0_89 = arith.constant 0 : index
    %c0_90 = arith.constant 0 : index
    %109 = vector.load %arg18[%c0_89, %c0_90] : memref<256x128xf32, #tpu.memory_space<vmem>>, vector<256x128xf32>
    tpu.vector_store %arg18[%c0_89, %c0_90], %108 {strides = array<i32>} : memref<256x128xf32, #tpu.memory_space<vmem>>, vector<256x128xf32>,
    %c41 = arith.constant 41 : index
    %c0_91 = arith.constant 0 : index
    %110 = vector.load %arg17[%c41, %c0_91] : memref<304x128xf32, #tpu.memory_space<vmem>>, vector<256x128xf32>
    %cst_92 = arith.constant 0.000000e+00 : f32
    %111 = vector.broadcast %cst_92 : f32 to vector<256x128xf32>
    %112 = arith.select %33, %110, %111 : vector<256x128xi1>, vector<256x128xf32>
    %c0_93 = arith.constant 0 : index
    %c0_94 = arith.constant 0 : index
    %113 = vector.load %arg18[%c0_93, %c0_94] : memref<256x128xf32, #tpu.memory_space<vmem>>, vector<256x128xf32>
    %114 = arith.truncf %112 : vector<256x128xf32> to vector<256x128xbf16>
    %c8_95 = arith.constant 8 : index
    %c0_96 = arith.constant 0 : index
    %c0_97 = arith.constant 0 : index
    %115 = vector.load %arg4[%c8_95, %c0_96, %c0_97] : memref<9x128x128xbf16, #tpu.memory_space<vmem>>, vector<1x128x128xbf16>
    %116 = vector.shape_cast %115 : vector<1x128x128xbf16> to vector<128x128xbf16>
    %cst_98 = arith.constant dense<0.000000e+00> : vector<256x128xf32>
    %117 = tpu.matmul %114, %116, %cst_98 {dimension_numbers = #tpu.dot_dimension_numbers<[1], [0], [0], [1], [0, 0, 1, 1], [], []>} : vector<256x128xbf16>, vector<128x128xbf16>, vector<256x128xf32> -> vector<256x128xf32>
    %118 = arith.addf %113, %117 : vector<256x128xf32>
    %c0_99 = arith.constant 0 : index
    %c0_100 = arith.constant 0 : index
    %119 = vector.load %arg18[%c0_99, %c0_100] : memref<256x128xf32, #tpu.memory_space<vmem>>, vector<256x128xf32>
    tpu.vector_store %arg18[%c0_99, %c0_100], %118 {strides = array<i32>} : memref<256x128xf32, #tpu.memory_space<vmem>>, vector<256x128xf32>,
    %c0_101 = arith.constant 0 : index
    %c0_102 = arith.constant 0 : index
    %120 = vector.load %arg18[%c0_101, %c0_102] : memref<256x128xf32, #tpu.memory_space<vmem>>, vector<256x128xf32>
    %c0_103 = arith.constant 0 : index
    %c0_104 = arith.constant 0 : index
    %121 = vector.load %arg5[%c0_103, %c0_104] : memref<1x128xf32, #tpu.memory_space<vmem>>, vector<1x128xf32>
    %122 = vector.broadcast %121 : vector<1x128xf32> to vector<256x128xf32>
    %123 = arith.addf %120, %122 : vector<256x128xf32>
    %cst_105 = arith.constant 0.000000e+00 : f32
    %124 = vector.broadcast %cst_105 : f32 to vector<256x128xf32>
    %125 = arith.maximumf %123, %124 : vector<256x128xf32>
    %126 = arith.truncf %125 : vector<256x128xf32> to vector<256x128xbf16>
    %c0_106 = arith.constant 0 : index
    %c0_107 = arith.constant 0 : index
    %127 = vector.load %arg6[%c0_106, %c0_107] : memref<128x128xbf16, #tpu.memory_space<vmem>>, vector<128x128xbf16>
    %cst_108 = arith.constant dense<0.000000e+00> : vector<256x128xf32>
    %128 = tpu.matmul %126, %127, %cst_108 {dimension_numbers = #tpu.dot_dimension_numbers<[1], [0], [0], [1], [0, 0, 1, 1], [], []>} : vector<256x128xbf16>, vector<128x128xbf16>, vector<256x128xf32> -> vector<256x128xf32>
    %c0_109 = arith.constant 0 : index
    %c0_110 = arith.constant 0 : index
    %129 = vector.load %arg7[%c0_109, %c0_110] : memref<1x128xf32, #tpu.memory_space<vmem>>, vector<1x128xf32>
    %130 = vector.broadcast %129 : vector<1x128xf32> to vector<256x128xf32>
    %131 = arith.addf %128, %130 : vector<256x128xf32>
    %132 = arith.truncf %131 : vector<256x128xf32> to vector<256x128xbf16>
    %c0_111 = arith.constant 0 : index
    %c0_112 = arith.constant 0 : index
    %c0_113 = arith.constant 0 : index
    %133 = vector.load %arg15[%c0_111, %c0_112, %c0_113] : memref<1x256x128xbf16, #tpu.memory_space<vmem>>, vector<1x256x128xbf16>
    %134 = vector.shape_cast %133 : vector<1x256x128xbf16> to vector<256x128xbf16>
    %135 = vector.shape_cast %132 : vector<256x128xbf16> to vector<1x256x128xbf16>
    tpu.vector_store %arg15[%c0_111, %c0_112, %c0_113], %135 {strides = array<i32>} : memref<1x256x128xbf16, #tpu.memory_space<vmem>>, vector<1x256x128xbf16>,
    %c24_114 = arith.constant 24 : index
    %c0_115 = arith.constant 0 : index
    %136 = vector.load %arg17[%c24_114, %c0_115] : memref<304x128xf32, #tpu.memory_space<vmem>>, vector<256x128xf32>
    %137 = arith.truncf %136 : vector<256x128xf32> to vector<256x128xbf16>
    %c0_116 = arith.constant 0 : index
    %c0_117 = arith.constant 0 : index
    %138 = vector.load %arg8[%c0_116, %c0_117] : memref<16x256xbf16, #tpu.memory_space<vmem>>, vector<16x256xbf16>
    %cst_118 = arith.constant dense<0.000000e+00> : vector<16x128xf32>
    %139 = tpu.matmul %138, %137, %cst_118 {dimension_numbers = #tpu.dot_dimension_numbers<[1], [0], [0], [1], [0, 0, 1, 1], [], []>} : vector<16x256xbf16>, vector<256x128xbf16>, vector<16x128xf32> -> vector<16x128xf32>
    %140 = arith.truncf %139 : vector<16x128xf32> to vector<16x128xbf16>
    %c0_119 = arith.constant 0 : index
    %c0_120 = arith.constant 0 : index
    %141 = vector.load %arg10[%c0_119, %c0_120] : memref<1x128xf32, #tpu.memory_space<vmem>>, vector<1x128xf32>
    %142 = vector.extract_strided_slice %140 {offsets = [0, 0], sizes = [1, 128], strides = [1, 1]} : vector<16x128xbf16> to vector<1x128xbf16>
    %c0_121 = arith.constant 0 : index
    %c0_122 = arith.constant 0 : index
    %c0_123 = arith.constant 0 : index
    %143 = vector.load %arg9[%c0_121, %c0_122, %c0_123] : memref<16x128x128xbf16, #tpu.memory_space<vmem>>, vector<1x128x128xbf16>
    %144 = vector.shape_cast %143 : vector<1x128x128xbf16> to vector<128x128xbf16>
    %cst_124 = arith.constant dense<0.000000e+00> : vector<1x128xf32>
    %145 = tpu.matmul %142, %144, %cst_124 {dimension_numbers = #tpu.dot_dimension_numbers<[1], [0], [0], [1], [0, 0, 1, 1], [], []>} : vector<1x128xbf16>, vector<128x128xbf16>, vector<1x128xf32> -> vector<1x128xf32>
    %146 = arith.addf %141, %145 : vector<1x128xf32>
    %147 = vector.extract_strided_slice %140 {offsets = [1, 0], sizes = [1, 128], strides = [1, 1]} : vector<16x128xbf16> to vector<1x128xbf16>
    %c1_125 = arith.constant 1 : index
    %c0_126 = arith.constant 0 : index
    %c0_127 = arith.constant 0 : index
    %148 = vector.load %arg9[%c1_125, %c0_126, %c0_127] : memref<16x128x128xbf16, #tpu.memory_space<vmem>>, vector<1x128x128xbf16>
    %149 = vector.shape_cast %148 : vector<1x128x128xbf16> to vector<128x128xbf16>
    %cst_128 = arith.constant dense<0.000000e+00> : vector<1x128xf32>
    %150 = tpu.matmul %147, %149, %cst_128 {dimension_numbers = #tpu.dot_dimension_numbers<[1], [0], [0], [1], [0, 0, 1, 1], [], []>} : vector<1x128xbf16>, vector<128x128xbf16>, vector<1x128xf32> -> vector<1x128xf32>
    %151 = arith.addf %146, %150 : vector<1x128xf32>
    %152 = vector.extract_strided_slice %140 {offsets = [2, 0], sizes = [1, 128], strides = [1, 1]} : vector<16x128xbf16> to vector<1x128xbf16>
    %c2_129 = arith.constant 2 : index
    %c0_130 = arith.constant 0 : index
    %c0_131 = arith.constant 0 : index
    %153 = vector.load %arg9[%c2_129, %c0_130, %c0_131] : memref<16x128x128xbf16, #tpu.memory_space<vmem>>, vector<1x128x128xbf16>
    %154 = vector.shape_cast %153 : vector<1x128x128xbf16> to vector<128x128xbf16>
    %cst_132 = arith.constant dense<0.000000e+00> : vector<1x128xf32>
    %155 = tpu.matmul %152, %154, %cst_132 {dimension_numbers = #tpu.dot_dimension_numbers<[1], [0], [0], [1], [0, 0, 1, 1], [], []>} : vector<1x128xbf16>, vector<128x128xbf16>, vector<1x128xf32> -> vector<1x128xf32>
    %156 = arith.addf %151, %155 : vector<1x128xf32>
    %157 = vector.extract_strided_slice %140 {offsets = [3, 0], sizes = [1, 128], strides = [1, 1]} : vector<16x128xbf16> to vector<1x128xbf16>
    %c3_133 = arith.constant 3 : index
    %c0_134 = arith.constant 0 : index
    %c0_135 = arith.constant 0 : index
    %158 = vector.load %arg9[%c3_133, %c0_134, %c0_135] : memref<16x128x128xbf16, #tpu.memory_space<vmem>>, vector<1x128x128xbf16>
    %159 = vector.shape_cast %158 : vector<1x128x128xbf16> to vector<128x128xbf16>
    %cst_136 = arith.constant dense<0.000000e+00> : vector<1x128xf32>
    %160 = tpu.matmul %157, %159, %cst_136 {dimension_numbers = #tpu.dot_dimension_numbers<[1], [0], [0], [1], [0, 0, 1, 1], [], []>} : vector<1x128xbf16>, vector<128x128xbf16>, vector<1x128xf32> -> vector<1x128xf32>
    %161 = arith.addf %156, %160 : vector<1x128xf32>
    %162 = vector.extract_strided_slice %140 {offsets = [4, 0], sizes = [1, 128], strides = [1, 1]} : vector<16x128xbf16> to vector<1x128xbf16>
    %c4_137 = arith.constant 4 : index
    %c0_138 = arith.constant 0 : index
    %c0_139 = arith.constant 0 : index
    %163 = vector.load %arg9[%c4_137, %c0_138, %c0_139] : memref<16x128x128xbf16, #tpu.memory_space<vmem>>, vector<1x128x128xbf16>
    %164 = vector.shape_cast %163 : vector<1x128x128xbf16> to vector<128x128xbf16>
    %cst_140 = arith.constant dense<0.000000e+00> : vector<1x128xf32>
    %165 = tpu.matmul %162, %164, %cst_140 {dimension_numbers = #tpu.dot_dimension_numbers<[1], [0], [0], [1], [0, 0, 1, 1], [], []>} : vector<1x128xbf16>, vector<128x128xbf16>, vector<1x128xf32> -> vector<1x128xf32>
    %166 = arith.addf %161, %165 : vector<1x128xf32>
    %167 = vector.extract_strided_slice %140 {offsets = [5, 0], sizes = [1, 128], strides = [1, 1]} : vector<16x128xbf16> to vector<1x128xbf16>
    %c5_141 = arith.constant 5 : index
    %c0_142 = arith.constant 0 : index
    %c0_143 = arith.constant 0 : index
    %168 = vector.load %arg9[%c5_141, %c0_142, %c0_143] : memref<16x128x128xbf16, #tpu.memory_space<vmem>>, vector<1x128x128xbf16>
    %169 = vector.shape_cast %168 : vector<1x128x128xbf16> to vector<128x128xbf16>
    %cst_144 = arith.constant dense<0.000000e+00> : vector<1x128xf32>
    %170 = tpu.matmul %167, %169, %cst_144 {dimension_numbers = #tpu.dot_dimension_numbers<[1], [0], [0], [1], [0, 0, 1, 1], [], []>} : vector<1x128xbf16>, vector<128x128xbf16>, vector<1x128xf32> -> vector<1x128xf32>
    %171 = arith.addf %166, %170 : vector<1x128xf32>
    %172 = vector.extract_strided_slice %140 {offsets = [6, 0], sizes = [1, 128], strides = [1, 1]} : vector<16x128xbf16> to vector<1x128xbf16>
    %c6_145 = arith.constant 6 : index
    %c0_146 = arith.constant 0 : index
    %c0_147 = arith.constant 0 : index
    %173 = vector.load %arg9[%c6_145, %c0_146, %c0_147] : memref<16x128x128xbf16, #tpu.memory_space<vmem>>, vector<1x128x128xbf16>
    %174 = vector.shape_cast %173 : vector<1x128x128xbf16> to vector<128x128xbf16>
    %cst_148 = arith.constant dense<0.000000e+00> : vector<1x128xf32>
    %175 = tpu.matmul %172, %174, %cst_148 {dimension_numbers = #tpu.dot_dimension_numbers<[1], [0], [0], [1], [0, 0, 1, 1], [], []>} : vector<1x128xbf16>, vector<128x128xbf16>, vector<1x128xf32> -> vector<1x128xf32>
    %176 = arith.addf %171, %175 : vector<1x128xf32>
    %177 = vector.extract_strided_slice %140 {offsets = [7, 0], sizes = [1, 128], strides = [1, 1]} : vector<16x128xbf16> to vector<1x128xbf16>
    %c7_149 = arith.constant 7 : index
    %c0_150 = arith.constant 0 : index
    %c0_151 = arith.constant 0 : index
    %178 = vector.load %arg9[%c7_149, %c0_150, %c0_151] : memref<16x128x128xbf16, #tpu.memory_space<vmem>>, vector<1x128x128xbf16>
    %179 = vector.shape_cast %178 : vector<1x128x128xbf16> to vector<128x128xbf16>
    %cst_152 = arith.constant dense<0.000000e+00> : vector<1x128xf32>
    %180 = tpu.matmul %177, %179, %cst_152 {dimension_numbers = #tpu.dot_dimension_numbers<[1], [0], [0], [1], [0, 0, 1, 1], [], []>} : vector<1x128xbf16>, vector<128x128xbf16>, vector<1x128xf32> -> vector<1x128xf32>
    %181 = arith.addf %176, %180 : vector<1x128xf32>
    %182 = vector.extract_strided_slice %140 {offsets = [8, 0], sizes = [1, 128], strides = [1, 1]} : vector<16x128xbf16> to vector<1x128xbf16>
    %c8_153 = arith.constant 8 : index
    %c0_154 = arith.constant 0 : index
    %c0_155 = arith.constant 0 : index
    %183 = vector.load %arg9[%c8_153, %c0_154, %c0_155] : memref<16x128x128xbf16, #tpu.memory_space<vmem>>, vector<1x128x128xbf16>
    %184 = vector.shape_cast %183 : vector<1x128x128xbf16> to vector<128x128xbf16>
    %cst_156 = arith.constant dense<0.000000e+00> : vector<1x128xf32>
    %185 = tpu.matmul %182, %184, %cst_156 {dimension_numbers = #tpu.dot_dimension_numbers<[1], [0], [0], [1], [0, 0, 1, 1], [], []>} : vector<1x128xbf16>, vector<128x128xbf16>, vector<1x128xf32> -> vector<1x128xf32>
    %186 = arith.addf %181, %185 : vector<1x128xf32>
    %187 = vector.extract_strided_slice %140 {offsets = [9, 0], sizes = [1, 128], strides = [1, 1]} : vector<16x128xbf16> to vector<1x128xbf16>
    %c9_157 = arith.constant 9 : index
    %c0_158 = arith.constant 0 : index
    %c0_159 = arith.constant 0 : index
    %188 = vector.load %arg9[%c9_157, %c0_158, %c0_159] : memref<16x128x128xbf16, #tpu.memory_space<vmem>>, vector<1x128x128xbf16>
    %189 = vector.shape_cast %188 : vector<1x128x128xbf16> to vector<128x128xbf16>
    %cst_160 = arith.constant dense<0.000000e+00> : vector<1x128xf32>
    %190 = tpu.matmul %187, %189, %cst_160 {dimension_numbers = #tpu.dot_dimension_numbers<[1], [0], [0], [1], [0, 0, 1, 1], [], []>} : vector<1x128xbf16>, vector<128x128xbf16>, vector<1x128xf32> -> vector<1x128xf32>
    %191 = arith.addf %186, %190 : vector<1x128xf32>
    %192 = vector.extract_strided_slice %140 {offsets = [10, 0], sizes = [1, 128], strides = [1, 1]} : vector<16x128xbf16> to vector<1x128xbf16>
    %c10 = arith.constant 10 : index
    %c0_161 = arith.constant 0 : index
    %c0_162 = arith.constant 0 : index
    %193 = vector.load %arg9[%c10, %c0_161, %c0_162] : memref<16x128x128xbf16, #tpu.memory_space<vmem>>, vector<1x128x128xbf16>
    %194 = vector.shape_cast %193 : vector<1x128x128xbf16> to vector<128x128xbf16>
    %cst_163 = arith.constant dense<0.000000e+00> : vector<1x128xf32>
    %195 = tpu.matmul %192, %194, %cst_163 {dimension_numbers = #tpu.dot_dimension_numbers<[1], [0], [0], [1], [0, 0, 1, 1], [], []>} : vector<1x128xbf16>, vector<128x128xbf16>, vector<1x128xf32> -> vector<1x128xf32>
    %196 = arith.addf %191, %195 : vector<1x128xf32>
    %197 = vector.extract_strided_slice %140 {offsets = [11, 0], sizes = [1, 128], strides = [1, 1]} : vector<16x128xbf16> to vector<1x128xbf16>
    %c11 = arith.constant 11 : index
    %c0_164 = arith.constant 0 : index
    %c0_165 = arith.constant 0 : index
    %198 = vector.load %arg9[%c11, %c0_164, %c0_165] : memref<16x128x128xbf16, #tpu.memory_space<vmem>>, vector<1x128x128xbf16>
    %199 = vector.shape_cast %198 : vector<1x128x128xbf16> to vector<128x128xbf16>
    %cst_166 = arith.constant dense<0.000000e+00> : vector<1x128xf32>
    %200 = tpu.matmul %197, %199, %cst_166 {dimension_numbers = #tpu.dot_dimension_numbers<[1], [0], [0], [1], [0, 0, 1, 1], [], []>} : vector<1x128xbf16>, vector<128x128xbf16>, vector<1x128xf32> -> vector<1x128xf32>
    %201 = arith.addf %196, %200 : vector<1x128xf32>
    %202 = vector.extract_strided_slice %140 {offsets = [12, 0], sizes = [1, 128], strides = [1, 1]} : vector<16x128xbf16> to vector<1x128xbf16>
    %c12 = arith.constant 12 : index
    %c0_167 = arith.constant 0 : index
    %c0_168 = arith.constant 0 : index
    %203 = vector.load %arg9[%c12, %c0_167, %c0_168] : memref<16x128x128xbf16, #tpu.memory_space<vmem>>, vector<1x128x128xbf16>
    %204 = vector.shape_cast %203 : vector<1x128x128xbf16> to vector<128x128xbf16>
    %cst_169 = arith.constant dense<0.000000e+00> : vector<1x128xf32>
    %205 = tpu.matmul %202, %204, %cst_169 {dimension_numbers = #tpu.dot_dimension_numbers<[1], [0], [0], [1], [0, 0, 1, 1], [], []>} : vector<1x128xbf16>, vector<128x128xbf16>, vector<1x128xf32> -> vector<1x128xf32>
    %206 = arith.addf %201, %205 : vector<1x128xf32>
    %207 = vector.extract_strided_slice %140 {offsets = [13, 0], sizes = [1, 128], strides = [1, 1]} : vector<16x128xbf16> to vector<1x128xbf16>
    %c13 = arith.constant 13 : index
    %c0_170 = arith.constant 0 : index
    %c0_171 = arith.constant 0 : index
    %208 = vector.load %arg9[%c13, %c0_170, %c0_171] : memref<16x128x128xbf16, #tpu.memory_space<vmem>>, vector<1x128x128xbf16>
    %209 = vector.shape_cast %208 : vector<1x128x128xbf16> to vector<128x128xbf16>
    %cst_172 = arith.constant dense<0.000000e+00> : vector<1x128xf32>
    %210 = tpu.matmul %207, %209, %cst_172 {dimension_numbers = #tpu.dot_dimension_numbers<[1], [0], [0], [1], [0, 0, 1, 1], [], []>} : vector<1x128xbf16>, vector<128x128xbf16>, vector<1x128xf32> -> vector<1x128xf32>
    %211 = arith.addf %206, %210 : vector<1x128xf32>
    %212 = vector.extract_strided_slice %140 {offsets = [14, 0], sizes = [1, 128], strides = [1, 1]} : vector<16x128xbf16> to vector<1x128xbf16>
    %c14 = arith.constant 14 : index
    %c0_173 = arith.constant 0 : index
    %c0_174 = arith.constant 0 : index
    %213 = vector.load %arg9[%c14, %c0_173, %c0_174] : memref<16x128x128xbf16, #tpu.memory_space<vmem>>, vector<1x128x128xbf16>
    %214 = vector.shape_cast %213 : vector<1x128x128xbf16> to vector<128x128xbf16>
    %cst_175 = arith.constant dense<0.000000e+00> : vector<1x128xf32>
    %215 = tpu.matmul %212, %214, %cst_175 {dimension_numbers = #tpu.dot_dimension_numbers<[1], [0], [0], [1], [0, 0, 1, 1], [], []>} : vector<1x128xbf16>, vector<128x128xbf16>, vector<1x128xf32> -> vector<1x128xf32>
    %216 = arith.addf %211, %215 : vector<1x128xf32>
    %217 = vector.extract_strided_slice %140 {offsets = [15, 0], sizes = [1, 128], strides = [1, 1]} : vector<16x128xbf16> to vector<1x128xbf16>
    %c15 = arith.constant 15 : index
    %c0_176 = arith.constant 0 : index
    %c0_177 = arith.constant 0 : index
    %218 = vector.load %arg9[%c15, %c0_176, %c0_177] : memref<16x128x128xbf16, #tpu.memory_space<vmem>>, vector<1x128x128xbf16>
    %219 = vector.shape_cast %218 : vector<1x128x128xbf16> to vector<128x128xbf16>
    %cst_178 = arith.constant dense<0.000000e+00> : vector<1x128xf32>
    %220 = tpu.matmul %217, %219, %cst_178 {dimension_numbers = #tpu.dot_dimension_numbers<[1], [0], [0], [1], [0, 0, 1, 1], [], []>} : vector<1x128xbf16>, vector<128x128xbf16>, vector<1x128xf32> -> vector<1x128xf32>
    %221 = arith.addf %216, %220 : vector<1x128xf32>
    %cst_179 = arith.constant 0.000000e+00 : f32
    %222 = vector.broadcast %cst_179 : f32 to vector<1x128xf32>
    %223 = arith.maximumf %221, %222 : vector<1x128xf32>
    %224 = arith.truncf %223 : vector<1x128xf32> to vector<1x128xbf16>
    %c0_180 = arith.constant 0 : index
    %c0_181 = arith.constant 0 : index
    %225 = vector.load %arg11[%c0_180, %c0_181] : memref<128x128xbf16, #tpu.memory_space<vmem>>, vector<128x128xbf16>
    %cst_182 = arith.constant dense<0.000000e+00> : vector<1x128xf32>
    %226 = tpu.matmul %224, %225, %cst_182 {dimension_numbers = #tpu.dot_dimension_numbers<[1], [0], [0], [1], [0, 0, 1, 1], [], []>} : vector<1x128xbf16>, vector<128x128xbf16>, vector<1x128xf32> -> vector<1x128xf32>
    %c0_183 = arith.constant 0 : index
    %c0_184 = arith.constant 0 : index
    %227 = vector.load %arg12[%c0_183, %c0_184] : memref<1x128xf32, #tpu.memory_space<vmem>>, vector<1x128xf32>
    %228 = arith.addf %226, %227 : vector<1x128xf32>
    %cst_185 = arith.constant 0.000000e+00 : f32
    %229 = vector.broadcast %cst_185 : f32 to vector<1x128xf32>
    %230 = arith.maximumf %228, %229 : vector<1x128xf32>
    %231 = arith.truncf %230 : vector<1x128xf32> to vector<1x128xbf16>
    %c0_186 = arith.constant 0 : index
    %c0_187 = arith.constant 0 : index
    %232 = vector.load %arg13[%c0_186, %c0_187] : memref<128x128xbf16, #tpu.memory_space<vmem>>, vector<128x128xbf16>
    %cst_188 = arith.constant dense<0.000000e+00> : vector<1x128xf32>
    %233 = tpu.matmul %231, %232, %cst_188 {dimension_numbers = #tpu.dot_dimension_numbers<[1], [0], [0], [1], [0, 0, 1, 1], [], []>} : vector<1x128xbf16>, vector<128x128xbf16>, vector<1x128xf32> -> vector<1x128xf32>
    %c0_189 = arith.constant 0 : index
    %c0_190 = arith.constant 0 : index
    %234 = vector.load %arg14[%c0_189, %c0_190] : memref<1x128xf32, #tpu.memory_space<vmem>>, vector<1x128xf32>
    %235 = arith.addf %233, %234 : vector<1x128xf32>
    %236 = vector.shape_cast %235 : vector<1x128xf32> to vector<1x128xf32>
    %237 = vector.broadcast %236 : vector<1x128xf32> to vector<8x128xf32>
    %c0_191 = arith.constant 0 : index
    %c0_192 = arith.constant 0 : index
    %c0_193 = arith.constant 0 : index
    %238 = vector.load %arg16[%c0_191, %c0_192, %c0_193] : memref<1x8x128xf32, #tpu.memory_space<vmem>>, vector<1x8x128xf32>
    %239 = vector.shape_cast %238 : vector<1x8x128xf32> to vector<8x128xf32>
    %240 = vector.shape_cast %237 : vector<8x128xf32> to vector<1x8x128xf32>
    tpu.vector_store %arg16[%c0_191, %c0_192, %c0_193], %240 {strides = array<i32>} : memref<1x8x128xf32, #tpu.memory_space<vmem>>, vector<1x8x128xf32>,
    return
  }
  func.func @transform_0(%arg0: i32) -> (i32, i32, i32) {
    %c0_i32 = arith.constant 0 : i32
    %c0_i32_0 = arith.constant 0 : i32
    %c0_i32_1 = arith.constant 0 : i32
    return %arg0, %c0_i32, %c0_i32_0 : i32, i32, i32
  }
  func.func @transform_1(%arg0: i32) -> (i32, i32) {
    %c0_i32 = arith.constant 0 : i32
    %c0_i32_0 = arith.constant 0 : i32
    %c0_i32_1 = arith.constant 0 : i32
    return %c0_i32, %c0_i32_0 : i32, i32
  }
  func.func @transform_2(%arg0: i32) -> (i32, i32) {
    %c0_i32 = arith.constant 0 : i32
    %c0_i32_0 = arith.constant 0 : i32
    %c0_i32_1 = arith.constant 0 : i32
    return %c0_i32, %c0_i32_0 : i32, i32
  }
  func.func @transform_3(%arg0: i32) -> (i32, i32, i32) {
    %c0_i32 = arith.constant 0 : i32
    %c0_i32_0 = arith.constant 0 : i32
    %c0_i32_1 = arith.constant 0 : i32
    %c0_i32_2 = arith.constant 0 : i32
    return %c0_i32, %c0_i32_0, %c0_i32_1 : i32, i32, i32
  }
  func.func @transform_4(%arg0: i32) -> (i32, i32) {
    %c0_i32 = arith.constant 0 : i32
    %c0_i32_0 = arith.constant 0 : i32
    %c0_i32_1 = arith.constant 0 : i32
    return %c0_i32, %c0_i32_0 : i32, i32
  }
  func.func @transform_5(%arg0: i32) -> (i32, i32) {
    %c0_i32 = arith.constant 0 : i32
    %c0_i32_0 = arith.constant 0 : i32
    %c0_i32_1 = arith.constant 0 : i32
    return %c0_i32, %c0_i32_0 : i32, i32
  }
  func.func @transform_6(%arg0: i32) -> (i32, i32) {
    %c0_i32 = arith.constant 0 : i32
    %c0_i32_0 = arith.constant 0 : i32
    %c0_i32_1 = arith.constant 0 : i32
    return %c0_i32, %c0_i32_0 : i32, i32
  }
  func.func @transform_7(%arg0: i32) -> (i32, i32) {
    %c0_i32 = arith.constant 0 : i32
    %c0_i32_0 = arith.constant 0 : i32
    %c0_i32_1 = arith.constant 0 : i32
    return %c0_i32, %c0_i32_0 : i32, i32
  }
  func.func @transform_8(%arg0: i32) -> (i32, i32, i32) {
    %c0_i32 = arith.constant 0 : i32
    %c0_i32_0 = arith.constant 0 : i32
    %c0_i32_1 = arith.constant 0 : i32
    %c0_i32_2 = arith.constant 0 : i32
    return %c0_i32, %c0_i32_0, %c0_i32_1 : i32, i32, i32
  }
  func.func @transform_9(%arg0: i32) -> (i32, i32) {
    %c0_i32 = arith.constant 0 : i32
    %c0_i32_0 = arith.constant 0 : i32
    %c0_i32_1 = arith.constant 0 : i32
    return %c0_i32, %c0_i32_0 : i32, i32
  }
  func.func @transform_10(%arg0: i32) -> (i32, i32) {
    %c0_i32 = arith.constant 0 : i32
    %c0_i32_0 = arith.constant 0 : i32
    %c0_i32_1 = arith.constant 0 : i32
    return %c0_i32, %c0_i32_0 : i32, i32
  }
  func.func @transform_11(%arg0: i32) -> (i32, i32) {
    %c0_i32 = arith.constant 0 : i32
    %c0_i32_0 = arith.constant 0 : i32
    %c0_i32_1 = arith.constant 0 : i32
    return %c0_i32, %c0_i32_0 : i32, i32
  }
  func.func @transform_12(%arg0: i32) -> (i32, i32) {
    %c0_i32 = arith.constant 0 : i32
    %c0_i32_0 = arith.constant 0 : i32
    %c0_i32_1 = arith.constant 0 : i32
    return %c0_i32, %c0_i32_0 : i32, i32
  }
  func.func @transform_13(%arg0: i32) -> (i32, i32) {
    %c0_i32 = arith.constant 0 : i32
    %c0_i32_0 = arith.constant 0 : i32
    %c0_i32_1 = arith.constant 0 : i32
    return %c0_i32, %c0_i32_0 : i32, i32
  }
  func.func @transform_14(%arg0: i32) -> (i32, i32, i32) {
    %c0_i32 = arith.constant 0 : i32
    %c0_i32_0 = arith.constant 0 : i32
    %c0_i32_1 = arith.constant 0 : i32
    return %arg0, %c0_i32, %c0_i32_0 : i32, i32, i32
  }
  func.func @transform_15(%arg0: i32) -> (i32, i32, i32) {
    %c0_i32 = arith.constant 0 : i32
    %c0_i32_0 = arith.constant 0 : i32
    %c0_i32_1 = arith.constant 0 : i32
    return %arg0, %c0_i32, %c0_i32_0 : i32, i32, i32
  }
}

</mosaic_0001>

<bundles_post_ra>
// kernel: faster_rcnn_forward.1
= control target key start
LH: loop header
LB: loop body
LE: loop exit
PB: predicated region body
PF: predicated region fallthrough
CT: control target
= control target key end

     0   :  { %s10709_s18 = smov 0   ;;  %s12484_s0 = inlined_call_operand.vmem [shape: bf16[2,256,128], index: 0, kind: input, shape index: {}]   ;;  %s12485_s1 = inlined_call_operand.vmem [shape: bf16[128,128], index: 1, kind: input, shape index: {}]   ;;  %s12486_s2 = inlined_call_operand.vmem [shape: f32[1,128], index: 2, kind: input, shape index: {}]   ;;  %s12487_s3 = inlined_call_operand.vmem [shape: bf16[9,128,128], index: 3, kind: input, shape index: {}]   ;;  %s12488_s4 = inlined_call_operand.vmem [shape: f32[1,128], index: 4, kind: input, shape index: {}]   ;;  %s12489_s5 = inlined_call_operand.vmem [shape: bf16[128,128], index: 5, kind: input, shape index: {}]   ;;  %s12490_s6 = inlined_call_operand.vmem [shape: f32[1,128], index: 6, kind: input, shape index: {}]   ;;  %s12491_s7 = inlined_call_operand.vmem [shape: bf16[16,256], index: 7, kind: input, shape index: {}]   ;;  %s12492_s8 = inlined_call_operand.vmem [shape: bf16[16,128,128], index: 8, kind: input, shape index: {}]   ;;  %s12493_s9 = inlined_call_operand.vmem [shape: f32[1,128], index: 9, kind: input, shape index: {}]   ;;  %s12494_s10 = inlined_call_operand.vmem [shape: bf16[128,128], index: 10, kind: input, shape index: {}]   ;;  %s12495_s11 = inlined_call_operand.vmem [shape: f32[1,128], index: 11, kind: input, shape index: {}]   ;;  %s12496_s12 = inlined_call_operand.vmem [shape: bf16[128,128], index: 12, kind: input, shape index: {}]   ;;  %s12497_s13 = inlined_call_operand.vmem [shape: f32[1,128], index: 13, kind: input, shape index: {}]   ;;  %s12498_s14 = inlined_call_operand.vmem [shape: bf16[2,256,128], index: 14, kind: output, shape index: {0}]   ;;  %s12499_s15 = inlined_call_operand.vmem [shape: f32[2,8,128], index: 15, kind: output, shape index: {1}]  }
   0x1 LB: > { %s7618_s19 = sadd.s32 4294967295, %s10623_s18   ;;  %p7622_p0 = scmp.ge.s32.totalorder %s10623_s18, 1  ;;  %s10623_s18 = sphi %s10709_s18, %s26_s18  }
   0x2   : > { %p440_p1 = scmp.lt.s32.totalorder %s10623_s18, 3 }
   0x4   : > { %p441_p2 = pnand %p7622_p0, %p440_p1 }
   0x6   : > { %444 = sbr.rel (%p441_p2) target bundleno = 2425 (0x979), region = 76 }
   0xd   : > { %v10364_v0 = vld [vmem:[%s12485_s1] sm:$0xff]   ;;  %p492_p3 = scmp.lt.s32.totalorder %s7618_s19, 1  ;;  %v10365_v1 = vld [vmem:[%s12485_s1 + $0x8] sm:$0xff]   ;;  %v10366_v2 = vld [vmem:[%s12485_s1 + $0x10] sm:$0xff]   ;;  %v10625_v30 = vmov 0.0   ;;  %v937_v32 = vlaneseq  ;;  %vm10626_vm1 = vmmov 1  }
   0xe   : > { %9148 = vmatprep.subr.bf16.mxu0 %v10364_v0  ;;  %v10367_v3 = vld [vmem:[%s12485_s1 + $0x18] sm:$0xff]   ;;  %v10368_v5 = vld [vmem:[%s12485_s1 + $0x20] sm:$0xff]   ;;  %v10369_v6 = vld [vmem:[%s12485_s1 + $0x28] sm:$0xff]   ;;  %899 = vst [vmem:[#allocation2] sm:$0xff] %v10625_v30 }
   0xf   : > { %s12690_s19 = smov (!%p492_p3, %s7618_s19), 1  ;;  %9149 = vmatpush3.bf16.msra.mxu0 %v10364_v0  ;;  %v10370_v7 = vld [vmem:[%s12485_s1 + $0x30] sm:$0xff]   ;;  %v10371_v8 = vld [vmem:[%s12485_s1 + $0x38] sm:$0xff]   ;;  %v10388_v9 = vld [vmem:[%s12487_s3] sm:$0xff]   ;;  %900 = vst [vmem:[#allocation2 + $0x8] sm:$0xff] %v10625_v30  ;;  %v10788_v33 = vshrl.u32 %v937_v32, 7 }
  0x10   : > { %9150 = vmatprep.subr.bf16.mxu0 %v10365_v1  ;;  %s8571_s26 = sshll.u32 %s12690_s19, 7  ;;  %v10389_v10 = vld [vmem:[%s12487_s3 + $0x8] sm:$0xff]   ;;  %9196 = vmatprep.subr.bf16.mxu1 %v10388_v9  ;;  %v10390_v11 = vld [vmem:[%s12487_s3 + $0x10] sm:$0xff]   ;;  %v10391_v14 = vld [vmem:[%s12487_s3 + $0x18] sm:$0xff]   ;;  %901 = vst [vmem:[#allocation2 + $0x10] sm:$0xff] %v10625_v30  ;;  %s7627_s30 = sshll.u32 %s12690_s19, 3 }
  0x11   : > { %s10734_s29 = scalar_lea.vmem %s12484_s0, %s8571_s26  ;;  %9197 = vmatpush3.bf16.msra.mxu1 %v10388_v9  ;;  %v10392_v28 = vld [vmem:[%s12487_s3 + $0x20] sm:$0xff]   ;;  %v10393_v29 = vld [vmem:[%s12487_s3 + $0x28] sm:$0xff]   ;;  %902 = vst [vmem:[#allocation2 + $0x118] sm:$0xff] %v10625_v30  ;;  %903 = vst [vmem:[#allocation2 + $0x120] sm:$0xff] %v10625_v30  ;;  %v974_v36 = vand.u32 15, %v10788_v33  ;;  %v940_v58 = vadd.s32 16, %v10788_v33  ;;  %s11823_s24 = scalar_lea.vmem %s12498_s14, %s8571_s26 }
  0x12   : > { %v10372_v4 = vld [vmem:[%s10734_s29] sm:$0xff]   ;;  %v10373_v12 = vld [vmem:[%s10734_s29 + $0x8] sm:$0xff]   ;;  %9198 = vmatprep.subr.bf16.mxu1 %v10389_v10  ;;  %v10374_v13 = vld [vmem:[%s10734_s29 + $0x10] sm:$0xff]   ;;  %904 = vst [vmem:[#allocation2 + $0x128] sm:$0xff] %v10625_v30  ;;  %v942_v62 = vadd.s32 32, %v10788_v33  ;;  %s505_s20 = scalar_lea.vmem %s12499_s15, %s7627_s30 }
  0x13   : > { %9151 = vmatpush3.bf16.msra.mxu0 %v10365_v1  ;;  %9164 = vmatprep.mubr.bf16.mxu0 %v10372_v4  ;;  %v10375_v15 = vld [vmem:[%s10734_s29 + $0x18] sm:$0xff]   ;;  %v10376_v16 = vld [vmem:[%s10734_s29 + $0x20] sm:$0xff]   ;;  %v10377_v17 = vld [vmem:[%s10734_s29 + $0x28] sm:$0xff]   ;;  %12555 = vst [vmem:[#allocation4_spill] sm:$0xff] %v10788_v33  ;;  %vm1354_vm0 = vcmp.ge.s32.totalorder %v974_v36, 1  ;;  %v988_v0 = vand.u32 15, %v940_v58 }
  0x14   : > { %9152 = vmatprep.subr.bf16.mxu0 %v10366_v2  ;;  %v10378_v18 = vld [vmem:[%s10734_s29 + $0x30] sm:$0xff]   ;;  %v10379_v19 = vld [vmem:[%s10734_s29 + $0x38] sm:$0xff]   ;;  %v10380_v20 = vld [vmem:[%s10734_s29 + $0x40] sm:$0xff]  }
  0x15   : > { %9199 = vmatpush3.bf16.msra.mxu1 %v10389_v10  ;;  %v10381_v21 = vld [vmem:[%s10734_s29 + $0x48] sm:$0xff]   ;;  %v10382_v22 = vld [vmem:[%s10734_s29 + $0x50] sm:$0xff]   ;;  %v10383_v23 = vld [vmem:[%s10734_s29 + $0x58] sm:$0xff]   ;;  %vm1356_vm3 = vcmp.ge.s32.totalorder %v988_v0, 1 }
  0x16   : > { %9200 = vmatprep.subr.bf16.mxu1 %v10390_v11  ;;  %v10384_v24 = vld [vmem:[%s10734_s29 + $0x60] sm:$0xff]   ;;  %v10385_v25 = vld [vmem:[%s10734_s29 + $0x68] sm:$0xff]   ;;  %v10386_v26 = vld [vmem:[%s10734_s29 + $0x70] sm:$0xff]  }
  0x17   : > { %9153 = vmatpush3.bf16.msra.mxu0 %v10366_v2  ;;  %v10387_v27 = vld [vmem:[%s10734_s29 + $0x78] sm:$0xff]   ;;  %v10394_v31 = vld [vmem:[%s12487_s3 + $0x30] sm:$0xff]   ;;  %v10397_v34 = vld [vmem:[%s12489_s5] sm:$0xff]  }
  0x18   : > { %9154 = vmatprep.subr.bf16.mxu0 %v10367_v3  ;;  %v10395_v35 = vld [vmem:[%s12487_s3 + $0x38] sm:$0xff]   ;;  %v1450_v37 = vld [vmem:[#allocation2 + $0x7] sm:$0xff]  ;;  %v1451_v38 = vld [vmem:[#allocation2 + $0xf] sm:$0xff] }
  0x19   : > { %9201 = vmatpush3.bf16.msra.mxu1 %v10390_v11  ;;  %v10398_v39 = vld [vmem:[%s12489_s5 + $0x8] sm:$0xff]   ;;  %v7662_v40 = vpack.c.bf16 %v1451_v38, %v1450_v37  ;;  %vm10801_vm2 = vmpackc.low %vm10626_vm1, %vm1354_vm0  ;;  %v10400_v42 = vld [vmem:[%s12489_s5 + $0x10] sm:$0xff]  }
  0x1a   : > { %9202 = vmatprep.subr.bf16.mxu1 %v10391_v14  ;;  %v10813_v43 = vld [vmem:[%s12487_s3 + $0x40] sm:$0xff]   ;;  %v10401_v44 = vld [vmem:[%s12489_s5 + $0x18] sm:$0xff]   ;;  %v10404_v46 = vld [vmem:[%s12489_s5 + $0x28] sm:$0xff]  }
  0x1b   : > { %9155 = vmatpush3.bf16.msra.mxu0 %v10367_v3  ;;  %9212 = vmatprep.mubr.msk.bf16.mxu1 %vm10801_vm2, %v7662_v40  ;;  %v10403_v45 = vld [vmem:[%s12489_s5 + $0x20] sm:$0xff]   ;;  %v10406_v47 = vld [vmem:[%s12489_s5 + $0x30] sm:$0xff]   ;;  %v10407_v48 = vld [vmem:[%s12489_s5 + $0x38] sm:$0xff]  }
  0x1c   : > { %9156 = vmatprep.subr.bf16.mxu0 %v10368_v5  ;;  %v10834_v49 = vld [vmem:[%s12486_s2] ss:$0 sm:$0xff]  ;;  %vm10857_vm5 = vmpackc.low %vm10626_vm1, %vm1356_vm3  ;;  %v10399_v30 = vld [vmem:[%s12487_s3 + $0x48] sm:$0xff]  }
  0x1d   : > { %9203 = vmatpush3.bf16.msra.mxu1 %v10391_v14 }
  0x1e   : > { %9204 = vmatprep.subr.bf16.mxu1 %v10392_v28 }
  0x1f   : > { %9157 = vmatpush3.bf16.msra.mxu0 %v10368_v5 }
  0x20   : > { %9158 = vmatprep.subr.bf16.mxu0 %v10369_v6 }
  0x21   : > { %9205 = vmatpush3.bf16.msra.mxu1 %v10392_v28  ;;  %v10456_v28 = vld [vmem:[%s12487_s3 + $0x1e0] sm:$0xff]  }
  0x22   : > { %9206 = vmatprep.subr.bf16.mxu1 %v10393_v29 }
  0x23   : > { %9159 = vmatpush3.bf16.msra.mxu0 %v10369_v6  ;;  %v1002_v6 = vand.u32 15, %v942_v62  ;;  %v10405_v62 = vld [vmem:[%s12487_s3 + $0x58] sm:$0xff]  }
  0x24   : > { %9160 = vmatprep.subr.bf16.mxu0 %v10370_v7 }
  0x25   : > { %9207 = vmatpush3.bf16.msra.mxu1 %v10393_v29  ;;  %vm10851_vm4 = vcmp.ge.s32.totalorder %v1002_v6, 1 }
  0x26   : > { %9208 = vmatprep.subr.bf16.mxu1 %v10394_v31  ;;  %vm10866_vm6 = vmpackc.low %vm10626_vm1, %vm10851_vm4 }
  0x27   : > { %9161 = vmatpush3.bf16.msra.mxu0 %v10370_v7 }
  0x28   : > { %9162 = vmatprep.subr.bf16.mxu0 %v10371_v8 }
  0x29   : > { %9209 = vmatpush3.bf16.msra.mxu1 %v10394_v31 }
  0x2a   : > { %9210 = vmatprep.subr.bf16.mxu1 %v10395_v35 }
  0x2b   : > { %9163 = vmatpush3.bf16.msra.mxu0 %v10371_v8 }
  0x2c   : > { %9628 = vmatprep.subr.bf16.mxu0 %v10397_v34 }
  0x2d   : > { %9211 = vmatpush3.bf16.msra.mxu1 %v10395_v35 }
  0x2e   : > { %9165 = vmatmul.mubr.bf16.vlgmr.msra.gmra.mrb[0].mxu0 %v10373_v12  ;;  %9244 = vmatprep.subr.bf16.mxu1 %v10813_v43  ;;  %v944_v12 = vadd.s32 48, %v10788_v33 }
  0x2f   : > { %9168 = vmatprep.mubr.bf16.mxu0 %v10374_v13  ;;  %9629 = vmatpush3.bf16.msra.mxu0 %v10397_v34 }
  0x30   : > { %9630 = vmatprep.subr.bf16.mxu0 %v10398_v39 }
  0x33   : > { %9631 = vmatpush3.bf16.msra.mxu0 %v10398_v39 }
  0x34   : > { %9632 = vmatprep.subr.bf16.mxu0 %v10400_v42 }
  0x36   : > { %9169 = vmatmul.mubr.bf16.gmra.mrb[4].mxu0 %v10375_v15 }
  0x37   : > { %9172 = vmatprep.mubr.bf16.mxu0 %v10376_v16  ;;  %9633 = vmatpush3.bf16.msra.mxu0 %v10400_v42  ;;  %v948_v42 = vadd.s32 80, %v10788_v33  ;;  %v954_v16 = vadd.s32 128, %v10788_v33 }
  0x38   : > { %9634 = vmatprep.subr.bf16.mxu0 %v10401_v44 }
  0x3b   : > { %9635 = vmatpush3.bf16.msra.mxu0 %v10401_v44 }
  0x3c   : > { %9636 = vmatprep.subr.bf16.mxu0 %v10403_v45 }
  0x3e   : > { %9173 = vmatmul.mubr.bf16.gmra.mrb[8].mxu0 %v10377_v17  ;;  %v946_v17 = vadd.s32 64, %v10788_v33 }
  0x3f   : > { %9176 = vmatprep.mubr.bf16.mxu0 %v10378_v18  ;;  %9637 = vmatpush3.bf16.msra.mxu0 %v10403_v45 }
  0x40   : > { %9638 = vmatprep.subr.bf16.mxu0 %v10404_v46  ;;  %v1030_v35 = vand.u32 15, %v946_v17 }
  0x42   : > { %vm10888_vm8 = vcmp.ge.s32.totalorder %v1030_v35, 1 }
  0x43   : > { %9639 = vmatpush3.bf16.msra.mxu0 %v10404_v46  ;;  %v10402_v46 = vld [vmem:[%s12487_s3 + $0x50] sm:$0xff]   ;;  %vm10903_vm10 = vmpackc.low %vm10626_vm1, %vm10888_vm8 }
  0x44   : > { %9640 = vmatprep.subr.bf16.mxu0 %v10406_v47 }
  0x46   : > { %9177 = vmatmul.mubr.bf16.gmra.mrb[12].mxu0 %v10379_v19  ;;  %v10455_v19 = vld [vmem:[%s12487_s3 + $0x1d8] sm:$0xff]  }
  0x47   : > { %9180 = vmatprep.mubr.bf16.mxu0 %v10380_v20  ;;  %9641 = vmatpush3.bf16.msra.mxu0 %v10406_v47 }
  0x48   : > { %9642 = vmatprep.subr.bf16.mxu0 %v10407_v48 }
  0x4b   : > { %9643 = vmatpush3.bf16.msra.mxu0 %v10407_v48 }
  0x4e   : > { %9181 = vmatmul.mubr.bf16.gmra.mrb[16].mxu0 %v10381_v21 }
  0x4f   : > { %9184 = vmatprep.mubr.bf16.mxu0 %v10382_v22 }
  0x56   : > { %9185 = vmatmul.mubr.bf16.gmra.mrb[20].mxu0 %v10383_v23 }
  0x57   : > { %9188 = vmatprep.mubr.bf16.mxu0 %v10384_v24  ;;  %v1016_v24 = vand.u32 15, %v944_v12 }
  0x59   : > { %vm1360_vm7 = vcmp.ge.s32.totalorder %v1016_v24, 1 }
  0x5a   : > { %vm10894_vm9 = vmpackc.low %vm10626_vm1, %vm1360_vm7 }
  0x5e   : > { %9189 = vmatmul.mubr.bf16.gmra.mrb[24].mxu0 %v10385_v25 }
  0x5f   : > { %9192 = vmatprep.mubr.bf16.mxu0 %v10386_v26 }
  0x66   : > { %9193 = vmatmul.mubr.bf16.gmra.mrb[28].mxu0 %v10387_v27 }
 0x101   : > { %v9166_v50 = vpop.f32.mrb[0].mxu0 }
 0x102   : > { %v749_v51 = vadd.f32 %v9166_v50, %v10834_v49  ;;  %v740_v52 = vpop.f32.mrb[1].mxu0 }
 0x103   : > { %v741_v53 = vadd.f32 %v10834_v49, %v740_v52  ;;  %v9167_v54 = vpop.f32.mrb[2].mxu0 }
 0x104   : > { %v869_v55 = vmax.f32 %v749_v51, 0.0  ;;  %v752_v56 = vadd.f32 %v9167_v54, %v10834_v49  ;;  %v743_v57 = vpop.f32.mrb[3].mxu0  ;;  %v10457_v51 = vld [vmem:[%s12487_s3 + $0x1e8] sm:$0xff]  }
 0x105   : > { %v867_v59 = vmax.f32 %v741_v53, 0.0  ;;  %v744_v60 = vadd.f32 %v10834_v49, %v743_v57 }
 0x106   : > { %907 = vst [vmem:[#allocation2 + $0x28] sm:$0xff] %v869_v55  ;;  %v870_v61 = vmax.f32 %v752_v56, 0.0  ;;  %v1044_v56 = vand.u32 15, %v948_v42 }
 0x107   : > { %905 = vst [vmem:[#allocation2 + $0x18] sm:$0xff] %v867_v59  ;;  %v868_v63 = vmax.f32 %v744_v60, 0.0  ;;  %v10458_v60 = vld [vmem:[%s12487_s3 + $0x1f0] sm:$0xff]  }
 0x108   : > { %908 = vst [vmem:[#allocation2 + $0x30] sm:$0xff] %v870_v61  ;;  %v10842_v1 = vpack.c.bf16 %v870_v61, %v869_v55  ;;  %vm1364_vm11 = vcmp.ge.s32.totalorder %v1044_v56, 1 }
 0x109   : > { %906 = vst [vmem:[#allocation2 + $0x20] sm:$0xff] %v868_v63  ;;  %v9170_v2 = vpop.f32.mrb[4].mxu0  ;;  %v10844_v3 = vpack.c.bf16 %v868_v63, %v867_v59  ;;  %vm10930_vm13 = vmpackc.low %vm10626_vm1, %vm1364_vm11 }
 0x10a   : > { %v765_v4 = vadd.f32 %v9170_v2, %v10834_v49  ;;  %v756_v5 = vpop.f32.mrb[5].mxu0 }
 0x10b   : > { %v757_v7 = vadd.f32 %v10834_v49, %v756_v5  ;;  %v9171_v8 = vpop.f32.mrb[6].mxu0 }
 0x10c   : > { %v873_v9 = vmax.f32 %v765_v4, 0.0  ;;  %v768_v10 = vadd.f32 %v9171_v8, %v10834_v49  ;;  %v759_v11 = vpop.f32.mrb[7].mxu0 }
 0x10d   : > { %v871_v13 = vmax.f32 %v757_v7, 0.0  ;;  %v760_v14 = vadd.f32 %v10834_v49, %v759_v11 }
 0x10e   : > { %911 = vst [vmem:[#allocation2 + $0x48] sm:$0xff] %v873_v9  ;;  %v874_v15 = vmax.f32 %v768_v10, 0.0  ;;  %v1452_v21 = vld [vmem:[#allocation2 + $0x17] sm:$0xff]  ;;  %v952_v10 = vadd.s32 112, %v10788_v33 }
 0x10f   : > { %909 = vst [vmem:[#allocation2 + $0x38] sm:$0xff] %v871_v13  ;;  %v872_v18 = vmax.f32 %v760_v14, 0.0  ;;  %v1455_v20 = vld [vmem:[#allocation2 + $0x2f] sm:$0xff] }
 0x110   : > { %912 = vst [vmem:[#allocation2 + $0x50] sm:$0xff] %v874_v15  ;;  %v1453_v22 = vld [vmem:[#allocation2 + $0x1f] sm:$0xff]  ;;  %v1454_v23 = vld [vmem:[#allocation2 + $0x27] sm:$0xff]  ;;  %v10861_v25 = vpack.c.bf16 %v874_v15, %v873_v9  ;;  %v1072_v24 = vand.u32 15, %v952_v10 }
 0x111   : > { %910 = vst [vmem:[#allocation2 + $0x40] sm:$0xff] %v872_v18  ;;  %v9174_v26 = vpop.f32.mrb[8].mxu0  ;;  %v7665_v27 = vpack.c.bf16 %v1453_v22, %v1452_v21  ;;  %v7668_v29 = vpack.c.bf16 %v1455_v20, %v1454_v23  ;;  %v10873_v31 = vpack.c.bf16 %v872_v18, %v871_v13  ;;  %v10408_v13 = vld [vmem:[%s12487_s3 + $0x60] sm:$0xff]   ;;  %v10459_v18 = vld [vmem:[%s12487_s3 + $0x1f8] sm:$0xff]  }
 0x112   : > { %v781_v32 = vadd.f32 %v9174_v26, %v10834_v49  ;;  %v772_v34 = vpop.f32.mrb[9].mxu0  ;;  %vm1368_vm15 = vcmp.ge.s32.totalorder %v1072_v24, 1 }
 0x113   : > { %v773_v36 = vadd.f32 %v10834_v49, %v772_v34  ;;  %v9175_v37 = vpop.f32.mrb[10].mxu0  ;;  %9213 = vmatmul.mubr.msk.bf16.vlgmr.msra.gmra.mrb[0].mxu1 %vm10857_vm5, %v7665_v27  ;;  %v10409_v34 = vld [vmem:[%s12487_s3 + $0x68] sm:$0xff]   ;;  %vm10972_vm3 = vmpackc.low %vm10626_vm1, %vm1368_vm15 }
 0x114   : > { %v877_v38 = vmax.f32 %v781_v32, 0.0  ;;  %v784_v39 = vadd.f32 %v9175_v37, %v10834_v49  ;;  %9245 = vmatpush3.bf16.msra.mxu1 %v10813_v43  ;;  %v775_v40 = vpop.f32.mrb[11].mxu0  ;;  %9216 = vmatprep.mubr.msk.bf16.mxu1 %vm10866_vm6, %v7668_v29  ;;  %v950_v43 = vadd.s32 96, %v10788_v33 }
 0x115   : > { %v875_v44 = vmax.f32 %v773_v36, 0.0  ;;  %v776_v45 = vadd.f32 %v10834_v49, %v775_v40  ;;  %9246 = vmatprep.subr.bf16.mxu1 %v10399_v30 }
 0x116   : > { %915 = vst [vmem:[#allocation2 + $0x68] sm:$0xff] %v877_v38  ;;  %v878_v47 = vmax.f32 %v784_v39, 0.0  ;;  %v1456_v53 = vld [vmem:[#allocation2 + $0x37] sm:$0xff]  ;;  %v1058_v4 = vand.u32 15, %v950_v43 }
 0x117   : > { %913 = vst [vmem:[#allocation2 + $0x58] sm:$0xff] %v875_v44  ;;  %v876_v50 = vmax.f32 %v776_v45, 0.0  ;;  %v1459_v52 = vld [vmem:[#allocation2 + $0x4f] sm:$0xff] }
 0x118   : > { %916 = vst [vmem:[#allocation2 + $0x70] sm:$0xff] %v878_v47  ;;  %v1457_v54 = vld [vmem:[#allocation2 + $0x3f] sm:$0xff]  ;;  %9247 = vmatpush3.bf16.msra.mxu1 %v10399_v30  ;;  %v1458_v55 = vld [vmem:[#allocation2 + $0x47] sm:$0xff]  ;;  %v10898_v57 = vpack.c.bf16 %v878_v47, %v877_v38  ;;  %vm10924_vm12 = vcmp.ge.s32.totalorder %v1058_v4, 1  ;;  %v12574_v30 = vmov 0  ;;  %v1086_v38 = vand.u32 15, %v954_v16 }
 0x119   : > { %914 = vst [vmem:[#allocation2 + $0x60] sm:$0xff] %v876_v50  ;;  %v9178_v58 = vpop.f32.mrb[12].mxu0  ;;  %v7671_v59 = vpack.c.bf16 %v1457_v54, %v1456_v53  ;;  %v7674_v61 = vpack.c.bf16 %v1459_v52, %v1458_v55  ;;  %9248 = vmatprep.subr.bf16.mxu1 %v10402_v46  ;;  %v10910_v63 = vpack.c.bf16 %v876_v50, %v875_v44  ;;  %vm10941_vm14 = vmpackc.low %vm10626_vm1, %vm10924_vm12  ;;  %v10410_v43 = vld [vmem:[%s12487_s3 + $0x70] sm:$0xff]   ;;  %v958_v53 = vadd.s32 160, %v10788_v33 }
 0x11a   : > { %v797_v0 = vadd.f32 %v9178_v58, %v10834_v49  ;;  %v788_v2 = vpop.f32.mrb[13].mxu0  ;;  %v12575_v30 = vsel %vm10941_vm14, 4294967295, %v12574_v30  ;;  %vm10966_vm0 = vcmp.ge.s32.totalorder %v1086_v38, 1  ;;  %v12578_v55 = vmov 0 }
 0x11b   : > { %v789_v5 = vadd.f32 %v10834_v49, %v788_v2  ;;  %v9179_v6 = vpop.f32.mrb[14].mxu0  ;;  %9217 = vmatmul.mubr.msk.bf16.gmra.mrb[4].mxu1 %vm10894_vm9, %v7671_v59  ;;  %v12579_v55 = vsel %vm10972_vm3, 4294967295, %v12578_v55  ;;  %vm10983_vm4 = vmpackc.low %vm10626_vm1, %vm10966_vm0 }
 0x11c   : > { %v881_v7 = vmax.f32 %v797_v0, 0.0  ;;  %v800_v8 = vadd.f32 %v9179_v6, %v10834_v49  ;;  %v791_v9 = vpop.f32.mrb[15].mxu0  ;;  %9220 = vmatprep.mubr.msk.bf16.mxu1 %vm10903_vm10, %v7674_v61  ;;  %9249 = vmatpush3.bf16.msra.mxu1 %v10402_v46  ;;  %v956_v46 = vadd.s32 144, %v10788_v33 }
 0x11d   : > { %v879_v11 = vmax.f32 %v789_v5, 0.0  ;;  %v792_v12 = vadd.f32 %v10834_v49, %v791_v9  ;;  %9250 = vmatprep.subr.bf16.mxu1 %v10405_v62  ;;  %v12580_v5 = vmov 0 }
 0x11e   : > { %919 = vst [vmem:[#allocation2 + $0x88] sm:$0xff] %v881_v7  ;;  %v882_v14 = vmax.f32 %v800_v8, 0.0  ;;  %v1460_v21 = vld [vmem:[#allocation2 + $0x57] sm:$0xff]  ;;  %v12581_v5 = vsel %vm10983_vm4, 4294967295, %v12580_v5 }
 0x11f   : > { %917 = vst [vmem:[#allocation2 + $0x78] sm:$0xff] %v879_v11  ;;  %v880_v17 = vmax.f32 %v792_v12, 0.0  ;;  %v1463_v20 = vld [vmem:[#allocation2 + $0x6f] sm:$0xff]  ;;  %v10411_v8 = vld [vmem:[%s12487_s3 + $0x78] sm:$0xff]  }
 0x120   : > { %920 = vst [vmem:[#allocation2 + $0x90] sm:$0xff] %v882_v14  ;;  %v1461_v22 = vld [vmem:[#allocation2 + $0x5f] sm:$0xff]  ;;  %v1462_v23 = vld [vmem:[#allocation2 + $0x67] sm:$0xff]  ;;  %9251 = vmatpush3.bf16.msra.mxu1 %v10405_v62  ;;  %v10934_v26 = vpack.c.bf16 %v882_v14, %v881_v7  ;;  %v1100_v62 = vand.u32 15, %v956_v46 }
 0x121   : > { %918 = vst [vmem:[#allocation2 + $0x80] sm:$0xff] %v880_v17  ;;  %v9182_v27 = vpop.f32.mrb[16].mxu0  ;;  %v10936_v29 = vpack.c.bf16 %v1461_v22, %v1460_v21  ;;  %v10945_v32 = vpack.c.bf16 %v1463_v20, %v1462_v23  ;;  %9252 = vmatprep.subr.bf16.mxu1 %v10408_v13  ;;  %v10950_v35 = vpack.c.bf16 %v880_v17, %v879_v11  ;;  %v1114_v11 = vand.u32 15, %v958_v53  ;;  %v11009_v22 = vld [vmem:[%s12487_s3 + $0x80] sm:$0xff]  }
 0x122   : > { %v813_v36 = vadd.f32 %v9182_v27, %v10834_v49  ;;  %v804_v37 = vpop.f32.mrb[17].mxu0  ;;  %vm1372_vm7 = vcmp.ge.s32.totalorder %v1100_v62, 1  ;;  %v960_v17 = vadd.s32 176, %v10788_v33  ;;  %v962_v27 = vadd.s32 192, %v10788_v33  ;;  %v3804_v41 = vld [vmem:[#allocation2 + $0x5f] sm:$0xff] }
 0x123   : > { %v805_v39 = vadd.f32 %v10834_v49, %v804_v37  ;;  %v9183_v40 = vpop.f32.mrb[18].mxu0  ;;  %9221 = vmatmul.mubr.msk.bf16.gmra.mrb[8].mxu1 %vm10930_vm13, %v10936_v29  ;;  %vm11011_vm8 = vcmp.ge.s32.totalorder %v1114_v11, 1  ;;  %vm11017_vm11 = vmpackc.low %vm10626_vm1, %vm1372_vm7  ;;  %v964_v62 = vadd.s32 208, %v10788_v33  ;;  %v966_v11 = vadd.s32 224, %v10788_v33 }
 0x124   : > { %v885_v42 = vmax.f32 %v813_v36, 0.0  ;;  %v816_v44 = vadd.f32 %v9183_v40, %v10834_v49  ;;  %v807_v45 = vpop.f32.mrb[19].mxu0  ;;  %9224 = vmatprep.mubr.msk.bf16.mxu1 %vm10941_vm14, %v10945_v32  ;;  %9253 = vmatpush3.bf16.msra.mxu1 %v10408_v13  ;;  %vm11028_vm12 = vmpackc.low %vm10626_vm1, %vm11011_vm8  ;;  %v1142_v53 = vand.u32 15, %v962_v27  ;;  %v12592_v27 = vmov 0 }
 0x125   : > { %v883_v47 = vmax.f32 %v805_v39, 0.0  ;;  %v808_v48 = vadd.f32 %v10834_v49, %v807_v45  ;;  %9254 = vmatprep.subr.bf16.mxu1 %v10409_v34 }
 0x126   : > { %923 = vst [vmem:[#allocation2 + $0xa8] sm:$0xff] %v885_v42  ;;  %v886_v50 = vmax.f32 %v816_v44, 0.0  ;;  %v1464_v58 = vld [vmem:[#allocation2 + $0x77] sm:$0xff]  ;;  %vm11048_vm0 = vcmp.ge.s32.totalorder %v1142_v53, 1 }
 0x127   : > { %921 = vst [vmem:[#allocation2 + $0x98] sm:$0xff] %v883_v47  ;;  %v884_v54 = vmax.f32 %v808_v48, 0.0  ;;  %v1467_v56 = vld [vmem:[#allocation2 + $0x8f] sm:$0xff]  ;;  %vm11065_vm8 = vmpackc.low %vm10626_vm1, %vm11048_vm0 }
 0x128   : > { %924 = vst [vmem:[#allocation2 + $0xb0] sm:$0xff] %v886_v50  ;;  %v1465_v59 = vld [vmem:[#allocation2 + $0x7f] sm:$0xff]  ;;  %v1466_v61 = vld [vmem:[#allocation2 + $0x87] sm:$0xff]  ;;  %9255 = vmatpush3.bf16.msra.mxu1 %v10409_v34  ;;  %v10976_v0 = vpack.c.bf16 %v886_v50, %v885_v42  ;;  %v1128_v42 = vand.u32 15, %v960_v17  ;;  %v12593_v27 = vsel %vm11065_vm8, 4294967295, %v12592_v27 }
 0x129   : > { %922 = vst [vmem:[#allocation2 + $0xa0] sm:$0xff] %v884_v54  ;;  %v9186_v2 = vpop.f32.mrb[20].mxu0  ;;  %v10978_v4 = vpack.c.bf16 %v1465_v59, %v1464_v58  ;;  %v10987_v6 = vpack.c.bf16 %v1467_v56, %v1466_v61  ;;  %v10989_v7 = vpack.c.bf16 %v884_v54, %v883_v47  ;;  %9256 = vmatprep.subr.bf16.mxu1 %v10410_v43  ;;  %v12586_v47 = vmov 0 }
 0x12a   : > { %v829_v9 = vadd.f32 %v9186_v2, %v10834_v49  ;;  %v820_v10 = vpop.f32.mrb[21].mxu0  ;;  %v12587_v47 = vsel %vm11028_vm12, 4294967295, %v12586_v47  ;;  %vm1376_vm15 = vcmp.ge.s32.totalorder %v1128_v42, 1 }
 0x12b   : > { %v821_v12 = vadd.f32 %v10834_v49, %v820_v10  ;;  %v9187_v13 = vpop.f32.mrb[22].mxu0  ;;  %9225 = vmatmul.mubr.msk.bf16.gmra.mrb[12].mxu1 %vm10972_vm3, %v10978_v4  ;;  %8964 = vmatprep.subr.bf16.mxu0 %v10989_v7  ;;  %vm11054_vm7 = vmpackc.low %vm10626_vm1, %vm1376_vm15 }
 0x12c   : > { %v889_v14 = vmax.f32 %v829_v9, 0.0  ;;  %v832_v15 = vadd.f32 %v9187_v13, %v10834_v49  ;;  %v823_v16 = vpop.f32.mrb[23].mxu0  ;;  %9228 = vmatprep.mubr.msk.bf16.mxu1 %vm10983_vm4, %v10987_v6  ;;  %9257 = vmatpush3.bf16.msra.mxu1 %v10410_v43  ;;  %v12590_v13 = vmov 0 }
 0x12d   : > { %v887_v20 = vmax.f32 %v821_v12, 0.0  ;;  %v824_v21 = vadd.f32 %v10834_v49, %v823_v16  ;;  %9258 = vmatprep.subr.bf16.mxu1 %v10411_v8  ;;  %v12591_v13 = vsel %vm11054_vm7, 4294967295, %v12590_v13 }
 0x12e   : > { %927 = vst [vmem:[#allocation2 + $0xc8] sm:$0xff] %v889_v14  ;;  %v890_v23 = vmax.f32 %v832_v15, 0.0  ;;  %v1468_v38 = vld [vmem:[#allocation2 + $0x97] sm:$0xff] }
 0x12f   : > { %925 = vst [vmem:[#allocation2 + $0xb8] sm:$0xff] %v887_v20  ;;  %v888_v34 = vmax.f32 %v824_v21, 0.0  ;;  %v1471_v37 = vld [vmem:[#allocation2 + $0xaf] sm:$0xff] }
 0x130   : > { %928 = vst [vmem:[#allocation2 + $0xd0] sm:$0xff] %v890_v23  ;;  %v1469_v39 = vld [vmem:[#allocation2 + $0x9f] sm:$0xff]  ;;  %v1470_v40 = vld [vmem:[#allocation2 + $0xa7] sm:$0xff]  ;;  %9259 = vmatpush3.bf16.msra.mxu1 %v10411_v8  ;;  %v11021_v44 = vpack.c.bf16 %v890_v23, %v889_v14 }
 0x131   : > { %926 = vst [vmem:[#allocation2 + $0xc0] sm:$0xff] %v888_v34  ;;  %v9190_v45 = vpop.f32.mrb[24].mxu0  ;;  %v11023_v46 = vpack.c.bf16 %v1469_v39, %v1468_v38  ;;  %v11032_v48 = vpack.c.bf16 %v1471_v37, %v1470_v40  ;;  %9292 = vmatprep.subr.bf16.mxu1 %v11009_v22  ;;  %v11035_v43 = vpack.c.bf16 %v888_v34, %v887_v20  ;;  %v1156_v20 = vand.u32 15, %v964_v62 }
 0x132   : > { %v845_v50 = vadd.f32 %v9190_v45, %v10834_v49  ;;  %v836_v52 = vpop.f32.mrb[25].mxu0  ;;  %v1170_v40 = vand.u32 15, %v966_v11  ;;  %v12594_v62 = vmov 0  ;;  %v12596_v11 = vmov 0 }
 0x133   : > { %v837_v54 = vadd.f32 %v10834_v49, %v836_v52  ;;  %v9191_v56 = vpop.f32.mrb[26].mxu0  ;;  %9229 = vmatmul.mubr.msk.bf16.gmra.mrb[16].mxu1 %vm11017_vm11, %v11023_v46  ;;  %vm1380_vm15 = vcmp.ge.s32.totalorder %v1156_v20, 1  ;;  %v12598_v20 = vmov 0 }
 0x134   : > { %v893_v58 = vmax.f32 %v845_v50, 0.0  ;;  %v848_v59 = vadd.f32 %v9191_v56, %v10834_v49  ;;  %v839_v61 = vpop.f32.mrb[27].mxu0  ;;  %9232 = vmatprep.mubr.msk.bf16.mxu1 %vm11028_vm12, %v11032_v48  ;;  %vm1382_vm0 = vcmp.ge.s32.totalorder %v1170_v40, 1  ;;  %v10414_v40 = vld [vmem:[%s12487_s3 + $0x90] sm:$0xff]  }
 0x135   : > { %v891_v2 = vmax.f32 %v837_v54, 0.0  ;;  %v840_v8 = vadd.f32 %v10834_v49, %v839_v61 }
 0x136   : > { %931 = vst [vmem:[#allocation2 + $0xe8] sm:$0xff] %v893_v58  ;;  %v894_v9 = vmax.f32 %v848_v59, 0.0  ;;  %v1472_v15 = vld [vmem:[#allocation2 + $0xb7] sm:$0xff] }
 0x137   : > { %929 = vst [vmem:[#allocation2 + $0xd8] sm:$0xff] %v891_v2  ;;  %v892_v12 = vmax.f32 %v840_v8, 0.0  ;;  %v1475_v14 = vld [vmem:[#allocation2 + $0xcf] sm:$0xff] }
 0x138   : > { %932 = vst [vmem:[#allocation2 + $0xf0] sm:$0xff] %v894_v9  ;;  %v1473_v16 = vld [vmem:[#allocation2 + $0xbf] sm:$0xff]  ;;  %v1474_v17 = vld [vmem:[#allocation2 + $0xc7] sm:$0xff]  ;;  %v11058_v21 = vpack.c.bf16 %v894_v9, %v893_v58  ;;  %v968_v58 = vadd.s32 240, %v10788_v33 }
 0x139   : > { %930 = vst [vmem:[#allocation2 + $0xe0] sm:$0xff] %v892_v12  ;;  %v9194_v23 = vpop.f32.mrb[28].mxu0  ;;  %v11060_v24 = vpack.c.bf16 %v1473_v16, %v1472_v15  ;;  %v11069_v34 = vpack.c.bf16 %v1475_v14, %v1474_v17  ;;  %v11071_v37 = vpack.c.bf16 %v892_v12, %v891_v2 }
 0x13a   : > { %v861_v38 = vadd.f32 %v9194_v23, %v10834_v49  ;;  %v852_v39 = vpop.f32.mrb[29].mxu0  ;;  %v1184_v14 = vand.u32 15, %v968_v58 }
 0x13b   : > { %v853_v42 = vadd.f32 %v10834_v49, %v852_v39  ;;  %v9195_v45 = vpop.f32.mrb[30].mxu0  ;;  %9233 = vmatmul.mubr.msk.bf16.gmra.mrb[20].mxu1 %vm11054_vm7, %v11060_v24  ;;  %vm11087_vm7 = vmpackc.low %vm10626_vm1, %vm1380_vm15  ;;  %v10413_v39 = vld [vmem:[%s12487_s3 + $0x88] sm:$0xff]  }
 0x13c   : > { %v897_v50 = vmax.f32 %v861_v38, 0.0  ;;  %v864_v52 = vadd.f32 %v9195_v45, %v10834_v49  ;;  %v855_v53 = vpop.f32.mrb[31].mxu0  ;;  %9236 = vmatprep.mubr.msk.bf16.mxu1 %vm11065_vm8, %v11069_v34  ;;  %v12595_v62 = vsel %vm11087_vm7, 4294967295, %v12594_v62  ;;  %vm11095_vm8 = vmpackc.low %vm10626_vm1, %vm1382_vm0  ;;  %vm1384_vm15 = vcmp.ge.s32.totalorder %v1184_v14, 1  ;;  %v2221_v45 = vld [vmem:[#allocation2 + $0x9] sm:$0xff] }
 0x13d   : > { %v895_v54 = vmax.f32 %v853_v42, 0.0  ;;  %v856_v56 = vadd.f32 %v10834_v49, %v855_v53  ;;  %v12597_v11 = vsel %vm11095_vm8, 4294967295, %v12596_v11  ;;  %vm11109_vm0 = vmpackc.low %vm10626_vm1, %vm1384_vm15  ;;  %v10627_v38 = vmov 0.0|0.0   ;;  %v10415_v42 = vld [vmem:[%s12487_s3 + $0x98] sm:$0xff]  }
 0x13e   : > { %935 = vst [vmem:[#allocation2 + $0x108] sm:$0xff] %v897_v50  ;;  %v898_v59 = vmax.f32 %v864_v52, 0.0  ;;  %v1476_v8 = vld [vmem:[#allocation2 + $0xd7] sm:$0xff]  ;;  %v12599_v20 = vsel %vm11109_vm0, 4294967295, %v12598_v20  ;;  %v2224_v52 = vld [vmem:[#allocation2 + $0x21] sm:$0xff]  ;;  %v947_v53 = vadd.s32 72, %v10788_v33 }
 0x13f   : > { %933 = vst [vmem:[#allocation2 + $0xf8] sm:$0xff] %v895_v54  ;;  %v11084_v61 = vmax.f32 %v856_v56, 0.0  ;;  %v1479_v2 = vld [vmem:[#allocation2 + $0xef] sm:$0xff]  ;;  %v12602_v56 = vmov 0 }
 0x140   : > { %936 = vst [vmem:[#allocation2 + $0x110] sm:$0xff] %v898_v59  ;;  %v1477_v9 = vld [vmem:[#allocation2 + $0xdf] sm:$0xff]  ;;  %v1478_v10 = vld [vmem:[#allocation2 + $0xe7] sm:$0xff]  ;;  %v1037_v14 = vand.u32 15, %v947_v53 }
 0x141   : > { %934 = vst [vmem:[#allocation2 + $0x100] sm:$0xff] %v11084_v61  ;;  %v11092_v49 = vpack.c.bf16 %v1477_v9, %v1476_v8  ;;  %v11099_v12 = vpack.c.bf16 %v1479_v2, %v1478_v10  ;;  %v1930_v15 = vpack.c.bf16 %v11084_v61, %v895_v54  ;;  %v2226_v54 = vld [vmem:[#allocation2 + $0x31] sm:$0xff]  ;;  %v2225_v59 = vld [vmem:[#allocation2 + $0x29] sm:$0xff]  ;;  %v12604_v2 = vmov 0 }
 0x142   : > { %v10421_v8 = vld [vmem:[%s12487_s3 + $0xc8] sm:$0xff]   ;;  %v11184_v10 = vpack.c.bf16 %v2226_v54, %v2225_v59 }
 0x143   : > { %9237 = vmatmul.mubr.msk.bf16.gmra.mrb[24].mxu1 %vm11087_vm7, %v11092_v49  ;;  %v10425_v54 = vld [vmem:[%s12487_s3 + $0xe8] sm:$0xff]  }
 0x144   : > { %9240 = vmatprep.mubr.msk.bf16.mxu1 %vm11095_vm8, %v11099_v12 }
 0x146   : > { %v1480_v16 = vld [vmem:[#allocation2 + $0xf7] sm:$0xff] }
 0x147   : > { %v3827_v36 = vld [vmem:[#allocation2 + $0x117] sm:$0xff] }
 0x148   : > { %v1481_v17 = vld [vmem:[#allocation2 + $0xff] sm:$0xff] }
 0x149   : > { %v11113_v23 = vpack.c.bf16 %v1481_v17, %v1480_v16  ;;  %v949_v16 = vadd.s32 88, %v10788_v33  ;;  %v2227_v17 = vld [vmem:[#allocation2 + $0x39] sm:$0xff] }
 0x14b   : > { %9241 = vmatmul.mubr.msk.bf16.gmra.mrb[28].mxu1 %vm11109_vm0, %v11113_v23 }
 0x14c   : > { %9260 = vmatprep.mubr.bf16.mxu1 %v10627_v38  ;;  %v2228_v38 = vld [vmem:[#allocation2 + $0x41] sm:$0xff] }
 0x153   : > { %9261 = vmatmul.mubr.bf16.vlgmr.msra.gmra.mrb[0].mxu1 %v10844_v3  ;;  %v10417_v3 = vld [vmem:[%s12487_s3 + $0xa8] sm:$0xff]  }
 0x154   : > { %9293 = vmatpush3.bf16.msra.mxu1 %v11009_v22  ;;  %9264 = vmatprep.mubr.bf16.mxu1 %v10842_v1  ;;  %v10416_v1 = vld [vmem:[%s12487_s3 + $0xa0] sm:$0xff]   ;;  %v943_v22 = vadd.s32 40, %v10788_v33 }
 0x155   : > { %9294 = vmatprep.subr.bf16.mxu1 %v10413_v39 }
 0x156   : > { %v1009_v50 = vand.u32 15, %v943_v22  ;;  %v10424_v22 = vld [vmem:[%s12487_s3 + $0xe0] sm:$0xff]  }
 0x158   : > { %9295 = vmatpush3.bf16.msra.mxu1 %v10413_v39  ;;  %vm1391_vm7 = vcmp.le.s32.totalorder %v1009_v50, 14  ;;  %v951_v39 = vadd.s32 104, %v10788_v33  ;;  %v12610_v50 = vmov 0 }
 0x159   : > { %9296 = vmatprep.subr.bf16.mxu1 %v10414_v40  ;;  %vm11177_vm12 = vmpackc.low %vm1391_vm7, %vm10626_vm1 }
 0x15a   : > { %v12605_v2 = vsel %vm11177_vm12, 4294967295, %v12604_v2 }
 0x15b   : > { %9265 = vmatmul.mubr.bf16.gmra.mrb[4].mxu1 %v10873_v31  ;;  %v10419_v31 = vld [vmem:[%s12487_s3 + $0xb8] sm:$0xff]  }
 0x15c   : > { %9268 = vmatprep.mubr.bf16.mxu1 %v10861_v25  ;;  %9297 = vmatpush3.bf16.msra.mxu1 %v10414_v40  ;;  %v10418_v25 = vld [vmem:[%s12487_s3 + $0xb0] sm:$0xff]  }
 0x15d   : > { %9298 = vmatprep.subr.bf16.mxu1 %v10415_v42  ;;  %v2230_v40 = vld [vmem:[#allocation2 + $0x51] sm:$0xff] }
 0x160   : > { %9299 = vmatpush3.bf16.msra.mxu1 %v10415_v42  ;;  %v12606_v42 = vmov 0 }
 0x161   : > { %9300 = vmatprep.subr.bf16.mxu1 %v10416_v1 }
 0x163   : > { %9269 = vmatmul.mubr.bf16.gmra.mrb[8].mxu1 %v10910_v63  ;;  %v939_v63 = vadd.s32 8, %v10788_v33 }
 0x164   : > { %9272 = vmatprep.mubr.bf16.mxu1 %v10898_v57  ;;  %9301 = vmatpush3.bf16.msra.mxu1 %v10416_v1  ;;  %v10420_v57 = vld [vmem:[%s12487_s3 + $0xc0] sm:$0xff]   ;;  %v11202_v1 = vpack.c.bf16 %v2228_v38, %v2227_v17  ;;  %v959_v17 = vadd.s32 168, %v10788_v33  ;;  %v2238_v38 = vld [vmem:[#allocation2 + $0x91] sm:$0xff] }
 0x165   : > { %9302 = vmatprep.subr.bf16.mxu1 %v10417_v3 }
 0x168   : > { %9303 = vmatpush3.bf16.msra.mxu1 %v10417_v3  ;;  %v2229_v3 = vld [vmem:[#allocation2 + $0x49] sm:$0xff] }
 0x169   : > { %9304 = vmatprep.subr.bf16.mxu1 %v10418_v25 }
 0x16b   : > { %9273 = vmatmul.mubr.bf16.gmra.mrb[12].mxu1 %v10950_v35  ;;  %v981_v35 = vand.u32 15, %v939_v63  ;;  %v11212_v63 = vpack.c.bf16 %v2230_v40, %v2229_v3  ;;  %v2237_v3 = vld [vmem:[#allocation2 + $0x89] sm:$0xff] }
 0x16c   : > { %9276 = vmatprep.mubr.bf16.mxu1 %v10934_v26  ;;  %9305 = vmatpush3.bf16.msra.mxu1 %v10418_v25  ;;  %v941_v26 = vadd.s32 24, %v10788_v33  ;;  %v12608_v25 = vmov 0 }
 0x16d   : > { %9306 = vmatprep.subr.bf16.mxu1 %v10419_v31  ;;  %vm1387_vm15 = vcmp.le.s32.totalorder %v981_v35, 14  ;;  %v1065_v35 = vand.u32 15, %v951_v39  ;;  %v12614_v39 = vmov 0 }
 0x16e   : > { %vm11161_vm0 = vmpackc.low %vm1387_vm15, %vm10626_vm1 }
 0x170   : > { %9307 = vmatpush3.bf16.msra.mxu1 %v10419_v31  ;;  %v1051_v31 = vand.u32 15, %v949_v16  ;;  %v2236_v16 = vld [vmem:[#allocation2 + $0x81] sm:$0xff] }
 0x171   : > { %9340 = vmatprep.subr.bf16.mxu1 %v10420_v57 }
 0x173   : > { %9277 = vmatmul.mubr.bf16.gmra.mrb[16].mxu1 %v10989_v7  ;;  %v2222_v7 = vld [vmem:[#allocation2 + $0x11] sm:$0xff] }
 0x174   : > { %9280 = vmatprep.mubr.bf16.mxu1 %v10976_v0  ;;  %v12600_v0 = vmov 0 }
 0x175   : > { %v12601_v0 = vsel %vm11161_vm0, 4294967295, %v12600_v0 }
 0x17b   : > { %9281 = vmatmul.mubr.bf16.gmra.mrb[20].mxu1 %v11035_v43  ;;  %v7758_v43 = vpack.c.bf16 %v2222_v7, %v2221_v45  ;;  %v2231_v45 = vld [vmem:[#allocation2 + $0x59] sm:$0xff]  ;;  %v2232_v7 = vld [vmem:[#allocation2 + $0x61] sm:$0xff] }
 0x17c   : > { %9284 = vmatprep.mubr.bf16.mxu1 %v11021_v44  ;;  %v995_v44 = vand.u32 15, %v941_v26  ;;  %v953_v26 = vadd.s32 120, %v10788_v33 }
 0x17e   : > { %vm1389_vm8 = vcmp.le.s32.totalorder %v995_v44, 14  ;;  %v955_v44 = vadd.s32 136, %v10788_v33  ;;  %v1079_v53 = vand.u32 15, %v953_v26  ;;  %v11268_v26 = vpack.c.bf16 %v2238_v38, %v2237_v3  ;;  %v2243_v3 = vld [vmem:[#allocation2 + $0xb9] sm:$0xff] }
 0x17f   : > { %vm11170_vm15 = vmpackc.low %vm1389_vm8, %vm10626_vm1  ;;  %vm1395_vm8 = vcmp.le.s32.totalorder %v1037_v14, 14  ;;  %v10426_v14 = vld [vmem:[%s12487_s3 + $0xf0] sm:$0xff]   ;;  %v965_v38 = vadd.s32 216, %v10788_v33 }
 0x180   : > { %v12603_v56 = vsel %vm11170_vm15, 4294967295, %v12602_v56 }
 0x183   : > { %9285 = vmatmul.mubr.bf16.gmra.mrb[24].mxu1 %v11071_v37  ;;  %v2223_v37 = vld [vmem:[#allocation2 + $0x19] sm:$0xff] }
 0x184   : > { %9288 = vmatprep.mubr.bf16.mxu1 %v11058_v21  ;;  %v945_v21 = vadd.s32 56, %v10788_v33  ;;  %v11174_v58 = vpack.c.bf16 %v2224_v52, %v2223_v37  ;;  %v2233_v37 = vld [vmem:[#allocation2 + $0x69] sm:$0xff]  ;;  %v12612_v52 = vmov 0 }
 0x186   : > { %v1023_v9 = vand.u32 15, %v945_v21  ;;  %v11230_v21 = vpack.c.bf16 %v2232_v7, %v2231_v45  ;;  %v961_v45 = vadd.s32 184, %v10788_v33  ;;  %v11280_v7 = vld [vmem:[%s12487_s3 + $0x100] sm:$0xff]  }
 0x188   : > { %vm1393_vm7 = vcmp.le.s32.totalorder %v1023_v9, 14  ;;  %v957_v9 = vadd.s32 152, %v10788_v33 }
 0x18b   : > { %9289 = vmatmul.mubr.bf16.gmra.mrb[28].mxu1 %v1930_v15  ;;  %v10422_v15 = vld [vmem:[%s12487_s3 + $0xd0] sm:$0xff]  }
 0x18c   : > { %9308 = vmatprep.mubr.msk.bf16.mxu1 %vm11161_vm0, %v7758_v43  ;;  %v2234_v43 = vld [vmem:[#allocation2 + $0x71] sm:$0xff] }
 0x18d   : > { %v11240_v59 = vpack.c.bf16 %v2234_v43, %v2233_v37  ;;  %v2240_v43 = vld [vmem:[#allocation2 + $0xa1] sm:$0xff]  ;;  %v963_v37 = vadd.s32 200, %v10788_v33 }
 0x193   : > { %9309 = vmatmul.mubr.msk.bf16.vlgmr.msra.gmra.mrb[0].mxu1 %vm11170_vm15, %v11174_v58  ;;  %vm11198_vm15 = vmpackc.low %vm1393_vm7, %vm10626_vm1  ;;  %vm1397_vm7 = vcmp.le.s32.totalorder %v1051_v31, 14  ;;  %v12616_v31 = vmov 0 }
 0x194   : > { %9341 = vmatpush3.bf16.msra.mxu1 %v10420_v57  ;;  %9312 = vmatprep.mubr.msk.bf16.mxu1 %vm11177_vm12, %v11184_v10  ;;  %v12607_v42 = vsel %vm11198_vm15, 4294967295, %v12606_v42  ;;  %vm11205_vm12 = vmpackc.low %vm1395_vm8, %vm10626_vm1  ;;  %v10423_v57 = vld [vmem:[%s12487_s3 + $0xd8] sm:$0xff]   ;;  %vm1399_vm8 = vcmp.le.s32.totalorder %v1065_v35, 14 }
 0x195   : > { %9342 = vmatprep.subr.bf16.mxu1 %v10421_v8  ;;  %v12609_v25 = vsel %vm11205_vm12, 4294967295, %v12608_v25  ;;  %v10427_v35 = vld [vmem:[%s12487_s3 + $0xf8] sm:$0xff]  }
 0x198   : > { %9343 = vmatpush3.bf16.msra.mxu1 %v10421_v8  ;;  %v1093_v8 = vand.u32 15, %v955_v44  ;;  %v2239_v44 = vld [vmem:[#allocation2 + $0x99] sm:$0xff] }
 0x199   : > { %9344 = vmatprep.subr.bf16.mxu1 %v10422_v15 }
 0x19b   : > { %9313 = vmatmul.mubr.msk.bf16.gmra.mrb[4].mxu1 %vm11198_vm15, %v11202_v1  ;;  %vm11226_vm15 = vmpackc.low %vm1397_vm7, %vm10626_vm1  ;;  %vm1401_vm7 = vcmp.le.s32.totalorder %v1079_v53, 14  ;;  %v2242_v53 = vld [vmem:[#allocation2 + $0xb1] sm:$0xff] }
 0x19c   : > { %9316 = vmatprep.mubr.msk.bf16.mxu1 %vm11205_vm12, %v11212_v63  ;;  %9345 = vmatpush3.bf16.msra.mxu1 %v10422_v15  ;;  %v12611_v50 = vsel %vm11226_vm15, 4294967295, %v12610_v50  ;;  %vm11233_vm12 = vmpackc.low %vm1399_vm8, %vm10626_vm1  ;;  %v2235_v15 = vld [vmem:[#allocation2 + $0x79] sm:$0xff]  ;;  %vm1403_vm8 = vcmp.le.s32.totalorder %v1093_v8, 14  ;;  %v11288_v8 = vpack.c.bf16 %v2240_v43, %v2239_v44  ;;  %v2245_v43 = vld [vmem:[#allocation2 + $0xc9] sm:$0xff] }
 0x19d   : > { %9346 = vmatprep.subr.bf16.mxu1 %v10423_v57  ;;  %v12613_v52 = vsel %vm11233_vm12, 4294967295, %v12612_v52  ;;  %v11258_v40 = vpack.c.bf16 %v2236_v16, %v2235_v15  ;;  %v1135_v15 = vand.u32 15, %v961_v45  ;;  %v12623_v45 = vmov 0 }
 0x1a0   : > { %9347 = vmatpush3.bf16.msra.mxu1 %v10423_v57  ;;  %v1107_v57 = vand.u32 15, %v957_v9  ;;  %v2241_v9 = vld [vmem:[#allocation2 + $0xa9] sm:$0xff] }
 0x1a1   : > { %9348 = vmatprep.subr.bf16.mxu1 %v10424_v22  ;;  %v11296_v16 = vpack.c.bf16 %v2242_v53, %v2241_v9  ;;  %v1163_v53 = vand.u32 15, %v965_v38  ;;  %v12628_v38 = vmov 0 }
 0x1a3   : > { %9317 = vmatmul.mubr.msk.bf16.gmra.mrb[8].mxu1 %vm11226_vm15, %v11230_v21  ;;  %vm11254_vm15 = vmpackc.low %vm1401_vm7, %vm10626_vm1  ;;  %vm1405_vm7 = vcmp.le.s32.totalorder %v1107_v57, 14  ;;  %v2244_v57 = vld [vmem:[#allocation2 + $0xc1] sm:$0xff] }
 0x1a4   : > { %9320 = vmatprep.mubr.msk.bf16.mxu1 %vm11233_vm12, %v11240_v59  ;;  %9349 = vmatpush3.bf16.msra.mxu1 %v10424_v22  ;;  %v12615_v39 = vsel %vm11254_vm15, 4294967295, %v12614_v39  ;;  %vm11261_vm12 = vmpackc.low %vm1403_vm8, %vm10626_vm1  ;;  %v1121_v22 = vand.u32 15, %v959_v17  ;;  %v1149_v17 = vand.u32 15, %v963_v37  ;;  %v11311_v44 = vpack.c.bf16 %v2244_v57, %v2243_v3  ;;  %v2247_v3 = vld [vmem:[#allocation2 + $0xd9] sm:$0xff]  ;;  %v2248_v57 = vld [vmem:[#allocation2 + $0xe1] sm:$0xff] }
 0x1a5   : > { %9350 = vmatprep.subr.bf16.mxu1 %v10425_v54  ;;  %v12617_v31 = vsel %vm11261_vm12, 4294967295, %v12616_v31  ;;  %v12625_v37 = vmov 0 }
 0x1a6   : > { %vm1407_vm8 = vcmp.le.s32.totalorder %v1121_v22, 14  ;;  %v2246_v22 = vld [vmem:[#allocation2 + $0xd1] sm:$0xff] }
 0x1a7   : > { %v11318_v9 = vpack.c.bf16 %v2246_v22, %v2245_v43  ;;  %v2249_v22 = vld [vmem:[#allocation2 + $0xe9] sm:$0xff]  ;;  %v12632_v43 = vmov 0 }
 0x1a8   : > { %9351 = vmatpush3.bf16.msra.mxu1 %v10425_v54  ;;  %v12618_v54 = vmov 0 }
 0x1a9   : > { %9352 = vmatprep.subr.bf16.mxu1 %v10426_v14 }
 0x1ab   : > { %9321 = vmatmul.mubr.msk.bf16.gmra.mrb[12].mxu1 %vm11254_vm15, %v11258_v40  ;;  %vm11284_vm15 = vmpackc.low %vm1405_vm7, %vm10626_vm1  ;;  %vm1409_vm7 = vcmp.le.s32.totalorder %v1135_v15, 14 }
 0x1ac   : > { %9324 = vmatprep.mubr.msk.bf16.mxu1 %vm11261_vm12, %v11268_v26  ;;  %9353 = vmatpush3.bf16.msra.mxu1 %v10426_v14  ;;  %v12619_v54 = vsel %vm11284_vm15, 4294967295, %v12618_v54  ;;  %vm11291_vm12 = vmpackc.low %vm1407_vm8, %vm10626_vm1  ;;  %v12620_v14 = vmov 0  ;;  %vm1411_vm8 = vcmp.le.s32.totalorder %v1149_v17, 14  ;;  %v969_v17 = vadd.s32 248, %v10788_v33 }
 0x1ad   : > { %9354 = vmatprep.subr.bf16.mxu1 %v10427_v35  ;;  %v12621_v14 = vsel %vm11291_vm12, 4294967295, %v12620_v14  ;;  %vm11307_vm0 = vmpackc.low %vm1409_vm7, %vm10626_vm1  ;;  %vm1413_vm7 = vcmp.le.s32.totalorder %v1163_v53, 14 }
 0x1ae   : > { %12622 = vst [vmem:[#allocation5_spill] sm:$0xff] %v12621_v14  ;;  %v12624_v45 = vsel %vm11307_vm0, 4294967295, %v12623_v45  ;;  %v2250_v14 = vld [vmem:[#allocation2 + $0xf1] sm:$0xff]  ;;  %v1191_v53 = vand.u32 15, %v969_v17 }
 0x1b0   : > { %9355 = vmatpush3.bf16.msra.mxu1 %v10427_v35  ;;  %v967_v35 = vadd.s32 232, %v10788_v33 }
 0x1b1   : > { %9388 = vmatprep.subr.bf16.mxu1 %v11280_v7 }
 0x1b2   : > { %v1177_v15 = vand.u32 15, %v967_v35  ;;  %v11332_v35 = vpack.c.bf16 %v2248_v57, %v2247_v3  ;;  %v2252_v3 = vld [vmem:[#allocation2 + $0x101] sm:$0xff] }
 0x1b3   : > { %9325 = vmatmul.mubr.msk.bf16.gmra.mrb[16].mxu1 %vm11284_vm15, %v11288_v8  ;;  %vm11314_vm15 = vmpackc.low %vm1411_vm8, %vm10626_vm1  ;;  %v2624_v57 = vld [vmem:[#allocation2 + $0x1f] sm:$0xff] }
 0x1b4   : > { %9328 = vmatprep.mubr.msk.bf16.mxu1 %vm11291_vm12, %v11296_v16  ;;  %v12626_v37 = vsel %vm11314_vm15, 4294967295, %v12625_v37  ;;  %vm1415_vm8 = vcmp.le.s32.totalorder %v1177_v15, 14  ;;  %vm11328_vm12 = vmpackc.low %vm1413_vm7, %vm10626_vm1  ;;  %12631 = vst [vmem:[#allocation8_spill] sm:$0xff] %v11332_v35  ;;  %vm1417_vm7 = vcmp.le.s32.totalorder %v1191_v53, 14  ;;  %v2251_v15 = vld [vmem:[#allocation2 + $0xf9] sm:$0xff]  ;;  %v2625_v53 = vld [vmem:[#allocation2 + $0x27] sm:$0xff] }
 0x1b5   : > { %12627 = vst [vmem:[#allocation6_spill] sm:$0xff] %v12626_v37  ;;  %v12629_v38 = vsel %vm11328_vm12, 4294967295, %v12628_v38  ;;  %v11339_v37 = vpack.c.bf16 %v2250_v14, %v2249_v22  ;;  %v11352_v17 = vpack.c.bf16 %v2252_v3, %v2251_v15  ;;  %v2623_v14 = vld [vmem:[#allocation2 + $0x17] sm:$0xff]  ;;  %v10429_v15 = vld [vmem:[%s12487_s3 + $0x108] sm:$0xff]  }
 0x1b6   : > { %12630 = vst [vmem:[#allocation7_spill] sm:$0xff] %v12629_v38  ;;  %v7830_v22 = vpack.c.bf16 %v2624_v57, %v2623_v14  ;;  %v2628_v38 = vld [vmem:[#allocation2 + $0x3f] sm:$0xff]  ;;  %v2629_v57 = vld [vmem:[#allocation2 + $0x47] sm:$0xff]  ;;  %v2630_v14 = vld [vmem:[#allocation2 + $0x4f] sm:$0xff] }
 0x1b7   : > { %12635 = vst [vmem:[#allocation10_spill] sm:$0xff] %v11339_v37 }
 0x1bb   : > { %9329 = vmatmul.mubr.msk.bf16.gmra.mrb[20].mxu1 %vm11307_vm0, %v11311_v44  ;;  %vm11335_vm0 = vmpackc.low %vm1415_vm8, %vm10626_vm1 }
 0x1bc   : > { %9332 = vmatprep.mubr.msk.bf16.mxu1 %vm11314_vm15, %v11318_v9  ;;  %v12633_v43 = vsel %vm11335_vm0, 4294967295, %v12632_v43  ;;  %vm11348_vm8 = vmpackc.low %vm1417_vm7, %vm10626_vm1  ;;  %vm12638_vm1 = vnez %v12587_v47  ;;  %vm12639_vm7 = vnez %v12591_v13  ;;  %v3828_v47 = vld [vmem:[#allocation2 + $0x11f] sm:$0xff] }
 0x1bd   : > { %12634 = vst [vmem:[#allocation9_spill] sm:$0xff] %v12633_v43  ;;  %v2626_v43 = vld [vmem:[#allocation2 + $0x2f] sm:$0xff] }
 0x1c3   : > { %9333 = vmatmul.mubr.msk.bf16.gmra.mrb[24].mxu1 %vm11328_vm12, %v11332_v35  ;;  %v2627_v35 = vld [vmem:[#allocation2 + $0x37] sm:$0xff] }
 0x1c4   : > { %9336 = vmatprep.mubr.msk.bf16.mxu1 %vm11335_vm0, %v11339_v37  ;;  %v11359_v37 = vpack.c.bf16 %v2626_v43, %v2625_v53  ;;  %v11364_v3 = vpack.c.bf16 %v2628_v38, %v2627_v35  ;;  %v10430_v43 = vld [vmem:[%s12487_s3 + $0x110] sm:$0xff]   ;;  %v11376_v38 = vpack.c.bf16 %v2630_v14, %v2629_v57  ;;  %v10431_v35 = vld [vmem:[%s12487_s3 + $0x118] sm:$0xff]   ;;  %v10437_v57 = vld [vmem:[%s12487_s3 + $0x148] sm:$0xff]  }
 0x1c5   : > { %v10435_v53 = vld [vmem:[%s12487_s3 + $0x138] sm:$0xff]  }
 0x1cb   : > { %9337 = vmatmul.mubr.msk.bf16.gmra.mrb[28].mxu1 %vm11348_vm8, %v11352_v17 }
 0x1cc   : > { %9356 = vmatprep.mubr.msk.bf16.mxu1 %vm10801_vm2, %v7830_v22  ;;  %v10433_v22 = vld [vmem:[%s12487_s3 + $0x128] sm:$0xff]  }
 0x1d3   : > { %9357 = vmatmul.mubr.msk.bf16.vlgmr.msra.gmra.mrb[0].mxu1 %vm10857_vm5, %v11359_v37 }
 0x1d4   : > { %9389 = vmatpush3.bf16.msra.mxu1 %v11280_v7  ;;  %9360 = vmatprep.mubr.msk.bf16.mxu1 %vm10866_vm6, %v11364_v3  ;;  %v10432_v7 = vld [vmem:[%s12487_s3 + $0x120] sm:$0xff]  }
 0x1d5   : > { %9390 = vmatprep.subr.bf16.mxu1 %v10429_v15 }
 0x1d8   : > { %9391 = vmatpush3.bf16.msra.mxu1 %v10429_v15 }
 0x1d9   : > { %9392 = vmatprep.subr.bf16.mxu1 %v10430_v43 }
 0x1db   : > { %9361 = vmatmul.mubr.msk.bf16.gmra.mrb[4].mxu1 %vm10894_vm9, %v11376_v38 }
 0x1dc   : > { %9364 = vmatprep.mubr.msk.bf16.mxu1 %vm10903_vm10, %v10936_v29  ;;  %9393 = vmatpush3.bf16.msra.mxu1 %v10430_v43  ;;  %v10434_v29 = vld [vmem:[%s12487_s3 + $0x130] sm:$0xff]  }
 0x1dd   : > { %9394 = vmatprep.subr.bf16.mxu1 %v10431_v35 }
 0x1e0   : > { %9395 = vmatpush3.bf16.msra.mxu1 %v10431_v35  ;;  %v10438_v35 = vld [vmem:[%s12487_s3 + $0x150] sm:$0xff]  }
 0x1e1   : > { %9396 = vmatprep.subr.bf16.mxu1 %v10432_v7 }
 0x1e3   : > { %9365 = vmatmul.mubr.msk.bf16.gmra.mrb[8].mxu1 %vm10930_vm13, %v10945_v32  ;;  %v10436_v32 = vld [vmem:[%s12487_s3 + $0x140] sm:$0xff]  }
 0x1e4   : > { %9368 = vmatprep.mubr.msk.bf16.mxu1 %vm10941_vm14, %v10978_v4  ;;  %9397 = vmatpush3.bf16.msra.mxu1 %v10432_v7  ;;  %vm12642_vm14 = vnez %v12597_v11  ;;  %v2653_v4 = vld [vmem:[#allocation2 + $0x107] sm:$0xff]  ;;  %v3032_v7 = vld [vmem:[#allocation2 + $0x50] sm:$0xff] }
 0x1e5   : > { %9398 = vmatprep.subr.bf16.mxu1 %v10433_v22 }
 0x1e8   : > { %9399 = vmatpush3.bf16.msra.mxu1 %v10433_v22  ;;  %v3034_v22 = vld [vmem:[#allocation2 + $0x60] sm:$0xff] }
 0x1e9   : > { %9400 = vmatprep.subr.bf16.mxu1 %v10434_v29 }
 0x1eb   : > { %9369 = vmatmul.mubr.msk.bf16.gmra.mrb[12].mxu1 %vm10972_vm3, %v10987_v6  ;;  %vm12641_vm3 = vnez %v12595_v62  ;;  %v2654_v6 = vld [vmem:[#allocation2 + $0x10f] sm:$0xff] }
 0x1ec   : > { %9372 = vmatprep.mubr.msk.bf16.mxu1 %vm10983_vm4, %v11023_v46  ;;  %9401 = vmatpush3.bf16.msra.mxu1 %v10434_v29  ;;  %vm12640_vm4 = vnez %v12593_v27  ;;  %v3026_v46 = vld [vmem:[#allocation2 + $0x20] sm:$0xff]  ;;  %v3031_v29 = vld [vmem:[#allocation2 + $0x48] sm:$0xff] }
 0x1ed   : > { %9402 = vmatprep.subr.bf16.mxu1 %v10435_v53 }
 0x1f0   : > { %9403 = vmatpush3.bf16.msra.mxu1 %v10435_v53  ;;  %v11452_v53 = vpack.c.bf16 %v3032_v7, %v3031_v29  ;;  %v3042_v29 = vld [vmem:[#allocation2 + $0xa0] sm:$0xff] }
 0x1f1   : > { %9436 = vmatprep.subr.bf16.mxu1 %v10436_v32 }
 0x1f3   : > { %9373 = vmatmul.mubr.msk.bf16.gmra.mrb[16].mxu1 %vm11017_vm11, %v11032_v48  ;;  %v11432_v48 = vpack.c.bf16 %v2654_v6, %v2653_v4  ;;  %v3033_v4 = vld [vmem:[#allocation2 + $0x58] sm:$0xff] }
 0x1f4   : > { %9376 = vmatprep.mubr.msk.bf16.mxu1 %vm12638_vm1, %v11060_v24  ;;  %v3025_v24 = vld [vmem:[#allocation2 + $0x18] sm:$0xff] }
 0x1f5   : > { %v11434_v15 = vpack.c.bf16 %v3026_v46, %v3025_v24  ;;  %v10439_v6 = vld [vmem:[%s12487_s3 + $0x158] sm:$0xff]   ;;  %v10440_v46 = vld [vmem:[%s12487_s3 + $0x160] sm:$0xff]   ;;  %v3036_v24 = vld [vmem:[#allocation2 + $0x70] sm:$0xff] }
 0x1f7   : > { %12643 = vst [vmem:[#allocation11_spill] sm:$0xff] %v11434_v15 }
 0x1fb   : > { %9377 = vmatmul.mubr.msk.bf16.gmra.mrb[20].mxu1 %vm12639_vm7, %v11069_v34  ;;  %vm12644_vm7 = vnez %v12599_v20  ;;  %v3028_v34 = vld [vmem:[#allocation2 + $0x30] sm:$0xff] }
 0x1fc   : > { %9380 = vmatprep.mubr.msk.bf16.mxu1 %vm12640_vm4, %v11092_v49  ;;  %v3030_v49 = vld [vmem:[#allocation2 + $0x40] sm:$0xff] }
 0x203   : > { %9381 = vmatmul.mubr.msk.bf16.gmra.mrb[24].mxu1 %vm12641_vm3, %v11099_v12  ;;  %v3027_v12 = vld [vmem:[#allocation2 + $0x28] sm:$0xff]  ;;  %vm12651_vm3 = vnez %v12605_v2 }
 0x204   : > { %9384 = vmatprep.mubr.msk.bf16.mxu1 %vm12642_vm14, %v11113_v23  ;;  %v11440_v43 = vpack.c.bf16 %v3028_v34, %v3027_v12  ;;  %v3029_v23 = vld [vmem:[#allocation2 + $0x38] sm:$0xff]  ;;  %v3038_v34 = vld [vmem:[#allocation2 + $0x80] sm:$0xff]  ;;  %vm12650_vm14 = vnez %v12603_v56 }
 0x205   : > { %v11445_v14 = vpack.c.bf16 %v3030_v49, %v3029_v23  ;;  %v3035_v49 = vld [vmem:[#allocation2 + $0x68] sm:$0xff]  ;;  %v3037_v23 = vld [vmem:[#allocation2 + $0x78] sm:$0xff] }
 0x206   : > { %v11464_v12 = vpack.c.bf16 %v3036_v24, %v3035_v49  ;;  %v11469_v7 = vpack.c.bf16 %v3038_v34, %v3037_v23  ;;  %v3041_v24 = vld [vmem:[#allocation2 + $0x98] sm:$0xff]  ;;  %v3044_v23 = vld [vmem:[#allocation2 + $0xb0] sm:$0xff] }
 0x207   : > { %v10443_v34 = vld [vmem:[%s12487_s3 + $0x178] sm:$0xff]   ;;  %v11481_v49 = vpack.c.bf16 %v3042_v29, %v3041_v24  ;;  %v3050_v24 = vld [vmem:[#allocation2 + $0xe0] sm:$0xff] }
 0x208   : > { %12645 = vst [vmem:[#allocation12_spill] sm:$0xff] %v11464_v12  ;;  %12646 = vst [vmem:[#allocation13_spill] sm:$0xff] %v11469_v7 }
 0x209   : > { %12648 = vst [vmem:[#allocation15_spill] sm:$0xff] %v11481_v49 }
 0x20b   : > { %9385 = vmatmul.mubr.msk.bf16.gmra.mrb[28].mxu1 %vm12644_vm7, %v11432_v48  ;;  %vm12649_vm7 = vnez %v12601_v0 }
 0x20c   : > { %9404 = vmatprep.mubr.bf16.mxu1 %v11434_v15  ;;  %v3045_v15 = vld [vmem:[#allocation2 + $0xb8] sm:$0xff] }
 0x213   : > { %9405 = vmatmul.mubr.bf16.vlgmr.msra.gmra.mrb[0].mxu1 %v11440_v43 }
 0x214   : > { %9437 = vmatpush3.bf16.msra.mxu1 %v10436_v32  ;;  %9408 = vmatprep.mubr.bf16.mxu1 %v11445_v14  ;;  %v11457_v32 = vpack.c.bf16 %v3034_v22, %v3033_v4  ;;  %v3040_v22 = vld [vmem:[#allocation2 + $0x90] sm:$0xff]  ;;  %v3039_v4 = vld [vmem:[#allocation2 + $0x88] sm:$0xff] }
 0x215   : > { %9438 = vmatprep.subr.bf16.mxu1 %v10437_v57 }
 0x218   : > { %9439 = vmatpush3.bf16.msra.mxu1 %v10437_v57  ;;  %v10441_v57 = vld [vmem:[%s12487_s3 + $0x168] sm:$0xff]  }
 0x219   : > { %9440 = vmatprep.subr.bf16.mxu1 %v10438_v35 }
 0x21b   : > { %9409 = vmatmul.mubr.bf16.gmra.mrb[4].mxu1 %v11452_v53 }
 0x21c   : > { %9412 = vmatprep.mubr.bf16.mxu1 %v11457_v32  ;;  %9441 = vmatpush3.bf16.msra.mxu1 %v10438_v35  ;;  %v10442_v35 = vld [vmem:[%s12487_s3 + $0x170] sm:$0xff]  }
 0x21d   : > { %9442 = vmatprep.subr.bf16.mxu1 %v10439_v6 }
 0x220   : > { %9443 = vmatpush3.bf16.msra.mxu1 %v10439_v6  ;;  %v11476_v6 = vpack.c.bf16 %v3040_v22, %v3039_v4  ;;  %v3043_v22 = vld [vmem:[#allocation2 + $0xa8] sm:$0xff] }
 0x221   : > { %9444 = vmatprep.subr.bf16.mxu1 %v10440_v46  ;;  %v11488_v4 = vpack.c.bf16 %v3044_v23, %v3043_v22  ;;  %v11500_v23 = vld [vmem:[#allocation2 + $0xf8] sm:$0xff] }
 0x222   : > { %12647 = vst [vmem:[#allocation14_spill] sm:$0xff] %v11476_v6  ;;  %v3103_v22 = vpack.c.bf16 %v11084_v61, %v11500_v23  ;;  %v10446_v61 = vld [vmem:[%s12487_s3 + $0x190] sm:$0xff]  }
 0x223   : > { %9413 = vmatmul.mubr.bf16.gmra.mrb[8].mxu1 %v11464_v12 }
 0x224   : > { %9416 = vmatprep.mubr.bf16.mxu1 %v11469_v7  ;;  %9445 = vmatpush3.bf16.msra.mxu1 %v10440_v46  ;;  %v10444_v46 = vld [vmem:[%s12487_s3 + $0x180] sm:$0xff]   ;;  %v3049_v7 = vld [vmem:[#allocation2 + $0xd8] sm:$0xff] }
 0x225   : > { %9446 = vmatprep.subr.bf16.mxu1 %v10441_v57  ;;  %v11496_v12 = vpack.c.bf16 %v3050_v24, %v3049_v7  ;;  %v10445_v24 = vld [vmem:[%s12487_s3 + $0x188] sm:$0xff]  }
 0x228   : > { %9447 = vmatpush3.bf16.msra.mxu1 %v10441_v57  ;;  %v3046_v57 = vld [vmem:[#allocation2 + $0xc0] sm:$0xff] }
 0x229   : > { %9448 = vmatprep.subr.bf16.mxu1 %v10442_v35  ;;  %v11490_v29 = vpack.c.bf16 %v3046_v57, %v3045_v15  ;;  %v3051_v15 = vld [vmem:[#allocation2 + $0xe8] sm:$0xff] }
 0x22b   : > { %9417 = vmatmul.mubr.bf16.gmra.mrb[12].mxu1 %v11476_v6 }
 0x22c   : > { %9420 = vmatprep.mubr.bf16.mxu1 %v11481_v49  ;;  %9449 = vmatpush3.bf16.msra.mxu1 %v10442_v35  ;;  %v3048_v35 = vld [vmem:[#allocation2 + $0xd0] sm:$0xff]  ;;  %v3047_v49 = vld [vmem:[#allocation2 + $0xc8] sm:$0xff] }
 0x22d   : > { %9450 = vmatprep.subr.bf16.mxu1 %v10443_v34  ;;  %v11494_v6 = vpack.c.bf16 %v3048_v35, %v3047_v49  ;;  %v3056_v49 = vld [vmem:[#allocation2 + $0x110] sm:$0xff]  ;;  %v3055_v35 = vld [vmem:[#allocation2 + $0x108] sm:$0xff] }
 0x22e   : > { %v11507_v7 = vpack.c.bf16 %v3056_v49, %v3055_v35  ;;  %v3803_v35 = vld [vmem:[#allocation2 + $0x57] sm:$0xff] }
 0x230   : > { %9451 = vmatpush3.bf16.msra.mxu1 %v10443_v34  ;;  %v3052_v34 = vld [vmem:[#allocation2 + $0xf0] sm:$0xff] }
 0x231   : > { %9484 = vmatprep.subr.bf16.mxu1 %v10444_v46  ;;  %v11502_v57 = vpack.c.bf16 %v3052_v34, %v3051_v15 }
 0x233   : > { %9421 = vmatmul.mubr.bf16.gmra.mrb[16].mxu1 %v11488_v4 }
 0x234   : > { %9424 = vmatprep.mubr.bf16.mxu1 %v11490_v29 }
 0x23b   : > { %9425 = vmatmul.mubr.bf16.gmra.mrb[20].mxu1 %v11494_v6 }
 0x23c   : > { %9428 = vmatprep.mubr.bf16.mxu1 %v11496_v12 }
 0x243   : > { %9429 = vmatmul.mubr.bf16.gmra.mrb[24].mxu1 %v11502_v57 }
 0x244   : > { %9432 = vmatprep.mubr.bf16.mxu1 %v3103_v22  ;;  %v3426_v22 = vld [vmem:[#allocation2 + $0x111] sm:$0xff] }
 0x24b   : > { %9433 = vmatmul.mubr.bf16.gmra.mrb[28].mxu1 %v11507_v7 }
 0x24c   : > { %9452 = vmatprep.mubr.msk.bf16.mxu1 %vm12649_vm7, %v11174_v58  ;;  %v10447_v58 = vld [vmem:[%s12487_s3 + $0x198] sm:$0xff]   ;;  %vm12652_vm7 = vnez %v12607_v42 }
 0x253   : > { %9453 = vmatmul.mubr.msk.bf16.vlgmr.msra.gmra.mrb[0].mxu1 %vm12650_vm14, %v11184_v10  ;;  %vm12653_vm14 = vnez %v12609_v25  ;;  %v10448_v10 = vld [vmem:[%s12487_s3 + $0x1a0] sm:$0xff]  }
 0x254   : > { %9485 = vmatpush3.bf16.msra.mxu1 %v10444_v46  ;;  %9456 = vmatprep.mubr.msk.bf16.mxu1 %vm12651_vm3, %v11202_v1  ;;  %v10449_v1 = vld [vmem:[%s12487_s3 + $0x1a8] sm:$0xff]   ;;  %vm12654_vm3 = vnez %v12611_v50  ;;  %v12664_v46 = vld [vmem:[#allocation10_spill] sm:$0xff] }
 0x255   : > { %9486 = vmatprep.subr.bf16.mxu1 %v10445_v24 }
 0x258   : > { %9487 = vmatpush3.bf16.msra.mxu1 %v10445_v24  ;;  %v8007_v24 = vpack.c.bf16 %v3804_v41, %v3803_v35  ;;  %v3818_v41 = vld [vmem:[#allocation2 + $0xcf] sm:$0xff] }
 0x259   : > { %9488 = vmatprep.subr.bf16.mxu1 %v10446_v61 }
 0x25b   : > { %9457 = vmatmul.mubr.msk.bf16.gmra.mrb[4].mxu1 %vm12652_vm7, %v11212_v63  ;;  %vm12655_vm7 = vnez %v12613_v52  ;;  %v10450_v63 = vld [vmem:[%s12487_s3 + $0x1b0] sm:$0xff]  }
 0x25c   : > { %9460 = vmatprep.mubr.msk.bf16.mxu1 %vm12653_vm14, %v11230_v21  ;;  %9489 = vmatpush3.bf16.msra.mxu1 %v10446_v61  ;;  %v10451_v21 = vld [vmem:[%s12487_s3 + $0x1b8] sm:$0xff]   ;;  %vm12656_vm14 = vnez %v12615_v39  ;;  %v3809_v61 = vld [vmem:[#allocation2 + $0x87] sm:$0xff] }
 0x25d   : > { %9490 = vmatprep.subr.bf16.mxu1 %v10447_v58 }
 0x260   : > { %9491 = vmatpush3.bf16.msra.mxu1 %v10447_v58  ;;  %v3810_v58 = vld [vmem:[#allocation2 + $0x8f] sm:$0xff] }
 0x261   : > { %9492 = vmatprep.subr.bf16.mxu1 %v10448_v10 }
 0x263   : > { %9461 = vmatmul.mubr.msk.bf16.gmra.mrb[8].mxu1 %vm12654_vm3, %v11240_v59  ;;  %vm12657_vm3 = vnez %v12617_v31  ;;  %v10452_v59 = vld [vmem:[%s12487_s3 + $0x1c0] sm:$0xff]  }
 0x264   : > { %9464 = vmatprep.mubr.msk.bf16.mxu1 %vm12655_vm7, %v11258_v40  ;;  %9493 = vmatpush3.bf16.msra.mxu1 %v10448_v10  ;;  %vm12658_vm7 = vnez %v12619_v54  ;;  %v12659_v40 = vld [vmem:[#allocation5_spill] sm:$0xff] }
 0x265   : > { %9494 = vmatprep.subr.bf16.mxu1 %v10449_v1  ;;  %vm12660_vm4 = vnez %v12659_v40  ;;  %v3807_v10 = vld [vmem:[#allocation2 + $0x77] sm:$0xff]  ;;  %v4600_v40 = vld [vmem:[#allocation2 + $0x121] sm:$0xff] }
 0x266   : > { %v4595_v31 = vld [vmem:[#allocation2 + $0xf9] sm:$0xff] }
 0x267   : > { %v4599_v54 = vld [vmem:[#allocation2 + $0x119] sm:$0xff] }
 0x268   : > { %9495 = vmatpush3.bf16.msra.mxu1 %v10449_v1 }
 0x269   : > { %9496 = vmatprep.subr.bf16.mxu1 %v10450_v63 }
 0x26b   : > { %9465 = vmatmul.mubr.msk.bf16.gmra.mrb[12].mxu1 %vm12656_vm14, %v11268_v26  ;;  %vm12661_vm14 = vnez %v12624_v45  ;;  %v12662_v26 = vld [vmem:[#allocation8_spill] sm:$0xff]  ;;  %v11724_v45 = vld [vmem:[%s12488_s4] ss:$0 sm:$0xff] }
 0x26c   : > { %9468 = vmatprep.mubr.msk.bf16.mxu1 %vm12657_vm3, %v11288_v8  ;;  %9497 = vmatpush3.bf16.msra.mxu1 %v10450_v63  ;;  %v8016_v63 = vpack.c.bf16 %v3810_v58, %v3809_v61  ;;  %v3823_v61 = vld [vmem:[#allocation2 + $0xf7] sm:$0xff] }
 0x26d   : > { %9498 = vmatprep.subr.bf16.mxu1 %v10451_v21 }
 0x270   : > { %9499 = vmatpush3.bf16.msra.mxu1 %v10451_v21  ;;  %v3812_v21 = vld [vmem:[#allocation2 + $0x9f] sm:$0xff] }
 0x271   : > { %9532 = vmatprep.subr.bf16.mxu1 %v10452_v59 }
 0x273   : > { %9469 = vmatmul.mubr.msk.bf16.gmra.mrb[16].mxu1 %vm12658_vm7, %v11296_v16  ;;  %v3425_v16 = vld [vmem:[#allocation2 + $0x109] sm:$0xff] }
 0x274   : > { %9472 = vmatprep.mubr.msk.bf16.mxu1 %vm12660_vm4, %v11311_v44  ;;  %v11579_v49 = vpack.c.bf16 %v3426_v22, %v3425_v16  ;;  %v10453_v44 = vld [vmem:[%s12487_s3 + $0x1c8] sm:$0xff]  }
 0x27b   : > { %9473 = vmatmul.mubr.msk.bf16.gmra.mrb[20].mxu1 %vm12661_vm14, %v11318_v9  ;;  %v10454_v9 = vld [vmem:[%s12487_s3 + $0x1d0] sm:$0xff]  }
 0x27c   : > { %9476 = vmatprep.mubr.msk.bf16.mxu1 %vm11314_vm15, %v12662_v26  ;;  %v3814_v26 = vld [vmem:[#allocation2 + $0xaf] sm:$0xff] }
 0x283   : > { %9477 = vmatmul.mubr.msk.bf16.gmra.mrb[24].mxu1 %vm11328_vm12, %v12664_v46  ;;  %v3811_v46 = vld [vmem:[#allocation2 + $0x97] sm:$0xff] }
 0x284   : > { %9480 = vmatprep.mubr.msk.bf16.mxu1 %vm11335_vm0, %v11352_v17  ;;  %v3806_v17 = vld [vmem:[#allocation2 + $0x6f] sm:$0xff]  ;;  %v8019_v16 = vpack.c.bf16 %v3812_v21, %v3811_v46 }
 0x285   : > { %v4569_v46 = vld [vmem:[#allocation2 + $0x29] sm:$0xff] }
 0x28b   : > { %9481 = vmatmul.mubr.msk.bf16.gmra.mrb[28].mxu1 %vm11348_vm8, %v11579_v49 }
 0x28c   : > { %9500 = vmatprep.mubr.msk.bf16.mxu1 %vm10801_vm2, %v11359_v37  ;;  %v3805_v37 = vld [vmem:[#allocation2 + $0x67] sm:$0xff]  ;;  %vm12667_vm2 = vnez %v12575_v30 }
 0x28d   : > { %v10460_v30 = vld [vmem:[%s12487_s3 + $0x200] sm:$0xff]  }
 0x293   : > { %9501 = vmatmul.mubr.msk.bf16.vlgmr.msra.gmra.mrb[0].mxu1 %vm10857_vm5, %v11364_v3  ;;  %v8010_v3 = vpack.c.bf16 %v3806_v17, %v3805_v37  ;;  %vm12668_vm5 = vnez %v12579_v55  ;;  %v3815_v37 = vld [vmem:[#allocation2 + $0xb7] sm:$0xff]  ;;  %v3820_v55 = vld [vmem:[#allocation2 + $0xdf] sm:$0xff] }
 0x294   : > { %9533 = vmatpush3.bf16.msra.mxu1 %v10452_v59  ;;  %9504 = vmatprep.mubr.msk.bf16.mxu1 %vm10866_vm6, %v11376_v38  ;;  %v3808_v38 = vld [vmem:[#allocation2 + $0x7f] sm:$0xff]  ;;  %v3813_v59 = vld [vmem:[#allocation2 + $0xa7] sm:$0xff]  ;;  %vm12669_vm6 = vnez %v12581_v5 }
 0x295   : > { %9534 = vmatprep.subr.bf16.mxu1 %v10453_v44  ;;  %v8013_v1 = vpack.c.bf16 %v3808_v38, %v3807_v10  ;;  %v8022_v22 = vpack.c.bf16 %v3814_v26, %v3813_v59  ;;  %v3821_v5 = vld [vmem:[#allocation2 + $0xe7] sm:$0xff]  ;;  %v3824_v38 = vld [vmem:[#allocation2 + $0xff] sm:$0xff]  ;;  %v8043_v10 = vpack.c.bf16 %v3828_v47, %v3827_v36  ;;  %v4570_v26 = vld [vmem:[#allocation2 + $0x31] sm:$0xff] }
 0x296   : > { %v8037_v58 = vpack.c.bf16 %v3824_v38, %v3823_v61  ;;  %v4584_v38 = vld [vmem:[#allocation2 + $0xa1] sm:$0xff]  ;;  %v4586_v61 = vld [vmem:[#allocation2 + $0xb1] sm:$0xff] }
 0x297   : > { %v4588_v47 = vld [vmem:[#allocation2 + $0xc1] sm:$0xff] }
 0x298   : > { %9535 = vmatpush3.bf16.msra.mxu1 %v10453_v44  ;;  %v3816_v44 = vld [vmem:[#allocation2 + $0xbf] sm:$0xff] }
 0x299   : > { %9536 = vmatprep.subr.bf16.mxu1 %v10454_v9  ;;  %v8025_v17 = vpack.c.bf16 %v3816_v44, %v3815_v37  ;;  %v4576_v37 = vld [vmem:[#allocation2 + $0x61] sm:$0xff] }
 0x29b   : > { %9505 = vmatmul.mubr.msk.bf16.gmra.mrb[4].mxu1 %vm10894_vm9, %v8007_v24  ;;  %v3822_v24 = vld [vmem:[#allocation2 + $0xef] sm:$0xff]  ;;  %vm12670_vm9 = vnez %v12591_v13 }
 0x29c   : > { %9508 = vmatprep.mubr.msk.bf16.mxu1 %vm10903_vm10, %v8010_v3  ;;  %9537 = vmatpush3.bf16.msra.mxu1 %v10454_v9  ;;  %v3817_v9 = vld [vmem:[#allocation2 + $0xc7] sm:$0xff]  ;;  %vm12671_vm10 = vnez %v12593_v27  ;;  %v10462_v27 = vld [vmem:[%s12487_s3 + $0x210] sm:$0xff]  }
 0x29d   : > { %9538 = vmatprep.subr.bf16.mxu1 %v10455_v19  ;;  %v8028_v35 = vpack.c.bf16 %v3818_v41, %v3817_v9  ;;  %v10461_v13 = vld [vmem:[%s12487_s3 + $0x208] sm:$0xff]   ;;  %v4575_v41 = vld [vmem:[#allocation2 + $0x59] sm:$0xff] }
 0x2a0   : > { %9539 = vmatpush3.bf16.msra.mxu1 %v10455_v19  ;;  %v3819_v19 = vld [vmem:[#allocation2 + $0xd7] sm:$0xff] }
 0x2a1   : > { %9540 = vmatprep.subr.bf16.mxu1 %v10456_v28  ;;  %v8031_v3 = vpack.c.bf16 %v3820_v55, %v3819_v19  ;;  %v4577_v55 = vld [vmem:[#allocation2 + $0x69] sm:$0xff]  ;;  %v4582_v19 = vld [vmem:[#allocation2 + $0x91] sm:$0xff] }
 0x2a3   : > { %9509 = vmatmul.mubr.msk.bf16.gmra.mrb[8].mxu1 %vm10930_vm13, %v8013_v1  ;;  %vm12672_vm13 = vnez %v12595_v62  ;;  %v10463_v62 = vld [vmem:[%s12487_s3 + $0x218] sm:$0xff]  }
 0x2a4   : > { %9512 = vmatprep.mubr.msk.bf16.mxu1 %vm12667_vm2, %v8016_v63  ;;  %9541 = vmatpush3.bf16.msra.mxu1 %v10456_v28  ;;  %v8034_v28 = vpack.c.bf16 %v3822_v24, %v3821_v5  ;;  %v10467_v1 = vld [vmem:[%s12487_s3 + $0x238] sm:$0xff]   ;;  %v11674_v63 = vld [vmem:[#allocation2] sm:$0xff]  ;;  %vm12679_vm2 = vnez %v12601_v0 }
 0x2a5   : > { %9542 = vmatprep.subr.bf16.mxu1 %v10457_v51  ;;  %v4278_v59 = vpack.c.bf16 %v11674_v63, %v11674_v63  ;;  %v4579_v0 = vld [vmem:[#allocation2 + $0x79] sm:$0xff]  ;;  %v4580_v24 = vld [vmem:[#allocation2 + $0x81] sm:$0xff] }
 0x2a8   : > { %9543 = vmatpush3.bf16.msra.mxu1 %v10457_v51  ;;  %v12678_v51 = vld [vmem:[#allocation15_spill] sm:$0xff] }
 0x2a9   : > { %9544 = vmatprep.subr.bf16.mxu1 %v10458_v60 }
 0x2ab   : > { %9513 = vmatmul.mubr.msk.bf16.gmra.mrb[12].mxu1 %vm12668_vm5, %v8019_v16  ;;  %v8094_v16 = vpack.c.bf16 %v4570_v26, %v4569_v46  ;;  %vm12680_vm5 = vnez %v12603_v56  ;;  %v8109_v56 = vpack.c.bf16 %v4580_v24, %v4579_v0 }
 0x2ac   : > { %9516 = vmatprep.mubr.msk.bf16.mxu1 %vm12669_vm6, %v8022_v22  ;;  %9545 = vmatpush3.bf16.msra.mxu1 %v10458_v60  ;;  %v4226_v60 = vld [vmem:[#allocation2 + $0x100] sm:$0xff]  ;;  %vm12681_vm6 = vnez %v12605_v2 }
 0x2ad   : > { %9546 = vmatprep.subr.bf16.mxu1 %v10459_v18  ;;  %v11682_v21 = vpack.c.bf16 %v4226_v60, %v11500_v23  ;;  %v4572_v22 = vld [vmem:[#allocation2 + $0x41] sm:$0xff]  ;;  %v4573_v23 = vld [vmem:[#allocation2 + $0x49] sm:$0xff]  ;;  %v4583_v2 = vld [vmem:[#allocation2 + $0x99] sm:$0xff] }
 0x2b0   : > { %9547 = vmatpush3.bf16.msra.mxu1 %v10459_v18  ;;  %v4571_v18 = vld [vmem:[#allocation2 + $0x39] sm:$0xff] }
 0x2b1   : > { %9580 = vmatprep.subr.bf16.mxu1 %v10460_v30  ;;  %v8097_v44 = vpack.c.bf16 %v4572_v22, %v4571_v18 }
 0x2b3   : > { %9517 = vmatmul.mubr.msk.bf16.gmra.mrb[16].mxu1 %vm11017_vm11, %v8025_v17  ;;  %vm12673_vm11 = vnez %v12597_v11  ;;  %v12675_v11 = vld [vmem:[#allocation12_spill] sm:$0xff] }
 0x2b4   : > { %9520 = vmatprep.mubr.msk.bf16.mxu1 %vm12638_vm1, %v8028_v35  ;;  %vm12674_vm1 = vnez %v12599_v20  ;;  %v10464_v20 = vld [vmem:[%s12487_s3 + $0x220] sm:$0xff]   ;;  %v4578_v17 = vld [vmem:[#allocation2 + $0x71] sm:$0xff]  ;;  %v8103_v35 = vpack.c.bf16 %v4576_v37, %v4575_v41 }
 0x2b5   : > { %v8106_v5 = vpack.c.bf16 %v4578_v17, %v4577_v55  ;;  %v12687_v55 = vld [vmem:[#allocation11_spill] sm:$0xff] }
 0x2bb   : > { %9521 = vmatmul.mubr.msk.bf16.gmra.mrb[20].mxu1 %vm12670_vm9, %v8031_v3  ;;  %vm12682_vm9 = vnez %v12607_v42  ;;  %v4581_v3 = vld [vmem:[#allocation2 + $0x89] sm:$0xff]  ;;  %v8115_v42 = vpack.c.bf16 %v4584_v38, %v4583_v2 }
 0x2bc   : > { %9524 = vmatprep.mubr.msk.bf16.mxu1 %vm12671_vm10, %v8034_v28  ;;  %vm12683_vm10 = vnez %v12609_v25  ;;  %v8112_v28 = vpack.c.bf16 %v4582_v19, %v4581_v3  ;;  %v4587_v25 = vld [vmem:[#allocation2 + $0xb9] sm:$0xff] }
 0x2bd   : > { %v5487_v3 = vld [vmem:[#allocation2 + $0x40] sm:$0xff] }
 0x2c3   : > { %9525 = vmatmul.mubr.msk.bf16.gmra.mrb[24].mxu1 %vm12672_vm13, %v8037_v58  ;;  %vm12684_vm13 = vnez %v12611_v50  ;;  %v4585_v58 = vld [vmem:[#allocation2 + $0xa9] sm:$0xff]  ;;  %v8121_v50 = vpack.c.bf16 %v4588_v47, %v4587_v25 }
 0x2c4   : > { %9528 = vmatprep.mubr.msk.bf16.mxu1 %vm12673_vm11, %v11432_v48  ;;  %v10465_v48 = vld [vmem:[%s12487_s3 + $0x228] sm:$0xff]   ;;  %vm12685_vm11 = vnez %v12613_v52  ;;  %v8118_v36 = vpack.c.bf16 %v4586_v61, %v4585_v58  ;;  %v4591_v52 = vld [vmem:[#allocation2 + $0xd9] sm:$0xff] }
 0x2cb   : > { %9529 = vmatmul.mubr.msk.bf16.gmra.mrb[28].mxu1 %vm12674_vm1, %v8043_v10  ;;  %vm12686_vm1 = vnez %v12615_v39  ;;  %v4590_v10 = vld [vmem:[#allocation2 + $0xd1] sm:$0xff] }
 0x2cc   : > { %9548 = vmatprep.mubr.bf16.mxu1 %v11440_v43 }
 0x2d3   : > { %9549 = vmatmul.mubr.bf16.vlgmr.msra.gmra.mrb[0].mxu1 %v11445_v14  ;;  %v12676_v14 = vld [vmem:[#allocation13_spill] sm:$0xff] }
 0x2d4   : > { %9581 = vmatpush3.bf16.msra.mxu1 %v10460_v30  ;;  %9552 = vmatprep.mubr.bf16.mxu1 %v11452_v53  ;;  %v12677_v53 = vld [vmem:[#allocation14_spill] sm:$0xff]  ;;  %v4574_v30 = vld [vmem:[#allocation2 + $0x51] sm:$0xff] }
 0x2d5   : > { %9582 = vmatprep.subr.bf16.mxu1 %v10461_v13  ;;  %v8100_v9 = vpack.c.bf16 %v4574_v30, %v4573_v23 }
 0x2d8   : > { %9583 = vmatpush3.bf16.msra.mxu1 %v10461_v13  ;;  %v4589_v13 = vld [vmem:[#allocation2 + $0xc9] sm:$0xff] }
 0x2d9   : > { %9584 = vmatprep.subr.bf16.mxu1 %v10462_v27 }
 0x2db   : > { %9553 = vmatmul.mubr.bf16.gmra.mrb[4].mxu1 %v11457_v32  ;;  %v10466_v32 = vld [vmem:[%s12487_s3 + $0x230] sm:$0xff]  }
 0x2dc   : > { %9556 = vmatprep.mubr.bf16.mxu1 %v12675_v11  ;;  %9585 = vmatpush3.bf16.msra.mxu1 %v10462_v27  ;;  %v8124_v27 = vpack.c.bf16 %v4590_v10, %v4589_v13  ;;  %v4594_v11 = vld [vmem:[#allocation2 + $0xf1] sm:$0xff] }
 0x2dd   : > { %9586 = vmatprep.subr.bf16.mxu1 %v10463_v62  ;;  %v5489_v10 = vld [vmem:[#allocation2 + $0x50] sm:$0xff] }
 0x2e0   : > { %9587 = vmatpush3.bf16.msra.mxu1 %v10463_v62  ;;  %v4592_v62 = vld [vmem:[#allocation2 + $0xe1] sm:$0xff] }
 0x2e1   : > { %9588 = vmatprep.subr.bf16.mxu1 %v10464_v20  ;;  %v8127_v39 = vpack.c.bf16 %v4592_v62, %v4591_v52 }
 0x2e3   : > { %9557 = vmatmul.mubr.bf16.gmra.mrb[8].mxu1 %v12676_v14  ;;  %v4596_v14 = vld [vmem:[#allocation2 + $0x101] sm:$0xff] }
 0x2e4   : > { %9560 = vmatprep.mubr.bf16.mxu1 %v12677_v53  ;;  %9589 = vmatpush3.bf16.msra.mxu1 %v10464_v20  ;;  %v4593_v20 = vld [vmem:[#allocation2 + $0xe9] sm:$0xff]  ;;  %v8133_v53 = vpack.c.bf16 %v4596_v14, %v4595_v31 }
 0x2e5   : > { %9590 = vmatprep.subr.bf16.mxu1 %v10465_v48 }
 0x2e8   : > { %9591 = vmatpush3.bf16.msra.mxu1 %v10465_v48  ;;  %v8130_v48 = vpack.c.bf16 %v4594_v11, %v4593_v20 }
 0x2e9   : > { %9592 = vmatprep.subr.bf16.mxu1 %v10466_v32 }
 0x2eb   : > { %9561 = vmatmul.mubr.bf16.gmra.mrb[12].mxu1 %v12678_v51 }
 0x2ec   : > { %9564 = vmatprep.mubr.bf16.mxu1 %v11488_v4  ;;  %9593 = vmatpush3.bf16.msra.mxu1 %v10466_v32  ;;  %v8139_v32 = vpack.c.bf16 %v4600_v40, %v4599_v54 }
 0x2ed   : > { %9594 = vmatprep.subr.bf16.mxu1 %v10467_v1 }
 0x2f0   : > { %9595 = vmatpush3.bf16.msra.mxu1 %v10467_v1 }
 0x2f1   : > { %9996 = vmatprep.subr.bf16.mxu1 %v11674_v63 }
 0x2f3   : > { %9565 = vmatmul.mubr.bf16.gmra.mrb[16].mxu1 %v11490_v29 }
 0x2f4   : > { %9568 = vmatprep.mubr.bf16.mxu1 %v11494_v6 }
 0x2fb   : > { %9569 = vmatmul.mubr.bf16.gmra.mrb[20].mxu1 %v11496_v12 }
 0x2fc   : > { %9572 = vmatprep.mubr.bf16.mxu1 %v11502_v57 }
 0x303   : > { %9573 = vmatmul.mubr.bf16.gmra.mrb[24].mxu1 %v11682_v21 }
 0x304   : > { %9576 = vmatprep.mubr.bf16.mxu1 %v11507_v7 }
 0x30b   : > { %9577 = vmatmul.mubr.bf16.gmra.mrb[28].mxu1 %v4278_v59 }
 0x30c   : > { %9596 = vmatprep.mubr.msk.bf16.mxu1 %vm12679_vm2, %v8094_v16 }
 0x313   : > { %9597 = vmatmul.mubr.msk.bf16.vlgmr.msra.gmra.mrb[0].mxu1 %vm12680_vm5, %v8097_v44 }
 0x314   : > { %9600 = vmatprep.mubr.msk.bf16.mxu1 %vm12681_vm6, %v8100_v9 }
 0x31b   : > { %9601 = vmatmul.mubr.msk.bf16.gmra.mrb[4].mxu1 %vm12682_vm9, %v8103_v35 }
 0x31c   : > { %9604 = vmatprep.mubr.msk.bf16.mxu1 %vm12683_vm10, %v8106_v5 }
 0x323   : > { %9605 = vmatmul.mubr.msk.bf16.gmra.mrb[8].mxu1 %vm12684_vm13, %v8109_v56 }
 0x324   : > { %9608 = vmatprep.mubr.msk.bf16.mxu1 %vm12685_vm11, %v8112_v28 }
 0x32b   : > { %9609 = vmatmul.mubr.msk.bf16.gmra.mrb[12].mxu1 %vm12686_vm1, %v8115_v42  ;;  %v5486_v42 = vld [vmem:[#allocation2 + $0x38] sm:$0xff] }
 0x32c   : > { %9612 = vmatprep.mubr.msk.bf16.mxu1 %vm12657_vm3, %v8118_v36  ;;  %v5516_v25 = vpack.c.bf16 %v5487_v3, %v5486_v42 }
 0x333   : > { %9613 = vmatmul.mubr.msk.bf16.gmra.mrb[16].mxu1 %vm12658_vm7, %v8121_v50 }
 0x334   : > { %9616 = vmatprep.mubr.msk.bf16.mxu1 %vm12660_vm4, %v8124_v27 }
 0x33b   : > { %9617 = vmatmul.mubr.msk.bf16.gmra.mrb[20].mxu1 %vm12661_vm14, %v8127_v39  ;;  %v5491_v39 = vld [vmem:[#allocation2 + $0x60] sm:$0xff]  ;;  %vm10628_vm14 = vmmov 0  }
 0x33c   : > { %9620 = vmatprep.mubr.msk.bf16.mxu1 %vm11314_vm15, %v8130_v48 }
 0x343   : > { %9621 = vmatmul.mubr.msk.bf16.gmra.mrb[24].mxu1 %vm11328_vm12, %v8133_v53  ;;  %v5490_v53 = vld [vmem:[#allocation2 + $0x58] sm:$0xff] }
 0x344   : > { %9624 = vmatprep.mubr.msk.bf16.mxu1 %vm11335_vm0, %v11579_v49 }
 0x34b   : > { %9625 = vmatmul.mubr.msk.bf16.gmra.mrb[28].mxu1 %vm11348_vm8, %v8139_v32 }
 0x34c   : > { %10012 = vmatprep.mubr.msk.bf16.mxu1 %vm10628_vm14, %v11674_v63 }
 0x3e6   : > { %v9598_v8 = vpop.f32.mrb[0].mxu1 }
 0x3e7   : > { %v5012_v1 = vadd.f32 %v9598_v8, %v11724_v45  ;;  %v4780_v34 = vpop.f32.mrb[1].mxu1 }
 0x3e8   : > { %v5010_v51 = vadd.f32 %v11724_v45, %v4780_v34  ;;  %v9599_v60 = vpop.f32.mrb[2].mxu1 }
 0x3e9   : > { %v5013_v15 = vadd.f32 %v9599_v60, %v11724_v45  ;;  %v4783_v49 = vpop.f32.mrb[3].mxu1  ;;  %v5044_v26 = vmax.f32 %v5012_v1, 0.0  ;;  %v5493_v1 = vld [vmem:[#allocation2 + $0x70] sm:$0xff] }
 0x3ea   : > { %v5011_v59 = vadd.f32 %v11724_v45, %v4783_v49  ;;  %v5042_v46 = vmax.f32 %v5010_v51, 0.0 }
 0x3eb   : > { %v5045_v33 = vmax.f32 %v5013_v15, 0.0 }
 0x3ec   : > { %v5043_v16 = vmax.f32 %v5011_v59, 0.0 }
 0x3ed   : > { %v5075_v18 = vpack.c.bf16 %v5045_v33, %v5044_v26  ;;  %v5495_v33 = vld [vmem:[#allocation2 + $0x80] sm:$0xff] }
 0x3ee   : > { %v5074_v22 = vpack.c.bf16 %v5043_v16, %v5042_v46  ;;  %v9602_v30 = vpop.f32.mrb[4].mxu1 }
 0x3ef   : > { %v5016_v44 = vadd.f32 %v9602_v30, %v11724_v45  ;;  %v4796_v23 = vpop.f32.mrb[5].mxu1  ;;  %v5494_v30 = vld [vmem:[#allocation2 + $0x78] sm:$0xff] }
 0x3f0   : > { %v5014_v9 = vadd.f32 %v11724_v45, %v4796_v23  ;;  %v9603_v41 = vpop.f32.mrb[6].mxu1  ;;  %9644 = vmatprep.mubr.bf16.mxu0 %v5074_v22 }
 0x3f1   : > { %v5017_v37 = vadd.f32 %v9603_v41, %v11724_v45  ;;  %v4799_v17 = vpop.f32.mrb[7].mxu1  ;;  %9645 = vmatmul.mubr.bf16.vlgmr.msra.gmra.mrb[32].mxu0 %v5075_v18  ;;  %v5048_v5 = vmax.f32 %v5016_v44, 0.0 }
 0x3f2   : > { %v5015_v35 = vadd.f32 %v11724_v45, %v4799_v17  ;;  %8965 = vmatpush3.bf16.msra.mxu0 %v12687_v55  ;;  %v5046_v24 = vmax.f32 %v5014_v9, 0.0 }
 0x3f3   : > { %v5049_v0 = vmax.f32 %v5017_v37, 0.0  ;;  %8966 = vmatprep.subr.bf16.mxu0 %v11488_v4  ;;  %v5497_v37 = vld [vmem:[#allocation2 + $0x90] sm:$0xff] }
 0x3f4   : > { %v5047_v19 = vmax.f32 %v5015_v35, 0.0 }
 0x3f5   : > { %v5077_v56 = vpack.c.bf16 %v5049_v0, %v5048_v5 }
 0x3f6   : > { %v5076_v28 = vpack.c.bf16 %v5047_v19, %v5046_v24  ;;  %8967 = vmatpush3.bf16.msra.mxu0 %v11440_v43  ;;  %v9606_v2 = vpop.f32.mrb[8].mxu1 }
 0x3f7   : > { %v5020_v38 = vadd.f32 %v9606_v2, %v11724_v45  ;;  %8968 = vmatprep.subr.bf16.mxu0 %v11490_v29  ;;  %v4812_v61 = vpop.f32.mrb[9].mxu1  ;;  %v5488_v29 = vld [vmem:[#allocation2 + $0x48] sm:$0xff] }
 0x3f8   : > { %v5018_v58 = vadd.f32 %v11724_v45, %v4812_v61  ;;  %v9607_v36 = vpop.f32.mrb[10].mxu1  ;;  %9648 = vmatprep.mubr.bf16.mxu0 %v5076_v28  ;;  %v5517_v62 = vpack.c.bf16 %v5489_v10, %v5488_v29 }
 0x3f9   : > { %v5021_v4 = vadd.f32 %v9607_v36, %v11724_v45  ;;  %v4815_v47 = vpop.f32.mrb[11].mxu1  ;;  %9649 = vmatmul.mubr.bf16.gmra.mrb[36].mxu0 %v5077_v56  ;;  %v5052_v43 = vmax.f32 %v5020_v38, 0.0 }
 0x3fa   : > { %v5019_v50 = vadd.f32 %v11724_v45, %v4815_v47  ;;  %8969 = vmatpush3.bf16.msra.mxu0 %v5516_v25  ;;  %v5050_v27 = vmax.f32 %v5018_v58, 0.0 }
 0x3fb   : > { %v5053_v13 = vmax.f32 %v5021_v4, 0.0  ;;  %8970 = vmatprep.subr.bf16.mxu0 %v11494_v6  ;;  %v5518_v6 = vpack.c.bf16 %v5491_v39, %v5490_v53 }
 0x3fc   : > { %v5051_v52 = vmax.f32 %v5019_v50, 0.0 }
 0x3fd   : > { %v5079_v11 = vpack.c.bf16 %v5053_v13, %v5052_v43 }
 0x3fe   : > { %v5078_v20 = vpack.c.bf16 %v5051_v52, %v5050_v27  ;;  %8971 = vmatpush3.bf16.msra.mxu0 %v5517_v62  ;;  %v9610_v48 = vpop.f32.mrb[12].mxu1 }
 0x3ff   : > { %v5024_v31 = vadd.f32 %v9610_v48, %v11724_v45  ;;  %8972 = vmatprep.subr.bf16.mxu0 %v11496_v12  ;;  %v4828_v14 = vpop.f32.mrb[13].mxu1  ;;  %v5492_v12 = vld [vmem:[#allocation2 + $0x68] sm:$0xff] }
 0x400   : > { %v5022_v54 = vadd.f32 %v11724_v45, %v4828_v14  ;;  %v9611_v40 = vpop.f32.mrb[14].mxu1  ;;  %9652 = vmatprep.mubr.bf16.mxu0 %v5078_v20  ;;  %v5519_v59 = vpack.c.bf16 %v5493_v1, %v5492_v12 }
 0x401   : > { %v5025_v32 = vadd.f32 %v9611_v40, %v11724_v45  ;;  %v4831_v8 = vpop.f32.mrb[15].mxu1  ;;  %9653 = vmatmul.mubr.bf16.gmra.mrb[40].mxu0 %v5079_v11  ;;  %v5056_v51 = vmax.f32 %v5024_v31, 0.0 }
 0x402   : > { %v5023_v34 = vadd.f32 %v11724_v45, %v4831_v8  ;;  %8973 = vmatpush3.bf16.msra.mxu0 %v5518_v6  ;;  %v5054_v15 = vmax.f32 %v5022_v54, 0.0 }
 0x403   : > { %v5057_v60 = vmax.f32 %v5025_v32, 0.0  ;;  %8974 = vmatprep.subr.bf16.mxu0 %v11502_v57  ;;  %v5520_v57 = vpack.c.bf16 %v5495_v33, %v5494_v30  ;;  %v10474_v30 = vld [vmem:[%s12492_s8 + $0x18] sm:$0xff]  }
 0x404   : > { %v5055_v49 = vmax.f32 %v5023_v34, 0.0 }
 0x405   : > { %v5081_v26 = vpack.c.bf16 %v5057_v60, %v5056_v51 }
 0x406   : > { %v5080_v46 = vpack.c.bf16 %v5055_v49, %v5054_v15  ;;  %8975 = vmatpush3.bf16.msra.mxu0 %v5519_v59  ;;  %v9614_v16 = vpop.f32.mrb[16].mxu1 }
 0x407   : > { %v5028_v18 = vadd.f32 %v9614_v16, %v11724_v45  ;;  %8976 = vmatprep.subr.bf16.mxu0 %v11682_v21  ;;  %v4844_v22 = vpop.f32.mrb[17].mxu1  ;;  %v5496_v21 = vld [vmem:[#allocation2 + $0x88] sm:$0xff] }
 0x408   : > { %v5026_v44 = vadd.f32 %v11724_v45, %v4844_v22  ;;  %v9615_v23 = vpop.f32.mrb[18].mxu1  ;;  %9656 = vmatprep.mubr.bf16.mxu0 %v5080_v46  ;;  %v5521_v24 = vpack.c.bf16 %v5497_v37, %v5496_v21  ;;  %v10470_v46 = vld [vmem:[%s12491_s7 + $0x4] ss:$8 sps:$4 sm:$0xff]   ;;  %v10468_v16 = vld [vmem:[%s12491_s7] ss:$8 sps:$4 sm:$0xff]   ;;  %v10473_v22 = vld [vmem:[%s12492_s8 + $0x10] sm:$0xff]  }
 0x409   : > { %v5029_v9 = vadd.f32 %v9615_v23, %v11724_v45  ;;  %v4847_v41 = vpop.f32.mrb[19].mxu1  ;;  %9657 = vmatmul.mubr.bf16.gmra.mrb[44].mxu0 %v5081_v26  ;;  %v5060_v35 = vmax.f32 %v5028_v18, 0.0  ;;  %v10472_v18 = vld [vmem:[%s12492_s8 + $0x8] sm:$0xff]   ;;  %v11813_v37 = vld [vmem:[%s12490_s6] ss:$0 sm:$0xff] }
 0x40a   : > { %v5027_v17 = vadd.f32 %v11724_v45, %v4847_v41  ;;  %8977 = vmatpush3.bf16.msra.mxu0 %v5520_v57  ;;  %v5058_v5 = vmax.f32 %v5026_v44, 0.0  ;;  %v10475_v44 = vld [vmem:[%s12492_s8 + $0x20] sm:$0xff]   ;;  %v10476_v23 = vld [vmem:[%s12492_s8 + $0x28] sm:$0xff]   ;;  %v10477_v57 = vld [vmem:[%s12492_s8 + $0x30] sm:$0xff]  }
 0x40b   : > { %v5061_v55 = vmax.f32 %v5029_v9, 0.0  ;;  %8978 = vmatprep.subr.bf16.mxu0 %v11507_v7  ;;  %v10478_v9 = vld [vmem:[%s12492_s8 + $0x38] sm:$0xff]  }
 0x40c   : > { %v5059_v0 = vmax.f32 %v5027_v17, 0.0 }
 0x40d   : > { %v5083_v19 = vpack.c.bf16 %v5061_v55, %v5060_v35 }
 0x40e   : > { %v5082_v56 = vpack.c.bf16 %v5059_v0, %v5058_v5  ;;  %8979 = vmatpush3.bf16.msra.mxu0 %v5521_v24  ;;  %v9618_v3 = vpop.f32.mrb[20].mxu1 }
 0x40f   : > { %v5032_v28 = vadd.f32 %v9618_v3, %v11724_v45  ;;  %v4860_v2 = vpop.f32.mrb[21].mxu1  ;;  %9676 = vmatprep.subr.bf16.mxu0 %v11674_v63 }
 0x410   : > { %v5030_v38 = vadd.f32 %v11724_v45, %v4860_v2  ;;  %v9619_v61 = vpop.f32.mrb[22].mxu1  ;;  %9660 = vmatprep.mubr.bf16.mxu0 %v5082_v56 }
 0x411   : > { %v5033_v42 = vadd.f32 %v9619_v61, %v11724_v45  ;;  %v4863_v7 = vpop.f32.mrb[23].mxu1  ;;  %9661 = vmatmul.mubr.bf16.gmra.mrb[48].mxu0 %v5083_v19  ;;  %v5064_v36 = vmax.f32 %v5032_v28, 0.0 }
 0x412   : > { %v5031_v58 = vadd.f32 %v11724_v45, %v4863_v7  ;;  %v5062_v4 = vmax.f32 %v5030_v38, 0.0 }
 0x413   : > { %v5065_v25 = vmax.f32 %v5033_v42, 0.0 }
 0x414   : > { %v5063_v47 = vmax.f32 %v5031_v58, 0.0 }
 0x415   : > { %v5085_v10 = vpack.c.bf16 %v5065_v25, %v5064_v36 }
 0x416   : > { %v5084_v50 = vpack.c.bf16 %v5063_v47, %v5062_v4  ;;  %v9622_v43 = vpop.f32.mrb[24].mxu1 }
 0x417   : > { %v5036_v13 = vadd.f32 %v9622_v43, %v11724_v45  ;;  %v4876_v29 = vpop.f32.mrb[25].mxu1 }
 0x418   : > { %v5034_v27 = vadd.f32 %v11724_v45, %v4876_v29  ;;  %v9623_v52 = vpop.f32.mrb[26].mxu1  ;;  %9664 = vmatprep.mubr.bf16.mxu0 %v5084_v50 }
 0x419   : > { %v5037_v62 = vadd.f32 %v9623_v52, %v11724_v45  ;;  %v4879_v11 = vpop.f32.mrb[27].mxu1  ;;  %9665 = vmatmul.mubr.bf16.gmra.mrb[52].mxu0 %v5085_v10  ;;  %v5068_v20 = vmax.f32 %v5036_v13, 0.0 }
 0x41a   : > { %v5035_v39 = vadd.f32 %v11724_v45, %v4879_v11  ;;  %v5066_v31 = vmax.f32 %v5034_v27, 0.0 }
 0x41b   : > { %v5069_v48 = vmax.f32 %v5037_v62, 0.0 }
 0x41c   : > { %v5067_v14 = vmax.f32 %v5035_v39, 0.0 }
 0x41d   : > { %v5087_v53 = vpack.c.bf16 %v5069_v48, %v5068_v20 }
 0x41e   : > { %v5086_v54 = vpack.c.bf16 %v5067_v14, %v5066_v31  ;;  %v9626_v40 = vpop.f32.mrb[28].mxu1 }
 0x41f   : > { %v5040_v6 = vadd.f32 %v9626_v40, %v11724_v45  ;;  %v4892_v32 = vpop.f32.mrb[29].mxu1 }
 0x420   : > { %v5038_v8 = vadd.f32 %v11724_v45, %v4892_v32  ;;  %v9627_v1 = vpop.f32.mrb[30].mxu1  ;;  %9668 = vmatprep.mubr.bf16.mxu0 %v5086_v54 }
 0x421   : > { %v5041_v34 = vadd.f32 %v9627_v1, %v11724_v45  ;;  %v4895_v51 = vpop.f32.mrb[31].mxu1  ;;  %9669 = vmatmul.mubr.bf16.gmra.mrb[56].mxu0 %v5087_v53  ;;  %v5072_v12 = vmax.f32 %v5040_v6, 0.0 }
 0x422   : > { %v5039_v60 = vadd.f32 %v11724_v45, %v4895_v51  ;;  %v5070_v49 = vmax.f32 %v5038_v8, 0.0  ;;  %v10471_v45 = vld [vmem:[%s12492_s8] sm:$0xff]  }
 0x423   : > { %v5073_v15 = vmax.f32 %v5041_v34, 0.0 }
 0x424   : > { %v5071_v59 = vmax.f32 %v5039_v60, 0.0 }
 0x425   : > { %v5089_v26 = vpack.c.bf16 %v5073_v15, %v5072_v12 }
 0x426   : > { %v5088_v33 = vpack.c.bf16 %v5071_v59, %v5070_v49 }
 0x428   : > { %9672 = vmatprep.mubr.bf16.mxu0 %v5088_v33 }
 0x429   : > { %9673 = vmatmul.mubr.bf16.gmra.mrb[60].mxu0 %v5089_v26 }
 0x42a   : > { %5574 = vmatprep.mubr.bf16.mxu0 %v10470_v46 }
 0x431   : > { %5575 = vmatmul.mubr.bf16.vlgmr.msra.gmra.mrb[64].mxu0 %v10468_v16 }
 0x432   : > { %9677 = vmatpush3.bf16.msra.mxu0 %v10471_v45  ;;  %9692 = vmatprep.mubr.msk.bf16.mxu0 %vm10628_vm14, %v11674_v63 }
 0x433   : > { %9678 = vmatprep.subr.bf16.mxu0 %v11674_v63 }
 0x436   : > { %9679 = vmatpush3.bf16.msra.mxu0 %v10472_v18 }
 0x437   : > { %9680 = vmatprep.subr.bf16.mxu0 %v11674_v63 }
 0x43a   : > { %9681 = vmatpush3.bf16.msra.mxu0 %v10473_v22 }
 0x43b   : > { %9682 = vmatprep.subr.bf16.mxu0 %v11674_v63 }
 0x43e   : > { %9683 = vmatpush3.bf16.msra.mxu0 %v10474_v30 }
 0x43f   : > { %9684 = vmatprep.subr.bf16.mxu0 %v11674_v63 }
 0x442   : > { %9685 = vmatpush3.bf16.msra.mxu0 %v10475_v44 }
 0x443   : > { %9686 = vmatprep.subr.bf16.mxu0 %v11674_v63 }
 0x446   : > { %9687 = vmatpush3.bf16.msra.mxu0 %v10476_v23 }
 0x447   : > { %9688 = vmatprep.subr.bf16.mxu0 %v11674_v63 }
 0x44a   : > { %9689 = vmatpush3.bf16.msra.mxu0 %v10477_v57 }
 0x44b   : > { %9690 = vmatprep.subr.bf16.mxu0 %v11674_v63 }
 0x44e   : > { %9691 = vmatpush3.bf16.msra.mxu0 %v10478_v9 }
 0x44f   : > { %9696 = vmatprep.subr.bf16.mxu0 %v11674_v63 }
 0x4c4   : > { %v9646_v41 = vpop.f32.mrb[32].mxu0 }
 0x4c5   : > { %v5195_v17 = vpop.f32.mrb[33].mxu0  ;;  %v5204_v55 = vadd.f32 %v9646_v41, %v11813_v37 }
 0x4c6   : > { %v9647_v35 = vpop.f32.mrb[34].mxu0  ;;  %v5196_v0 = vadd.f32 %v11813_v37, %v5195_v17 }
 0x4c7   : > { %v5207_v21 = vadd.f32 %v9647_v35, %v11813_v37  ;;  %v5198_v5 = vpop.f32.mrb[35].mxu0 }
 0x4c8   : > { %v5199_v24 = vadd.f32 %v11813_v37, %v5198_v5 }
 0x4c9   : > { %v8613_v19 = vpack.c.bf16 %v5207_v21, %v5204_v55 }
 0x4ca   : > { %v8608_v56 = vpack.c.bf16 %v5199_v24, %v5196_v0 }
 0x4cb   : > { %8685 = vst [vmem:[%s11823_s24 + $0x8] sm:$0xff] %v8613_v19  }
 0x4cc   : > { %8609 = vst [vmem:[%s11823_s24] sm:$0xff] %v8608_v56   ;;  %v9650_v3 = vpop.f32.mrb[36].mxu0 }
 0x4cd   : > { %v5211_v28 = vpop.f32.mrb[37].mxu0  ;;  %v5220_v38 = vadd.f32 %v9650_v3, %v11813_v37 }
 0x4ce   : > { %v9651_v2 = vpop.f32.mrb[38].mxu0  ;;  %v5212_v7 = vadd.f32 %v11813_v37, %v5211_v28 }
 0x4cf   : > { %v5223_v61 = vadd.f32 %v9651_v2, %v11813_v37  ;;  %v5214_v42 = vpop.f32.mrb[39].mxu0 }
 0x4d0   : > { %v5215_v58 = vadd.f32 %v11813_v37, %v5214_v42 }
 0x4d1   : > { %v8623_v36 = vpack.c.bf16 %v5223_v61, %v5220_v38 }
 0x4d2   : > { %v8618_v25 = vpack.c.bf16 %v5215_v58, %v5212_v7 }
 0x4d3   : > { %8687 = vst [vmem:[%s11823_s24 + $0x18] sm:$0xff] %v8623_v36  }
 0x4d4   : > { %8686 = vst [vmem:[%s11823_s24 + $0x10] sm:$0xff] %v8618_v25   ;;  %v9654_v4 = vpop.f32.mrb[40].mxu0 }
 0x4d5   : > { %v5227_v47 = vpop.f32.mrb[41].mxu0  ;;  %v5236_v50 = vadd.f32 %v9654_v4, %v11813_v37 }
 0x4d6   : > { %v9655_v10 = vpop.f32.mrb[42].mxu0  ;;  %v5228_v29 = vadd.f32 %v11813_v37, %v5227_v47 }
 0x4d7   : > { %v5239_v43 = vadd.f32 %v9655_v10, %v11813_v37  ;;  %v5230_v13 = vpop.f32.mrb[43].mxu0 }
 0x4d8   : > { %v5231_v27 = vadd.f32 %v11813_v37, %v5230_v13 }
 0x4d9   : > { %v8633_v52 = vpack.c.bf16 %v5239_v43, %v5236_v50  ;;  %v10479_v43 = vld [vmem:[%s12492_s8 + $0x40] sm:$0xff]  }
 0x4da   : > { %v8628_v62 = vpack.c.bf16 %v5231_v27, %v5228_v29  ;;  %v10481_v29 = vld [vmem:[%s12492_s8 + $0x50] sm:$0xff]   ;;  %v10482_v27 = vld [vmem:[%s12492_s8 + $0x58] sm:$0xff]  }
 0x4db   : > { %8689 = vst [vmem:[%s11823_s24 + $0x28] sm:$0xff] %v8633_v52   ;;  %v10483_v52 = vld [vmem:[%s12492_s8 + $0x60] sm:$0xff]  }
 0x4dc   : > { %8688 = vst [vmem:[%s11823_s24 + $0x20] sm:$0xff] %v8628_v62   ;;  %v9658_v11 = vpop.f32.mrb[44].mxu0  ;;  %v10484_v62 = vld [vmem:[%s12492_s8 + $0x68] sm:$0xff]  }
 0x4dd   : > { %v5243_v39 = vpop.f32.mrb[45].mxu0  ;;  %v5252_v48 = vadd.f32 %v9658_v11, %v11813_v37  ;;  %v10485_v11 = vld [vmem:[%s12492_s8 + $0x70] sm:$0xff]  }
 0x4de   : > { %v9659_v20 = vpop.f32.mrb[46].mxu0  ;;  %v5244_v53 = vadd.f32 %v11813_v37, %v5243_v39  ;;  %v10486_v39 = vld [vmem:[%s12492_s8 + $0x78] sm:$0xff]  }
 0x4df   : > { %v5255_v31 = vadd.f32 %v9659_v20, %v11813_v37  ;;  %v5246_v14 = vpop.f32.mrb[47].mxu0  ;;  %v10487_v20 = vld [vmem:[%s12492_s8 + $0x80] sm:$0xff]  }
 0x4e0   : > { %v5247_v54 = vadd.f32 %v11813_v37, %v5246_v14  ;;  %v10489_v14 = vld [vmem:[%s12492_s8 + $0x90] sm:$0xff]  }
 0x4e1   : > { %v8643_v40 = vpack.c.bf16 %v5255_v31, %v5252_v48  ;;  %v10488_v31 = vld [vmem:[%s12492_s8 + $0x88] sm:$0xff]  }
 0x4e2   : > { %v8638_v6 = vpack.c.bf16 %v5247_v54, %v5244_v53  ;;  %v10490_v53 = vld [vmem:[%s12492_s8 + $0x98] sm:$0xff]   ;;  %v10491_v54 = vld [vmem:[%s12492_s8 + $0xa0] sm:$0xff]  }
 0x4e3   : > { %8691 = vst [vmem:[%s11823_s24 + $0x38] sm:$0xff] %v8643_v40   ;;  %v10492_v40 = vld [vmem:[%s12492_s8 + $0xa8] sm:$0xff]  }
 0x4e4   : > { %8690 = vst [vmem:[%s11823_s24 + $0x30] sm:$0xff] %v8638_v6   ;;  %v9662_v32 = vpop.f32.mrb[48].mxu0  ;;  %v10493_v6 = vld [vmem:[%s12492_s8 + $0xb0] sm:$0xff]  }
 0x4e5   : > { %v5259_v8 = vpop.f32.mrb[49].mxu0  ;;  %v5268_v34 = vadd.f32 %v9662_v32, %v11813_v37  ;;  %v10494_v32 = vld [vmem:[%s12492_s8 + $0xb8] sm:$0xff]  }
 0x4e6   : > { %v9663_v1 = vpop.f32.mrb[50].mxu0  ;;  %v5260_v12 = vadd.f32 %v11813_v37, %v5259_v8  ;;  %v10495_v8 = vld [vmem:[%s12492_s8 + $0xc0] sm:$0xff]  }
 0x4e7   : > { %v5271_v51 = vadd.f32 %v9663_v1, %v11813_v37  ;;  %v5262_v60 = vpop.f32.mrb[51].mxu0 }
 0x4e8   : > { %v5263_v15 = vadd.f32 %v11813_v37, %v5262_v60  ;;  %v10498_v60 = vld [vmem:[%s12492_s8 + $0xd8] sm:$0xff]  }
 0x4e9   : > { %v8653_v49 = vpack.c.bf16 %v5271_v51, %v5268_v34  ;;  %v10496_v34 = vld [vmem:[%s12492_s8 + $0xc8] sm:$0xff]   ;;  %v10497_v51 = vld [vmem:[%s12492_s8 + $0xd0] sm:$0xff]  }
 0x4ea   : > { %v8648_v59 = vpack.c.bf16 %v5263_v15, %v5260_v12  ;;  %v10499_v12 = vld [vmem:[%s12492_s8 + $0xe0] sm:$0xff]   ;;  %v10500_v15 = vld [vmem:[%s12492_s8 + $0xe8] sm:$0xff]  }
 0x4eb   : > { %8693 = vst [vmem:[%s11823_s24 + $0x48] sm:$0xff] %v8653_v49   ;;  %v10501_v49 = vld [vmem:[%s12492_s8 + $0xf0] sm:$0xff]  }
 0x4ec   : > { %8692 = vst [vmem:[%s11823_s24 + $0x40] sm:$0xff] %v8648_v59   ;;  %v9666_v26 = vpop.f32.mrb[52].mxu0  ;;  %v10502_v59 = vld [vmem:[%s12492_s8 + $0xf8] sm:$0xff]  }
 0x4ed   : > { %v5275_v33 = vpop.f32.mrb[53].mxu0  ;;  %v5284_v16 = vadd.f32 %v9666_v26, %v11813_v37  ;;  %v10503_v26 = vld [vmem:[%s12492_s8 + $0x100] sm:$0xff]  }
 0x4ee   : > { %v9667_v46 = vpop.f32.mrb[54].mxu0  ;;  %v5276_v22 = vadd.f32 %v11813_v37, %v5275_v33 }
 0x4ef   : > { %v5287_v45 = vadd.f32 %v9667_v46, %v11813_v37  ;;  %v5278_v18 = vpop.f32.mrb[55].mxu0  ;;  %v10504_v46 = vld [vmem:[%s12492_s8 + $0x108] sm:$0xff]  }
 0x4f0   : > { %v5279_v30 = vadd.f32 %v11813_v37, %v5278_v18  ;;  %v10507_v18 = vld [vmem:[%s12492_s8 + $0x120] sm:$0xff]  }
 0x4f1   : > { %v8663_v44 = vpack.c.bf16 %v5287_v45, %v5284_v16  ;;  %v10505_v16 = vld [vmem:[%s12492_s8 + $0x110] sm:$0xff]   ;;  %v10506_v45 = vld [vmem:[%s12492_s8 + $0x118] sm:$0xff]  }
 0x4f2   : > { %v8658_v23 = vpack.c.bf16 %v5279_v30, %v5276_v22  ;;  %v10508_v22 = vld [vmem:[%s12492_s8 + $0x128] sm:$0xff]   ;;  %v10509_v30 = vld [vmem:[%s12492_s8 + $0x130] sm:$0xff]  }
 0x4f3   : > { %8695 = vst [vmem:[%s11823_s24 + $0x58] sm:$0xff] %v8663_v44   ;;  %v10510_v44 = vld [vmem:[%s12492_s8 + $0x138] sm:$0xff]  }
 0x4f4   : > { %8694 = vst [vmem:[%s11823_s24 + $0x50] sm:$0xff] %v8658_v23   ;;  %v9670_v57 = vpop.f32.mrb[56].mxu0  ;;  %v10511_v23 = vld [vmem:[%s12492_s8 + $0x140] sm:$0xff]  }
 0x4f5   : > { %v5291_v9 = vpop.f32.mrb[57].mxu0  ;;  %v5300_v17 = vadd.f32 %v9670_v57, %v11813_v37 }
 0x4f6   : > { %v9671_v41 = vpop.f32.mrb[58].mxu0  ;;  %v5292_v21 = vadd.f32 %v11813_v37, %v5291_v9  ;;  %v10512_v9 = vld [vmem:[%s12492_s8 + $0x148] sm:$0xff]  }
 0x4f7   : > { %v5303_v35 = vadd.f32 %v9671_v41, %v11813_v37  ;;  %v5294_v55 = vpop.f32.mrb[59].mxu0  ;;  %v10513_v41 = vld [vmem:[%s12492_s8 + $0x150] sm:$0xff]  }
 0x4f8   : > { %v5295_v5 = vadd.f32 %v11813_v37, %v5294_v55  ;;  %v10516_v55 = vld [vmem:[%s12492_s8 + $0x168] sm:$0xff]  }
 0x4f9   : > { %v8673_v0 = vpack.c.bf16 %v5303_v35, %v5300_v17  ;;  %v10514_v17 = vld [vmem:[%s12492_s8 + $0x158] sm:$0xff]   ;;  %v10515_v35 = vld [vmem:[%s12492_s8 + $0x160] sm:$0xff]  }
 0x4fa   : > { %v8668_v24 = vpack.c.bf16 %v5295_v5, %v5292_v21  ;;  %v10517_v21 = vld [vmem:[%s12492_s8 + $0x170] sm:$0xff]   ;;  %v10518_v5 = vld [vmem:[%s12492_s8 + $0x178] sm:$0xff]  }
 0x4fb   : > { %8697 = vst [vmem:[%s11823_s24 + $0x68] sm:$0xff] %v8673_v0   ;;  %v10519_v0 = vld [vmem:[%s12492_s8 + $0x180] sm:$0xff]  }
 0x4fc   : > { %8696 = vst [vmem:[%s11823_s24 + $0x60] sm:$0xff] %v8668_v24   ;;  %v9674_v19 = vpop.f32.mrb[60].mxu0 }
 0x4fd   : > { %v5307_v56 = vpop.f32.mrb[61].mxu0  ;;  %v5316_v28 = vadd.f32 %v9674_v19, %v11813_v37  ;;  %v10520_v19 = vld [vmem:[%s12492_s8 + $0x188] sm:$0xff]  }
 0x4fe   : > { %v9675_v3 = vpop.f32.mrb[62].mxu0  ;;  %v5308_v61 = vadd.f32 %v11813_v37, %v5307_v56  ;;  %v10521_v56 = vld [vmem:[%s12492_s8 + $0x190] sm:$0xff]  }
 0x4ff   : > { %v5319_v2 = vadd.f32 %v9675_v3, %v11813_v37  ;;  %v5310_v38 = vpop.f32.mrb[63].mxu0  ;;  %v12063_v3 = vld [vmem:[#allocation2] sm:$0xff] }
 0x500   : > { %v5311_v42 = vadd.f32 %v11813_v37, %v5310_v38  ;;  %v10480_v37 = vld [vmem:[%s12492_s8 + $0x48] sm:$0xff]   ;;  %v10525_v38 = vld [vmem:[%s12492_s8 + $0x1b0] sm:$0xff]  }
 0x501   : > { %v8683_v7 = vpack.c.bf16 %v5319_v2, %v5316_v28  ;;  %v10522_v28 = vld [vmem:[%s12492_s8 + $0x198] sm:$0xff]   ;;  %v10524_v2 = vld [vmem:[%s12492_s8 + $0x1a8] sm:$0xff]  }
 0x502   : > { %v8678_v58 = vpack.c.bf16 %v5311_v42, %v5308_v61  ;;  %v10526_v61 = vld [vmem:[%s12492_s8 + $0x1b8] sm:$0xff]   ;;  %v10527_v42 = vld [vmem:[%s12492_s8 + $0x1c0] sm:$0xff]  }
 0x503   : > { %8699 = vst [vmem:[%s11823_s24 + $0x78] sm:$0xff] %v8683_v7  }
 0x504   : > { %8698 = vst [vmem:[%s11823_s24 + $0x70] sm:$0xff] %v8678_v58   ;;  %v8980_v36 = vpop.f32.mrb[64].mxu0  ;;  %v10528_v58 = vld [vmem:[%s12492_s8 + $0x1c8] sm:$0xff]  }
 0x505   : > { %v8981_v25 = vpop.f32.mrb[65].mxu0 }
 0x506   : > { %v8982_v4 = vadd.f32 %v8981_v25, %v8980_v36  ;;  %v8983_v47 = vpop.f32.mrb[66].mxu0  ;;  %v10529_v36 = vld [vmem:[%s12492_s8 + $0x1d0] sm:$0xff]   ;;  %v10530_v25 = vld [vmem:[%s12492_s8 + $0x1d8] sm:$0xff]  }
 0x507   : > { %v8984_v10 = vpop.f32.mrb[67].mxu0 }
 0x508   : > { %v8985_v50 = vadd.f32 %v8984_v10, %v8983_v47  ;;  %v10532_v47 = vld [vmem:[%s12492_s8 + $0x1e8] sm:$0xff]   ;;  %v10533_v10 = vld [vmem:[%s12492_s8 + $0x1f0] sm:$0xff]  }
 0x50a   : > { %v11873_v13 = vpack.c.bf16 %v8985_v50, %v8982_v4  ;;  %v10531_v4 = vld [vmem:[%s12492_s8 + $0x1e0] sm:$0xff]   ;;  %v10534_v50 = vld [vmem:[%s12492_s8 + $0x1f8] sm:$0xff]  }
 0x50c   : > { %9693 = vmatmul.mubr.bf16.vlgmr.msra.gmra.mrb[68].mxu0 %v11873_v13  ;;  %v11910_v48 = vshrl.u32 %v11873_v13, 16  ;;  %v5818_v1 = vrot.slane %v11873_v13, 1  ;;  %v6034_v57 = vrot.slane %v11873_v13, 2  ;;  %v6250_v7 = vrot.slane %v11873_v13, 3 }
 0x50d   : > { %9697 = vmatpush3.bf16.msra.mxu0 %v10479_v43  ;;  %9712 = vmatprep.mubr.msk.bf16.mxu0 %vm10628_vm14, %v11674_v63  ;;  %v10535_v43 = vld [vmem:[%s12492_s8 + $0x200] sm:$0xff]  }
 0x50e   : > { %9698 = vmatprep.subr.bf16.mxu0 %v11674_v63  ;;  %v5926_v33 = vrot.slane %v11910_v48, 1  ;;  %v6142_v24 = vrot.slane %v11910_v48, 2 }
 0x511   : > { %9699 = vmatpush3.bf16.msra.mxu0 %v10480_v37  ;;  %v6358_v37 = vrot.slane %v11910_v48, 3 }
 0x512   : > { %9700 = vmatprep.subr.bf16.mxu0 %v11674_v63 }
 0x515   : > { %9701 = vmatpush3.bf16.msra.mxu0 %v10481_v29  ;;  %v10536_v29 = vld [vmem:[%s12492_s8 + $0x208] sm:$0xff]  }
 0x516   : > { %9702 = vmatprep.subr.bf16.mxu0 %v11674_v63 }
 0x519   : > { %9703 = vmatpush3.bf16.msra.mxu0 %v10482_v27  ;;  %v10537_v27 = vld [vmem:[%s12492_s8 + $0x210] sm:$0xff]  }
 0x51a   : > { %9704 = vmatprep.subr.bf16.mxu0 %v11674_v63 }
 0x51d   : > { %9705 = vmatpush3.bf16.msra.mxu0 %v10483_v52  ;;  %v10538_v52 = vld [vmem:[%s12492_s8 + $0x218] sm:$0xff]  }
 0x51e   : > { %9706 = vmatprep.subr.bf16.mxu0 %v11674_v63 }
 0x521   : > { %9707 = vmatpush3.bf16.msra.mxu0 %v10484_v62  ;;  %v10539_v62 = vld [vmem:[%s12492_s8 + $0x220] sm:$0xff]  }
 0x522   : > { %9708 = vmatprep.subr.bf16.mxu0 %v11674_v63 }
 0x525   : > { %9709 = vmatpush3.bf16.msra.mxu0 %v10485_v11  ;;  %v10540_v11 = vld [vmem:[%s12492_s8 + $0x228] sm:$0xff]  }
 0x526   : > { %9710 = vmatprep.subr.bf16.mxu0 %v11674_v63 }
 0x529   : > { %9711 = vmatpush3.bf16.msra.mxu0 %v10486_v39  ;;  %v10541_v39 = vld [vmem:[%s12492_s8 + $0x230] sm:$0xff]  }
 0x52a   : > { %9716 = vmatprep.subr.bf16.mxu0 %v11674_v63 }
 0x52c   : > { %9713 = vmatmul.mubr.bf16.vlgmr.msra.gmra.mrb[68].mxu0 %v11910_v48 }
 0x52d   : > { %9717 = vmatpush3.bf16.msra.mxu0 %v10487_v20  ;;  %9732 = vmatprep.mubr.msk.bf16.mxu0 %vm10628_vm14, %v11674_v63  ;;  %v10542_v20 = vld [vmem:[%s12492_s8 + $0x238] sm:$0xff]  }
 0x52e   : > { %9718 = vmatprep.subr.bf16.mxu0 %v11674_v63 }
 0x531   : > { %9719 = vmatpush3.bf16.msra.mxu0 %v10488_v31  ;;  %v10543_v31 = vld [vmem:[%s12492_s8 + $0x240] sm:$0xff]  }
 0x532   : > { %9720 = vmatprep.subr.bf16.mxu0 %v11674_v63 }
 0x535   : > { %9721 = vmatpush3.bf16.msra.mxu0 %v10489_v14  ;;  %v6466_v14 = vrot.slane %v11873_v13, 4 }
 0x536   : > { %9722 = vmatprep.subr.bf16.mxu0 %v11674_v63 }
 0x539   : > { %9723 = vmatpush3.bf16.msra.mxu0 %v10490_v53  ;;  %v10544_v53 = vld [vmem:[%s12492_s8 + $0x248] sm:$0xff]  }
 0x53a   : > { %9724 = vmatprep.subr.bf16.mxu0 %v11674_v63 }
 0x53d   : > { %9725 = vmatpush3.bf16.msra.mxu0 %v10491_v54  ;;  %v10545_v54 = vld [vmem:[%s12492_s8 + $0x250] sm:$0xff]  }
 0x53e   : > { %9726 = vmatprep.subr.bf16.mxu0 %v11674_v63 }
 0x541   : > { %9727 = vmatpush3.bf16.msra.mxu0 %v10492_v40  ;;  %v10546_v40 = vld [vmem:[%s12492_s8 + $0x258] sm:$0xff]  }
 0x542   : > { %9728 = vmatprep.subr.bf16.mxu0 %v11674_v63 }
 0x545   : > { %9729 = vmatpush3.bf16.msra.mxu0 %v10493_v6  ;;  %v10547_v6 = vld [vmem:[%s12492_s8 + $0x260] sm:$0xff]  }
 0x546   : > { %9730 = vmatprep.subr.bf16.mxu0 %v11674_v63 }
 0x549   : > { %9731 = vmatpush3.bf16.msra.mxu0 %v10494_v32  ;;  %v10548_v32 = vld [vmem:[%s12492_s8 + $0x268] sm:$0xff]  }
 0x54a   : > { %9736 = vmatprep.subr.bf16.mxu0 %v11674_v63 }
 0x54c   : > { %9733 = vmatmul.mubr.bf16.vlgmr.msra.gmra.mrb[68].mxu0 %v5818_v1  ;;  %v10550_v1 = vld [vmem:[%s12492_s8 + $0x278] sm:$0xff]  }
 0x54d   : > { %9737 = vmatpush3.bf16.msra.mxu0 %v10495_v8  ;;  %9752 = vmatprep.mubr.msk.bf16.mxu0 %vm10628_vm14, %v11674_v63  ;;  %v10549_v8 = vld [vmem:[%s12492_s8 + $0x270] sm:$0xff]  }
 0x54e   : > { %9738 = vmatprep.subr.bf16.mxu0 %v11674_v63 }
 0x551   : > { %9739 = vmatpush3.bf16.msra.mxu0 %v10496_v34  ;;  %v10551_v34 = vld [vmem:[%s12492_s8 + $0x280] sm:$0xff]  }
 0x552   : > { %9740 = vmatprep.subr.bf16.mxu0 %v11674_v63 }
 0x555   : > { %9741 = vmatpush3.bf16.msra.mxu0 %v10497_v51  ;;  %v6574_v51 = vrot.slane %v11910_v48, 4 }
 0x556   : > { %9742 = vmatprep.subr.bf16.mxu0 %v11674_v63 }
 0x559   : > { %9743 = vmatpush3.bf16.msra.mxu0 %v10498_v60  ;;  %v10552_v60 = vld [vmem:[%s12492_s8 + $0x288] sm:$0xff]  }
 0x55a   : > { %9744 = vmatprep.subr.bf16.mxu0 %v11674_v63 }
 0x55d   : > { %9745 = vmatpush3.bf16.msra.mxu0 %v10499_v12  ;;  %v10553_v12 = vld [vmem:[%s12492_s8 + $0x290] sm:$0xff]  }
 0x55e   : > { %9746 = vmatprep.subr.bf16.mxu0 %v11674_v63 }
 0x561   : > { %9747 = vmatpush3.bf16.msra.mxu0 %v10500_v15  ;;  %v10554_v15 = vld [vmem:[%s12492_s8 + $0x298] sm:$0xff]  }
 0x562   : > { %9748 = vmatprep.subr.bf16.mxu0 %v11674_v63 }
 0x565   : > { %9749 = vmatpush3.bf16.msra.mxu0 %v10501_v49  ;;  %v10555_v49 = vld [vmem:[%s12492_s8 + $0x2a0] sm:$0xff]  }
 0x566   : > { %9750 = vmatprep.subr.bf16.mxu0 %v11674_v63 }
 0x569   : > { %9751 = vmatpush3.bf16.msra.mxu0 %v10502_v59  ;;  %v10556_v59 = vld [vmem:[%s12492_s8 + $0x2a8] sm:$0xff]  }
 0x56a   : > { %9756 = vmatprep.subr.bf16.mxu0 %v11674_v63 }
 0x56c   : > { %9753 = vmatmul.mubr.bf16.vlgmr.msra.gmra.mrb[68].mxu0 %v5926_v33  ;;  %v10558_v33 = vld [vmem:[%s12492_s8 + $0x2b8] sm:$0xff]  }
 0x56d   : > { %9757 = vmatpush3.bf16.msra.mxu0 %v10503_v26  ;;  %9772 = vmatprep.mubr.msk.bf16.mxu0 %vm10628_vm14, %v11674_v63  ;;  %v10557_v26 = vld [vmem:[%s12492_s8 + $0x2b0] sm:$0xff]  }
 0x56e   : > { %9758 = vmatprep.subr.bf16.mxu0 %v11674_v63 }
 0x571   : > { %9759 = vmatpush3.bf16.msra.mxu0 %v10504_v46  ;;  %v10559_v46 = vld [vmem:[%s12492_s8 + $0x2c0] sm:$0xff]  }
 0x572   : > { %9760 = vmatprep.subr.bf16.mxu0 %v11674_v63 }
 0x575   : > { %9761 = vmatpush3.bf16.msra.mxu0 %v10505_v16  ;;  %v6682_v16 = vrot.slane %v11873_v13, 5 }
 0x576   : > { %9762 = vmatprep.subr.bf16.mxu0 %v11674_v63 }
 0x579   : > { %9763 = vmatpush3.bf16.msra.mxu0 %v10506_v45  ;;  %v10560_v45 = vld [vmem:[%s12492_s8 + $0x2c8] sm:$0xff]  }
 0x57a   : > { %9764 = vmatprep.subr.bf16.mxu0 %v11674_v63 }
 0x57d   : > { %9765 = vmatpush3.bf16.msra.mxu0 %v10507_v18  ;;  %v10561_v18 = vld [vmem:[%s12492_s8 + $0x2d0] sm:$0xff]  }
 0x57e   : > { %9766 = vmatprep.subr.bf16.mxu0 %v11674_v63 }
 0x581   : > { %9767 = vmatpush3.bf16.msra.mxu0 %v10508_v22  ;;  %v10562_v22 = vld [vmem:[%s12492_s8 + $0x2d8] sm:$0xff]  }
 0x582   : > { %9768 = vmatprep.subr.bf16.mxu0 %v11674_v63 }
 0x585   : > { %9769 = vmatpush3.bf16.msra.mxu0 %v10509_v30  ;;  %v10563_v30 = vld [vmem:[%s12492_s8 + $0x2e0] sm:$0xff]  }
 0x586   : > { %9770 = vmatprep.subr.bf16.mxu0 %v11674_v63 }
 0x589   : > { %9771 = vmatpush3.bf16.msra.mxu0 %v10510_v44  ;;  %v10564_v44 = vld [vmem:[%s12492_s8 + $0x2e8] sm:$0xff]  }
 0x58a   : > { %9776 = vmatprep.subr.bf16.mxu0 %v11674_v63 }
 0x58c   : > { %9773 = vmatmul.mubr.bf16.vlgmr.msra.gmra.mrb[68].mxu0 %v6034_v57  ;;  %v10566_v57 = vld [vmem:[%s12492_s8 + $0x2f8] sm:$0xff]  }
 0x58d   : > { %9777 = vmatpush3.bf16.msra.mxu0 %v10511_v23  ;;  %9792 = vmatprep.mubr.msk.bf16.mxu0 %vm10628_vm14, %v11674_v63  ;;  %v10565_v23 = vld [vmem:[%s12492_s8 + $0x2f0] sm:$0xff]  }
 0x58e   : > { %9778 = vmatprep.subr.bf16.mxu0 %v11674_v63 }
 0x591   : > { %9779 = vmatpush3.bf16.msra.mxu0 %v10512_v9  ;;  %v10567_v9 = vld [vmem:[%s12492_s8 + $0x300] sm:$0xff]  }
 0x592   : > { %9780 = vmatprep.subr.bf16.mxu0 %v11674_v63 }
 0x595   : > { %9781 = vmatpush3.bf16.msra.mxu0 %v10513_v41  ;;  %v6790_v41 = vrot.slane %v11910_v48, 5 }
 0x596   : > { %9782 = vmatprep.subr.bf16.mxu0 %v11674_v63 }
 0x599   : > { %9783 = vmatpush3.bf16.msra.mxu0 %v10514_v17  ;;  %v10599_v17 = vld [vmem:[%s12494_s10] sm:$0xff]  }
 0x59a   : > { %9784 = vmatprep.subr.bf16.mxu0 %v11674_v63  ;;  %9997 = vmatpush3.bf16.msra.mxu1 %v10599_v17 }
 0x59b   : > { %9998 = vmatprep.subr.bf16.mxu1 %v12063_v3 }
 0x59d   : > { %9785 = vmatpush3.bf16.msra.mxu0 %v10515_v35  ;;  %v10568_v35 = vld [vmem:[%s12492_s8 + $0x308] sm:$0xff]  }
 0x59e   : > { %9786 = vmatprep.subr.bf16.mxu0 %v11674_v63 }
 0x5a1   : > { %9787 = vmatpush3.bf16.msra.mxu0 %v10516_v55  ;;  %v10600_v55 = vld [vmem:[%s12494_s10 + $0x8] sm:$0xff]  }
 0x5a2   : > { %9788 = vmatprep.subr.bf16.mxu0 %v11674_v63  ;;  %9999 = vmatpush3.bf16.msra.mxu1 %v10600_v55 }
 0x5a3   : > { %10000 = vmatprep.subr.bf16.mxu1 %v12063_v3 }
 0x5a5   : > { %9789 = vmatpush3.bf16.msra.mxu0 %v10517_v21  ;;  %v10569_v21 = vld [vmem:[%s12492_s8 + $0x310] sm:$0xff]  }
 0x5a6   : > { %9790 = vmatprep.subr.bf16.mxu0 %v11674_v63 }
 0x5a9   : > { %9791 = vmatpush3.bf16.msra.mxu0 %v10518_v5  ;;  %v10601_v5 = vld [vmem:[%s12494_s10 + $0x10] sm:$0xff]  }
 0x5aa   : > { %9796 = vmatprep.subr.bf16.mxu0 %v11674_v63  ;;  %10001 = vmatpush3.bf16.msra.mxu1 %v10601_v5  ;;  %v7438_v5 = vld [vmem:[%s12497_s13] sm:$0x1] }
 0x5ab   : > { %10002 = vmatprep.subr.bf16.mxu1 %v12063_v3 }
 0x5ac   : > { %9793 = vmatmul.mubr.bf16.vlgmr.msra.gmra.mrb[68].mxu0 %v6142_v24  ;;  %v10602_v24 = vld [vmem:[%s12494_s10 + $0x18] sm:$0xff]  }
 0x5ad   : > { %9797 = vmatpush3.bf16.msra.mxu0 %v10519_v0  ;;  %9812 = vmatprep.mubr.msk.bf16.mxu0 %vm10628_vm14, %v11674_v63  ;;  %v10570_v0 = vld [vmem:[%s12492_s8 + $0x318] sm:$0xff]  }
 0x5ae   : > { %9798 = vmatprep.subr.bf16.mxu0 %v11674_v63  ;;  %v10523_v63 = vld [vmem:[%s12492_s8 + $0x1a0] sm:$0xff]   ;;  %10003 = vmatpush3.bf16.msra.mxu1 %v10602_v24 }
 0x5af   : > { %10004 = vmatprep.subr.bf16.mxu1 %v12063_v3 }
 0x5b1   : > { %9799 = vmatpush3.bf16.msra.mxu0 %v10520_v19  ;;  %v10571_v19 = vld [vmem:[%s12492_s8 + $0x320] sm:$0xff]  }
 0x5b2   : > { %9800 = vmatprep.subr.bf16.mxu0 %v12063_v3 }
 0x5b5   : > { %9801 = vmatpush3.bf16.msra.mxu0 %v10521_v56  ;;  %v10603_v56 = vld [vmem:[%s12494_s10 + $0x20] sm:$0xff]  }
 0x5b6   : > { %9802 = vmatprep.subr.bf16.mxu0 %v12063_v3  ;;  %10005 = vmatpush3.bf16.msra.mxu1 %v10603_v56 }
 0x5b7   : > { %10006 = vmatprep.subr.bf16.mxu1 %v12063_v3 }
 0x5b9   : > { %9803 = vmatpush3.bf16.msra.mxu0 %v10522_v28  ;;  %v10572_v28 = vld [vmem:[%s12492_s8 + $0x328] sm:$0xff]  }
 0x5ba   : > { %9804 = vmatprep.subr.bf16.mxu0 %v12063_v3 }
 0x5bd   : > { %9805 = vmatpush3.bf16.msra.mxu0 %v10523_v63  ;;  %v10604_v63 = vld [vmem:[%s12494_s10 + $0x28] sm:$0xff]  }
 0x5be   : > { %9806 = vmatprep.subr.bf16.mxu0 %v12063_v3  ;;  %10007 = vmatpush3.bf16.msra.mxu1 %v10604_v63 }
 0x5bf   : > { %10008 = vmatprep.subr.bf16.mxu1 %v12063_v3 }
 0x5c1   : > { %9807 = vmatpush3.bf16.msra.mxu0 %v10524_v2  ;;  %v10573_v2 = vld [vmem:[%s12492_s8 + $0x330] sm:$0xff]  }
 0x5c2   : > { %9808 = vmatprep.subr.bf16.mxu0 %v12063_v3 }
 0x5c5   : > { %9809 = vmatpush3.bf16.msra.mxu0 %v10525_v38  ;;  %v10605_v38 = vld [vmem:[%s12494_s10 + $0x30] sm:$0xff]  }
 0x5c6   : > { %9810 = vmatprep.subr.bf16.mxu0 %v12063_v3  ;;  %10009 = vmatpush3.bf16.msra.mxu1 %v10605_v38 }
 0x5c7   : > { %10010 = vmatprep.subr.bf16.mxu1 %v12063_v3 }
 0x5c9   : > { %9811 = vmatpush3.bf16.msra.mxu0 %v10526_v61  ;;  %v10574_v61 = vld [vmem:[%s12492_s8 + $0x338] sm:$0xff]  }
 0x5ca   : > { %9816 = vmatprep.subr.bf16.mxu0 %v12063_v3 }
 0x5cc   : > { %9813 = vmatmul.mubr.bf16.vlgmr.msra.gmra.mrb[68].mxu0 %v6250_v7  ;;  %v10575_v7 = vld [vmem:[%s12492_s8 + $0x340] sm:$0xff]  }
 0x5cd   : > { %9817 = vmatpush3.bf16.msra.mxu0 %v10527_v42  ;;  %9832 = vmatprep.mubr.msk.bf16.mxu0 %vm10628_vm14, %v12063_v3  ;;  %v10606_v42 = vld [vmem:[%s12494_s10 + $0x38] sm:$0xff]  }
 0x5ce   : > { %9818 = vmatprep.subr.bf16.mxu0 %v12063_v3  ;;  %10011 = vmatpush3.bf16.msra.mxu1 %v10606_v42 }
 0x5cf   : > { %10016 = vmatprep.subr.bf16.mxu1 %v12063_v3 }
 0x5d1   : > { %9819 = vmatpush3.bf16.msra.mxu0 %v10528_v58  ;;  %v6898_v58 = vrot.slane %v11873_v13, 6 }
 0x5d2   : > { %9820 = vmatprep.subr.bf16.mxu0 %v12063_v3 }
 0x5d5   : > { %9821 = vmatpush3.bf16.msra.mxu0 %v10529_v36  ;;  %v10576_v36 = vld [vmem:[%s12492_s8 + $0x348] sm:$0xff]  }
 0x5d6   : > { %9822 = vmatprep.subr.bf16.mxu0 %v12063_v3 }
 0x5d9   : > { %9823 = vmatpush3.bf16.msra.mxu0 %v10530_v25  ;;  %v10577_v25 = vld [vmem:[%s12492_s8 + $0x350] sm:$0xff]  }
 0x5da   : > { %9824 = vmatprep.subr.bf16.mxu0 %v12063_v3 }
 0x5dd   : > { %9825 = vmatpush3.bf16.msra.mxu0 %v10531_v4  ;;  %v10578_v4 = vld [vmem:[%s12492_s8 + $0x358] sm:$0xff]  }
 0x5de   : > { %9826 = vmatprep.subr.bf16.mxu0 %v12063_v3 }
 0x5e1   : > { %9827 = vmatpush3.bf16.msra.mxu0 %v10532_v47  ;;  %v10579_v47 = vld [vmem:[%s12492_s8 + $0x360] sm:$0xff]  }
 0x5e2   : > { %9828 = vmatprep.subr.bf16.mxu0 %v12063_v3 }
 0x5e5   : > { %9829 = vmatpush3.bf16.msra.mxu0 %v10533_v10  ;;  %v10580_v10 = vld [vmem:[%s12492_s8 + $0x368] sm:$0xff]  }
 0x5e6   : > { %9830 = vmatprep.subr.bf16.mxu0 %v12063_v3 }
 0x5e9   : > { %9831 = vmatpush3.bf16.msra.mxu0 %v10534_v50  ;;  %v10581_v50 = vld [vmem:[%s12492_s8 + $0x370] sm:$0xff]  }
 0x5ea   : > { %9836 = vmatprep.subr.bf16.mxu0 %v12063_v3 }
 0x5ec   : > { %9833 = vmatmul.mubr.bf16.vlgmr.msra.gmra.mrb[68].mxu0 %v6358_v37  ;;  %v10583_v37 = vld [vmem:[%s12492_s8 + $0x380] sm:$0xff]  }
 0x5ed   : > { %9837 = vmatpush3.bf16.msra.mxu0 %v10535_v43  ;;  %9852 = vmatprep.mubr.msk.bf16.mxu0 %vm10628_vm14, %v12063_v3  ;;  %v10582_v43 = vld [vmem:[%s12492_s8 + $0x378] sm:$0xff]  }
 0x5ee   : > { %9838 = vmatprep.subr.bf16.mxu0 %v12063_v3 }
 0x5f1   : > { %9839 = vmatpush3.bf16.msra.mxu0 %v10536_v29  ;;  %v7006_v29 = vrot.slane %v11910_v48, 6 }
 0x5f2   : > { %9840 = vmatprep.subr.bf16.mxu0 %v12063_v3 }
 0x5f5   : > { %9841 = vmatpush3.bf16.msra.mxu0 %v10537_v27  ;;  %v10584_v27 = vld [vmem:[%s12492_s8 + $0x388] sm:$0xff]  }
 0x5f6   : > { %9842 = vmatprep.subr.bf16.mxu0 %v12063_v3 }
 0x5f9   : > { %9843 = vmatpush3.bf16.msra.mxu0 %v10538_v52  ;;  %v10585_v52 = vld [vmem:[%s12492_s8 + $0x390] sm:$0xff]  }
 0x5fa   : > { %9844 = vmatprep.subr.bf16.mxu0 %v12063_v3 }
 0x5fd   : > { %9845 = vmatpush3.bf16.msra.mxu0 %v10539_v62  ;;  %v10586_v62 = vld [vmem:[%s12492_s8 + $0x398] sm:$0xff]  }
 0x5fe   : > { %9846 = vmatprep.subr.bf16.mxu0 %v12063_v3 }
 0x601   : > { %9847 = vmatpush3.bf16.msra.mxu0 %v10540_v11  ;;  %v10587_v11 = vld [vmem:[%s12492_s8 + $0x3a0] sm:$0xff]  }
 0x602   : > { %9848 = vmatprep.subr.bf16.mxu0 %v12063_v3 }
 0x605   : > { %9849 = vmatpush3.bf16.msra.mxu0 %v10541_v39  ;;  %v10588_v39 = vld [vmem:[%s12492_s8 + $0x3a8] sm:$0xff]  }
 0x606   : > { %9850 = vmatprep.subr.bf16.mxu0 %v12063_v3 }
 0x609   : > { %9851 = vmatpush3.bf16.msra.mxu0 %v10542_v20  ;;  %v10589_v20 = vld [vmem:[%s12492_s8 + $0x3b0] sm:$0xff]  }
 0x60a   : > { %9856 = vmatprep.subr.bf16.mxu0 %v12063_v3 }
 0x60c   : > { %9853 = vmatmul.mubr.bf16.vlgmr.msra.gmra.mrb[68].mxu0 %v6466_v14  ;;  %v10591_v14 = vld [vmem:[%s12492_s8 + $0x3c0] sm:$0xff]  }
 0x60d   : > { %9857 = vmatpush3.bf16.msra.mxu0 %v10543_v31  ;;  %9872 = vmatprep.mubr.msk.bf16.mxu0 %vm10628_vm14, %v12063_v3  ;;  %v10590_v31 = vld [vmem:[%s12492_s8 + $0x3b8] sm:$0xff]  }
 0x60e   : > { %9858 = vmatprep.subr.bf16.mxu0 %v12063_v3 }
 0x611   : > { %9859 = vmatpush3.bf16.msra.mxu0 %v10544_v53  ;;  %v7114_v53 = vrot.slane %v11873_v13, 7  ;;  %v10594_v13 = vld [vmem:[%s12492_s8 + $0x3d8] sm:$0xff]  }
 0x612   : > { %9860 = vmatprep.subr.bf16.mxu0 %v12063_v3 }
 0x615   : > { %9861 = vmatpush3.bf16.msra.mxu0 %v10545_v54  ;;  %v10592_v54 = vld [vmem:[%s12492_s8 + $0x3c8] sm:$0xff]  }
 0x616   : > { %9862 = vmatprep.subr.bf16.mxu0 %v12063_v3 }
 0x619   : > { %9863 = vmatpush3.bf16.msra.mxu0 %v10546_v40  ;;  %v10593_v40 = vld [vmem:[%s12492_s8 + $0x3d0] sm:$0xff]  }
 0x61a   : > { %9864 = vmatprep.subr.bf16.mxu0 %v12063_v3 }
 0x61d   : > { %9865 = vmatpush3.bf16.msra.mxu0 %v10547_v6  ;;  %v10595_v6 = vld [vmem:[%s12492_s8 + $0x3e0] sm:$0xff]  }
 0x61e   : > { %9866 = vmatprep.subr.bf16.mxu0 %v12063_v3 }
 0x621   : > { %9867 = vmatpush3.bf16.msra.mxu0 %v10548_v32  ;;  %v10596_v32 = vld [vmem:[%s12492_s8 + $0x3e8] sm:$0xff]  }
 0x622   : > { %9868 = vmatprep.subr.bf16.mxu0 %v12063_v3 }
 0x625   : > { %9869 = vmatpush3.bf16.msra.mxu0 %v10549_v8  ;;  %v10597_v8 = vld [vmem:[%s12492_s8 + $0x3f0] sm:$0xff]  }
 0x626   : > { %9870 = vmatprep.subr.bf16.mxu0 %v12063_v3 }
 0x629   : > { %9871 = vmatpush3.bf16.msra.mxu0 %v10550_v1  ;;  %v10598_v1 = vld [vmem:[%s12492_s8 + $0x3f8] sm:$0xff]  }
 0x62a   : > { %9876 = vmatprep.subr.bf16.mxu0 %v12063_v3 }
 0x62c   : > { %9873 = vmatmul.mubr.bf16.vlgmr.msra.gmra.mrb[68].mxu0 %v6574_v51  ;;  %v5584_v51 = vld [vmem:[%s12493_s9] sm:$0x1] }
 0x62d   : > { %9877 = vmatpush3.bf16.msra.mxu0 %v10551_v34  ;;  %9892 = vmatprep.mubr.msk.bf16.mxu0 %vm10628_vm14, %v12063_v3  ;;  %v7222_v34 = vrot.slane %v11910_v48, 7  ;;  %v10608_v48 = vld [vmem:[%s12496_s12 + $0x8] sm:$0xff]  }
 0x62e   : > { %9878 = vmatprep.subr.bf16.mxu0 %v12063_v3 }
 0x631   : > { %9879 = vmatpush3.bf16.msra.mxu0 %v10552_v60 }
 0x632   : > { %9880 = vmatprep.subr.bf16.mxu0 %v12063_v3 }
 0x635   : > { %9881 = vmatpush3.bf16.msra.mxu0 %v10553_v12 }
 0x636   : > { %9882 = vmatprep.subr.bf16.mxu0 %v12063_v3 }
 0x639   : > { %9883 = vmatpush3.bf16.msra.mxu0 %v10554_v15 }
 0x63a   : > { %9884 = vmatprep.subr.bf16.mxu0 %v12063_v3 }
 0x63d   : > { %9885 = vmatpush3.bf16.msra.mxu0 %v10555_v49 }
 0x63e   : > { %9886 = vmatprep.subr.bf16.mxu0 %v12063_v3 }
 0x641   : > { %9887 = vmatpush3.bf16.msra.mxu0 %v10556_v59 }
 0x642   : > { %9888 = vmatprep.subr.bf16.mxu0 %v12063_v3 }
 0x645   : > { %9889 = vmatpush3.bf16.msra.mxu0 %v10557_v26 }
 0x646   : > { %9890 = vmatprep.subr.bf16.mxu0 %v12063_v3 }
 0x649   : > { %9891 = vmatpush3.bf16.msra.mxu0 %v10558_v33  ;;  %v10607_v33 = vld [vmem:[%s12496_s12] sm:$0xff]  }
 0x64a   : > { %9896 = vmatprep.subr.bf16.mxu0 %v12063_v3 }
 0x64c   : > { %9893 = vmatmul.mubr.bf16.vlgmr.msra.gmra.mrb[68].mxu0 %v6682_v16  ;;  %v10609_v16 = vld [vmem:[%s12496_s12 + $0x10] sm:$0xff]  }
 0x64d   : > { %9897 = vmatpush3.bf16.msra.mxu0 %v10559_v46  ;;  %9912 = vmatprep.mubr.msk.bf16.mxu0 %vm10628_vm14, %v12063_v3 }
 0x64e   : > { %9898 = vmatprep.subr.bf16.mxu0 %v12063_v3 }
 0x651   : > { %9899 = vmatpush3.bf16.msra.mxu0 %v10560_v45  ;;  %v10610_v45 = vld [vmem:[%s12496_s12 + $0x18] sm:$0xff]  }
 0x652   : > { %9900 = vmatprep.subr.bf16.mxu0 %v12063_v3 }
 0x655   : > { %9901 = vmatpush3.bf16.msra.mxu0 %v10561_v18  ;;  %v10611_v18 = vld [vmem:[%s12496_s12 + $0x20] sm:$0xff]  }
 0x656   : > { %9902 = vmatprep.subr.bf16.mxu0 %v12063_v3 }
 0x659   : > { %9903 = vmatpush3.bf16.msra.mxu0 %v10562_v22  ;;  %v10612_v22 = vld [vmem:[%s12496_s12 + $0x28] sm:$0xff]  }
 0x65a   : > { %9904 = vmatprep.subr.bf16.mxu0 %v12063_v3 }
 0x65d   : > { %9905 = vmatpush3.bf16.msra.mxu0 %v10563_v30  ;;  %v10613_v30 = vld [vmem:[%s12496_s12 + $0x30] sm:$0xff]  }
 0x65e   : > { %9906 = vmatprep.subr.bf16.mxu0 %v12063_v3 }
 0x661   : > { %9907 = vmatpush3.bf16.msra.mxu0 %v10564_v44  ;;  %v10614_v44 = vld [vmem:[%s12496_s12 + $0x38] sm:$0xff]  }
 0x662   : > { %9908 = vmatprep.subr.bf16.mxu0 %v12063_v3 }
 0x665   : > { %9909 = vmatpush3.bf16.msra.mxu0 %v10565_v23  ;;  %v7331_v23 = vld [vmem:[%s12495_s11] sm:$0x1] }
 0x666   : > { %9910 = vmatprep.subr.bf16.mxu0 %v12063_v3 }
 0x669   : > { %9911 = vmatpush3.bf16.msra.mxu0 %v10566_v57 }
 0x66a   : > { %9916 = vmatprep.subr.bf16.mxu0 %v12063_v3 }
 0x66c   : > { %9913 = vmatmul.mubr.bf16.vlgmr.msra.gmra.mrb[68].mxu0 %v6790_v41 }
 0x66d   : > { %9917 = vmatpush3.bf16.msra.mxu0 %v10567_v9  ;;  %9932 = vmatprep.mubr.msk.bf16.mxu0 %vm10628_vm14, %v12063_v3 }
 0x66e   : > { %9918 = vmatprep.subr.bf16.mxu0 %v12063_v3 }
 0x671   : > { %9919 = vmatpush3.bf16.msra.mxu0 %v10568_v35 }
 0x672   : > { %9920 = vmatprep.subr.bf16.mxu0 %v12063_v3 }
 0x675   : > { %9921 = vmatpush3.bf16.msra.mxu0 %v10569_v21 }
 0x676   : > { %9922 = vmatprep.subr.bf16.mxu0 %v12063_v3 }
 0x679   : > { %9923 = vmatpush3.bf16.msra.mxu0 %v10570_v0  ;;  %v12688_v0 = vld [vmem:[#allocation4_spill] sm:$0xff] }
 0x67a   : > { %9924 = vmatprep.subr.bf16.mxu0 %v12063_v3 }
 0x67d   : > { %9925 = vmatpush3.bf16.msra.mxu0 %v10571_v19 }
 0x67e   : > { %9926 = vmatprep.subr.bf16.mxu0 %v12063_v3 }
 0x681   : > { %9927 = vmatpush3.bf16.msra.mxu0 %v10572_v28 }
 0x682   : > { %9928 = vmatprep.subr.bf16.mxu0 %v12063_v3 }
 0x685   : > { %9929 = vmatpush3.bf16.msra.mxu0 %v10573_v2 }
 0x686   : > { %9930 = vmatprep.subr.bf16.mxu0 %v12063_v3 }
 0x689   : > { %9931 = vmatpush3.bf16.msra.mxu0 %v10574_v61 }
 0x68a   : > { %9936 = vmatprep.subr.bf16.mxu0 %v12063_v3 }
 0x68c   : > { %9933 = vmatmul.mubr.bf16.vlgmr.msra.gmra.mrb[68].mxu0 %v6898_v58 }
 0x68d   : > { %9937 = vmatpush3.bf16.msra.mxu0 %v10575_v7  ;;  %9952 = vmatprep.mubr.msk.bf16.mxu0 %vm10628_vm14, %v12063_v3 }
 0x68e   : > { %9938 = vmatprep.subr.bf16.mxu0 %v12063_v3 }
 0x691   : > { %9939 = vmatpush3.bf16.msra.mxu0 %v10576_v36 }
 0x692   : > { %9940 = vmatprep.subr.bf16.mxu0 %v12063_v3 }
 0x695   : > { %9941 = vmatpush3.bf16.msra.mxu0 %v10577_v25 }
 0x696   : > { %9942 = vmatprep.subr.bf16.mxu0 %v12063_v3 }
 0x699   : > { %9943 = vmatpush3.bf16.msra.mxu0 %v10578_v4 }
 0x69a   : > { %9944 = vmatprep.subr.bf16.mxu0 %v12063_v3 }
 0x69d   : > { %9945 = vmatpush3.bf16.msra.mxu0 %v10579_v47 }
 0x69e   : > { %9946 = vmatprep.subr.bf16.mxu0 %v12063_v3 }
 0x6a1   : > { %9947 = vmatpush3.bf16.msra.mxu0 %v10580_v10 }
 0x6a2   : > { %9948 = vmatprep.subr.bf16.mxu0 %v12063_v3 }
 0x6a5   : > { %9949 = vmatpush3.bf16.msra.mxu0 %v10581_v50 }
 0x6a6   : > { %9950 = vmatprep.subr.bf16.mxu0 %v12063_v3 }
 0x6a9   : > { %9951 = vmatpush3.bf16.msra.mxu0 %v10582_v43 }
 0x6aa   : > { %9956 = vmatprep.subr.bf16.mxu0 %v12063_v3 }
 0x6ac   : > { %9953 = vmatmul.mubr.bf16.vlgmr.msra.gmra.mrb[68].mxu0 %v7006_v29 }
 0x6ad   : > { %9957 = vmatpush3.bf16.msra.mxu0 %v10583_v37  ;;  %9972 = vmatprep.mubr.msk.bf16.mxu0 %vm10628_vm14, %v12063_v3 }
 0x6ae   : > { %9958 = vmatprep.subr.bf16.mxu0 %v12063_v3 }
 0x6b1   : > { %9959 = vmatpush3.bf16.msra.mxu0 %v10584_v27 }
 0x6b2   : > { %9960 = vmatprep.subr.bf16.mxu0 %v12063_v3 }
 0x6b5   : > { %9961 = vmatpush3.bf16.msra.mxu0 %v10585_v52 }
 0x6b6   : > { %9962 = vmatprep.subr.bf16.mxu0 %v12063_v3 }
 0x6b9   : > { %9963 = vmatpush3.bf16.msra.mxu0 %v10586_v62 }
 0x6ba   : > { %9964 = vmatprep.subr.bf16.mxu0 %v12063_v3 }
 0x6bd   : > { %9965 = vmatpush3.bf16.msra.mxu0 %v10587_v11 }
 0x6be   : > { %9966 = vmatprep.subr.bf16.mxu0 %v12063_v3 }
 0x6c1   : > { %9967 = vmatpush3.bf16.msra.mxu0 %v10588_v39 }
 0x6c2   : > { %9968 = vmatprep.subr.bf16.mxu0 %v12063_v3 }
 0x6c5   : > { %9969 = vmatpush3.bf16.msra.mxu0 %v10589_v20 }
 0x6c6   : > { %9970 = vmatprep.subr.bf16.mxu0 %v12063_v3 }
 0x6c9   : > { %9971 = vmatpush3.bf16.msra.mxu0 %v10590_v31 }
 0x6ca   : > { %9976 = vmatprep.subr.bf16.mxu0 %v12063_v3 }
 0x6cc   : > { %9973 = vmatmul.mubr.bf16.vlgmr.msra.gmra.mrb[68].mxu0 %v7114_v53 }
 0x6cd   : > { %9977 = vmatpush3.bf16.msra.mxu0 %v10591_v14  ;;  %9992 = vmatprep.mubr.msk.bf16.mxu0 %vm10628_vm14, %v12063_v3 }
 0x6ce   : > { %9978 = vmatprep.subr.bf16.mxu0 %v12063_v3 }
 0x6d1   : > { %9979 = vmatpush3.bf16.msra.mxu0 %v10592_v54 }
 0x6d2   : > { %9980 = vmatprep.subr.bf16.mxu0 %v12063_v3 }
 0x6d5   : > { %9981 = vmatpush3.bf16.msra.mxu0 %v10593_v40 }
 0x6d6   : > { %9982 = vmatprep.subr.bf16.mxu0 %v12063_v3 }
 0x6d9   : > { %9983 = vmatpush3.bf16.msra.mxu0 %v10594_v13 }
 0x6da   : > { %9984 = vmatprep.subr.bf16.mxu0 %v12063_v3 }
 0x6dd   : > { %9985 = vmatpush3.bf16.msra.mxu0 %v10595_v6 }
 0x6de   : > { %9986 = vmatprep.subr.bf16.mxu0 %v12063_v3 }
 0x6e1   : > { %9987 = vmatpush3.bf16.msra.mxu0 %v10596_v32 }
 0x6e2   : > { %9988 = vmatprep.subr.bf16.mxu0 %v12063_v3 }
 0x6e5   : > { %9989 = vmatpush3.bf16.msra.mxu0 %v10597_v8 }
 0x6e6   : > { %9990 = vmatprep.subr.bf16.mxu0 %v12063_v3 }
 0x6e9   : > { %9991 = vmatpush3.bf16.msra.mxu0 %v10598_v1 }
 0x6ec   : > { %9993 = vmatmul.mubr.bf16.vlgmr.msra.gmra.mrb[68].mxu0 %v7222_v34 }
 0x7bf   : > { %v7306_v60 = vpop.f32.mrb[68].mxu0 }
 0x7c0   : > { %v10036_v12 = vadd.f32 %v7306_v60, %v5584_v51  ;;  %v9994_v15 = vpop.f32.mrb[69].mxu0 }
 0x7c1   : > { %v7309_v49 = vpop.f32.mrb[70].mxu0 }
 0x7c2   : > { %v7313_v59 = vmax.f32 %v10036_v12, 0.0  ;;  %v9995_v26 = vpop.f32.mrb[71].mxu0 }
 0x7c4   : > { %v7314_v46 = vpack.c.bf16 %v7313_v59, %v7313_v59 }
 0x7c6   : > { %10013 = vmatmul.mubr.bf16.vlgmr.msra.gmra.mrb[32].mxu1 %v7314_v46 }
 0x7c7   : > { %10017 = vmatpush3.bf16.msra.mxu1 %v10607_v33  ;;  %10032 = vmatprep.mubr.msk.bf16.mxu1 %vm10628_vm14, %v12063_v3 }
 0x7c8   : > { %10018 = vmatprep.subr.bf16.mxu1 %v12063_v3 }
 0x7cb   : > { %10019 = vmatpush3.bf16.msra.mxu1 %v10608_v48 }
 0x7cc   : > { %10020 = vmatprep.subr.bf16.mxu1 %v12063_v3 }
 0x7cf   : > { %10021 = vmatpush3.bf16.msra.mxu1 %v10609_v16 }
 0x7d0   : > { %10022 = vmatprep.subr.bf16.mxu1 %v12063_v3 }
 0x7d3   : > { %10023 = vmatpush3.bf16.msra.mxu1 %v10610_v45 }
 0x7d4   : > { %10024 = vmatprep.subr.bf16.mxu1 %v12063_v3 }
 0x7d7   : > { %10025 = vmatpush3.bf16.msra.mxu1 %v10611_v18 }
 0x7d8   : > { %10026 = vmatprep.subr.bf16.mxu1 %v12063_v3 }
 0x7db   : > { %10027 = vmatpush3.bf16.msra.mxu1 %v10612_v22 }
 0x7dc   : > { %10028 = vmatprep.subr.bf16.mxu1 %v12063_v3 }
 0x7df   : > { %10029 = vmatpush3.bf16.msra.mxu1 %v10613_v30 }
 0x7e0   : > { %10030 = vmatprep.subr.bf16.mxu1 %v12063_v3  ;;  %v7529_v3 = vsub.s32 0, %v12688_v0 }
 0x7e3   : > { %10031 = vmatpush3.bf16.msra.mxu1 %v10614_v44 }
 0x899   : > { %v7414_v57 = vpop.f32.mrb[32].mxu1 }
 0x89a   : > { %v7415_v9 = vadd.f32 %v7414_v57, %v7331_v23  ;;  %v10014_v41 = vpop.f32.mrb[33].mxu1 }
 0x89b   : > { %v7417_v17 = vpop.f32.mrb[34].mxu1 }
 0x89c   : > { %v7420_v35 = vmax.f32 %v7415_v9, 0.0  ;;  %v10015_v55 = vpop.f32.mrb[35].mxu1 }
 0x89e   : > { %v7421_v21 = vpack.c.bf16 %v7420_v35, %v7420_v35 }
 0x8a0   : > { %10033 = vmatmul.mubr.bf16.vlgmr.msra.gmra.mrb[36].mxu1 %v7421_v21 }
 0x973   : > { %v7521_v24 = vpop.f32.mrb[36].mxu1 }
 0x974   : > { %v7522_v19 = vadd.f32 %v7521_v24, %v7438_v5  ;;  %v10034_v56 = vpop.f32.mrb[37].mxu1 }
 0x975   : > { %v7524_v28 = vpop.f32.mrb[38].mxu1 }
 0x976   : > { %v7530_v63 = vrot.slane %v7522_v19, %v7529_v3  ;;  %v10035_v2 = vpop.f32.mrb[39].mxu1 }
 0x978   : > { %7531 = vst [vmem:[%s505_s20] sm:$0xff] %v7530_v63 }
 0x979 PF: > { %s26_s18 = sadd.s32 1, %s10623_s18  }
 0x97a   : > { %p23_p4 = scmp.ge.s32.totalorder %s26_s18, 4  }
 0x97c   :  { %25 = sbr.rel (!%p23_p4) target bundleno = 1 (0x1), region = 141 }

</bundles_post_ra>
